<compile_context>
chip_gen: v6e
topology: v6e:2x2x1
jax: 0.10.0
libtpu: 0.0.40
codegen_flags: <defaults>
</compile_context>

<pallas_src>
import numpy as np
import jax
import jax.numpy as jnp
from jax.experimental import pallas as pl
from jax.experimental.pallas import tpu as pltpu

_NPOS = 16     # 4x4 pooled positions
_KCONV = 128   # conv1 output channels (fixed by the module)
_F1 = 1024     # linear1 output features (fixed by the module)


def _aux_head_kernel(x_ref, p_ref, w1_ref, w2_ref, b2_ref, w3_ref, b3_ref,
                     o_ref, conv_ref):
    # x_ref   : (B*C, 196)    bf16 lane-dense input, row = b*C + c, col = h*14 + w
    # p_ref   : (196, 16)     bf16 constant AvgPool(5,3) matrix (cols = 4x4 positions)
    # w1_ref  : (C, 128)      bf16 1x1 conv weight (transposed)
    # w2_ref  : (2048, tn)    bf16 fc1 weight chunk (rows ordered (pos, conv_ch)),
    #                         leading chunk axis squeezed away by the BlockSpec
    # b2_ref  : (1, tn)       f32  fc1 bias chunk (conv bias folded in)
    # w3_ref  : (tn, O_pad)   bf16 fc2 weight chunk (rows = this fc1 chunk)
    # b3_ref  : (1, O_pad)    f32  fc2 bias (zero-padded)
    # o_ref   : (B, O_pad)    f32  output accumulator (resident across grid steps)
    # conv_ref: (B, 2048)     bf16 scratch: pooled+conv features, position-major
    step = pl.program_id(0)

    @pl.when(step == 0)
    def _():
        C = w1_ref.shape[0]
        B = x_ref.shape[0] // C
        npos = p_ref.shape[1]
        kc = w1_ref.shape[1]
        # AvgPool2d(5, stride=3): single MXU matmul against the pooling matrix.
        pooled = jnp.dot(x_ref[...], p_ref[...],
                         preferred_element_type=jnp.float32)            # (B*C, 16)
        # (b, c, p) -> (b*p, c) so one matmul handles all 16 spatial positions.
        # One-time small relayout, only at step 0.
        # TODO(synk): if x can arrive channels-last (B, 196, C) upstream, the pool
        #             matmul becomes lane-dense in C and this transpose disappears.
        pooled = pooled.reshape(B, C, npos).transpose(0, 2, 1).reshape(B * npos, C)
        # 1x1 conv (its bias is folded into the fc1 bias in the wrapper).
        conv = jnp.dot(pooled.astype(jnp.bfloat16), w1_ref[...],
                       preferred_element_type=jnp.float32)              # (B*16, 128)
        conv_ref[...] = conv.reshape(B, npos * kc).astype(jnp.bfloat16)
        # Initialize the output accumulator with the fc2 bias.
        o_ref[...] = jnp.broadcast_to(b3_ref[...], o_ref.shape)

    # fc1 chunk (one long-K matmul), ReLU, then this chunk's fc2 contribution.
    acc = jnp.dot(conv_ref[...], w2_ref[...],
                  preferred_element_type=jnp.float32)                    # (B, tn)
    h1 = jnp.maximum(acc + b2_ref[...], 0.0).astype(jnp.bfloat16)
    # Dropout(p=0.7) is identity in eval mode.
    # TODO(synk): training-mode dropout (random mask + 1/(1-p) scaling) not implemented.
    o_ref[...] += jnp.dot(h1, w3_ref[...], preferred_element_type=jnp.float32)


def _make_pool_matrix(h, w):
    """(h*w, 16) matrix implementing AvgPool2d(kernel=5, stride=3) on 14x14."""
    pm = np.zeros((h * w, _NPOS), dtype=np.float32)
    for i in range(4):
        for j in range(4):
            p = i * 4 + j
            for hh in range(i * 3, i * 3 + 5):
                for ww in range(j * 3, j * 3 + 5):
                    pm[hh * w + ww, p] = 1.0 / 25.0
    return jnp.asarray(pm)


def inception_classification(x, w_conv, b_conv, w_fc1, b_fc1, w_fc2, b_fc2,
                             *, block_f1=512):
    """Forward pass of InceptionClassifiction (eval mode).

    x      : (B, C, 14, 14) float32, NCHW
    w_conv : (128, C, 1, 1), b_conv: (128,)
    w_fc1  : (1024, 2048),   b_fc1: (1024,)
    w_fc2  : (O, 1024),      b_fc2: (O,)
    returns: (B, O) float32
    """
    B, C, H, W = x.shape
    assert (H, W) == (14, 14), "spatial size must be 14x14 (pool(5,3) -> 4x4)"
    K = w_conv.shape[0]
    F1 = w_fc1.shape[0]
    O = w_fc2.shape[0]
    assert K == _KCONV and F1 == _F1 and w_fc1.shape[1] == K * _NPOS
    assert F1 % block_f1 == 0 and block_f1 % 128 == 0
    # Keep >= 2 grid steps so the chunk-1 weight DMA overlaps step-0 compute.
    n_steps = F1 // block_f1

    hp = jax.lax.Precision.HIGHEST

    # ---- parameter plumbing (plain JAX glue, one-time) ----
    pool_mat = _make_pool_matrix(H, W).astype(jnp.bfloat16)              # (196, 16)
    x_flat = x.reshape(B * C, H * W).astype(jnp.bfloat16)                # lane-dense

    w1 = jnp.transpose(w_conv.reshape(K, C)).astype(jnp.bfloat16)        # (C, 128)

    # fc1 weight permuted to position-major input rows: row = (h*4 + w)*128 + c_out
    w2_f32 = (w_fc1.reshape(F1, K, 4, 4)
                    .transpose(2, 3, 1, 0)
                    .reshape(_NPOS * K, F1)
                    .astype(jnp.float32))                                # (2048, 1024)
    # Fold the conv bias into the fc1 bias:  sum_p (conv_p + b1) @ W2_p
    #   = conv_feat @ W2 + tile(b1, 16) @ W2.
    b2_eff = (b_fc1.astype(jnp.float32)
              + jnp.dot(jnp.tile(b_conv.astype(jnp.float32), _NPOS), w2_f32,
                        precision=hp)).reshape(1, F1)
    # Pre-chunk so every per-step fc1-weight DMA is one contiguous block.
    w2 = (w2_f32.astype(jnp.bfloat16)
                .reshape(_NPOS * K, n_steps, block_f1)
                .transpose(1, 0, 2))                                     # (n_steps, 2048, tn)

    # Pad the output dim to a lane-dense multiple of 128.
    O_pad = ((O + 127) // 128) * 128
    w3 = jnp.pad(jnp.transpose(w_fc2).astype(jnp.bfloat16),
                 ((0, 0), (0, O_pad - O)))                               # (1024, O_pad)
    b3 = jnp.pad(b_fc2.astype(jnp.float32), (0, O_pad - O)).reshape(1, O_pad)

    # Grid-invariant operands only need a single VMEM buffer.
    resident = pl.Buffered(1)

    # Explicit scoped-VMEM budget: resident operands once + pipelined chunks x2,
    # with ~2x headroom, clamped to [32 MiB, 64 MiB] (v7x physical ceiling).
    bytes_resident = ((x_flat.size + pool_mat.size + w1.size) * 2      # bf16
                      + b3.size * 4
                      + B * _NPOS * K * 2                              # conv scratch
                      + B * O_pad * 4)                                 # output acc
    bytes_pipelined = 2 * (_NPOS * K * block_f1 * 2                    # w2 chunk
                           + block_f1 * 4                              # b2 chunk
                           + block_f1 * O_pad * 2)                     # w3 chunk
    vmem_limit = int(min(max(2 * (bytes_resident + bytes_pipelined),
                             32 * 1024 * 1024), 64 * 1024 * 1024))

    grid_spec = pltpu.PrefetchScalarGridSpec(
        num_scalar_prefetch=0,
        grid=(n_steps,),
        in_specs=[
            pl.BlockSpec((B * C, H * W), lambda k: (0, 0),
                         pipeline_mode=resident),                       # x (resident)
            pl.BlockSpec((H * W, _NPOS), lambda k: (0, 0),
                         pipeline_mode=resident),                       # pool matrix
            pl.BlockSpec((C, K), lambda k: (0, 0),
                         pipeline_mode=resident),                       # conv weight
            pl.BlockSpec((None, _NPOS * K, block_f1),
                         lambda k: (k, 0, 0)),                          # fc1 W chunk
            pl.BlockSpec((1, block_f1), lambda k: (0, k)),              # fc1 b chunk
            pl.BlockSpec((block_f1, O_pad), lambda k: (k, 0)),          # fc2 W chunk
            pl.BlockSpec((1, O_pad), lambda k: (0, 0),
                         pipeline_mode=resident),                       # fc2 bias
        ],
        out_specs=pl.BlockSpec((B, O_pad), lambda k: (0, 0),
                               pipeline_mode=resident),                 # accumulator
        scratch_shapes=[pltpu.VMEM((B, _NPOS * K), jnp.bfloat16)],
    )

    out_pad = pl.pallas_call(
        _aux_head_kernel,
        out_shape=jax.ShapeDtypeStruct((B, O_pad), jnp.float32),
        grid_spec=grid_spec,
        compiler_params=pltpu.CompilerParams(
            dimension_semantics=("arbitrary",),
            vmem_limit_bytes=vmem_limit),
    )(x_flat, pool_mat, w1, w2, b2_eff, w3, b3)

    return out_pad[:, :O]


def _reference(x, w_conv, b_conv, w_fc1, b_fc1, w_fc2, b_fc2):
    """Pure-JAX f32 reference mirroring the PyTorch module (eval mode)."""
    B, C, _, _ = x.shape
    K = w_conv.shape[0]
    hp = jax.lax.Precision.HIGHEST
    pooled = jnp.stack([
        jnp.stack([
            jnp.mean(x[:, :, i * 3:i * 3 + 5, j * 3:j * 3 + 5], axis=(2, 3))
            for j in range(4)], axis=-1)
        for i in range(4)], axis=-2)                                     # (B, C, 4, 4)
    conv = (jnp.einsum('bchw,kc->bkhw', pooled, w_conv.reshape(K, C), precision=hp)
            + b_conv[None, :, None, None])
    feat = conv.reshape(B, -1)                                           # (B, 2048)
    h1 = jnp.maximum(jnp.dot(feat, w_fc1.T, precision=hp) + b_fc1, 0.0)
    return jnp.dot(h1, w_fc2.T, precision=hp) + b_fc2


if __name__ == "__main__":
    B, C, O = 2, 8, 16   # small in/out channels for the synthetic test
    key = jax.random.PRNGKey(0)
    kx, k1, k2, k3, k4, k5, k6 = jax.random.split(key, 7)

    x = jax.random.normal(kx, (B, C, 14, 14), dtype=jnp.float32)
    w_conv = jax.random.normal(k1, (128, C, 1, 1), dtype=jnp.float32) * 0.05
    b_conv = jax.random.normal(k2, (128,), dtype=jnp.float32) * 0.05
    w_fc1 = jax.random.normal(k3, (1024, 128 * 4 * 4), dtype=jnp.float32) * 0.02
    b_fc1 = jax.random.normal(k4, (1024,), dtype=jnp.float32) * 0.02
    w_fc2 = jax.random.normal(k5, (O, 1024), dtype=jnp.float32) * 0.02
    b_fc2 = jax.random.normal(k6, (O,), dtype=jnp.float32) * 0.02

    out = jax.block_until_ready(
        inception_classification(x, w_conv, b_conv, w_fc1, b_fc1, w_fc2, b_fc2))
    ref = jax.block_until_ready(
        _reference(x, w_conv, b_conv, w_fc1, b_fc1, w_fc2, b_fc2))

    assert out.shape == (B, O), out.shape
    # bf16 activations + weights -> slightly looser tolerance than pure f32.
    np.testing.assert_allclose(np.asarray(out), np.asarray(ref), rtol=2e-2, atol=2e-2)
    print("KERNEL_OK")
</pallas_src>

<mosaic_0001>
module attributes {stable_mosaic.version = 11 : i64} {
  func.func @_aux_head_kernel(%arg0: i32, %arg1: memref<16x196xbf16, #tpu.memory_space<vmem>>, %arg2: memref<196x16xbf16, #tpu.memory_space<vmem>>, %arg3: memref<8x128xbf16, #tpu.memory_space<vmem>>, %arg4: memref<1x2048x512xbf16, #tpu.memory_space<vmem>>, %arg5: memref<1x512xf32, #tpu.memory_space<vmem>>, %arg6: memref<512x128xbf16, #tpu.memory_space<vmem>>, %arg7: memref<1x128xf32, #tpu.memory_space<vmem>>, %arg8: memref<2x128xf32, #tpu.memory_space<vmem>>, %arg9: memref<2x2048xbf16, #tpu.memory_space<vmem>>) attributes {dimension_semantics = [#tpu.dimension_semantics<arbitrary>], iteration_bounds = array<i64: 2>, scalar_prefetch = 0 : i64, scratch_operands = 1 : i64, tpu.core_type = #tpu.core_type<tc>, window_params = [{pipeline_mode = #tpu.pipeline_mode<synchronous>, transform_indices = @transform_0, window_bounds = array<i64: 16, 196>}, {pipeline_mode = #tpu.pipeline_mode<synchronous>, transform_indices = @transform_1, window_bounds = array<i64: 196, 16>}, {pipeline_mode = #tpu.pipeline_mode<synchronous>, transform_indices = @transform_2, window_bounds = array<i64: 8, 128>}, {transform_indices = @transform_3, window_bounds = array<i64: 1, 2048, 512>}, {transform_indices = @transform_4, window_bounds = array<i64: 1, 512>}, {transform_indices = @transform_5, window_bounds = array<i64: 512, 128>}, {pipeline_mode = #tpu.pipeline_mode<synchronous>, transform_indices = @transform_6, window_bounds = array<i64: 1, 128>}, {pipeline_mode = #tpu.pipeline_mode<synchronous>, transform_indices = @transform_7, window_bounds = array<i64: 2, 128>}]} {
    %c0_i32 = arith.constant 0 : i32
    %0 = arith.cmpi eq, %arg0, %c0_i32 : i32
    %1 = arith.extui %0 : i1 to i32
    %c0_i32_0 = arith.constant 0 : i32
    %2 = arith.cmpi ne, %1, %c0_i32_0 : i32
    scf.if %2 {
      %c0_15 = arith.constant 0 : index
      %c0_16 = arith.constant 0 : index
      %18 = vector.load %arg1[%c0_15, %c0_16] : memref<16x196xbf16, #tpu.memory_space<vmem>>, vector<16x196xbf16>
      %c0_17 = arith.constant 0 : index
      %c0_18 = arith.constant 0 : index
      %19 = vector.load %arg2[%c0_17, %c0_18] : memref<196x16xbf16, #tpu.memory_space<vmem>>, vector<196x16xbf16>
      %cst_19 = arith.constant dense<0.000000e+00> : vector<16x16xf32>
      %20 = tpu.matmul %18, %19, %cst_19 {dimension_numbers = #tpu.dot_dimension_numbers<[1], [0], [0], [1], [0, 0, 1, 1], [], []>} : vector<16x196xbf16>, vector<196x16xbf16>, vector<16x16xf32> -> vector<16x16xf32>
      %21 = vector.shape_cast %20 : vector<16x16xf32> to vector<2x8x16xf32>
      %22 = tpu.transpose %21, [0, 2, 1] : vector<2x8x16xf32> -> vector<2x16x8xf32>
      %23 = vector.shape_cast %22 : vector<2x16x8xf32> to vector<32x8xf32>
      %24 = arith.truncf %23 : vector<32x8xf32> to vector<32x8xbf16>
      %c0_20 = arith.constant 0 : index
      %c0_21 = arith.constant 0 : index
      %25 = vector.load %arg3[%c0_20, %c0_21] : memref<8x128xbf16, #tpu.memory_space<vmem>>, vector<8x128xbf16>
      %cst_22 = arith.constant dense<0.000000e+00> : vector<32x128xf32>
      %26 = tpu.matmul %24, %25, %cst_22 {dimension_numbers = #tpu.dot_dimension_numbers<[1], [0], [0], [1], [0, 0, 1, 1], [], []>} : vector<32x8xbf16>, vector<8x128xbf16>, vector<32x128xf32> -> vector<32x128xf32>
      %27 = vector.shape_cast %26 : vector<32x128xf32> to vector<2x2048xf32>
      %28 = arith.truncf %27 : vector<2x2048xf32> to vector<2x2048xbf16>
      %c0_23 = arith.constant 0 : index
      %c0_24 = arith.constant 0 : index
      %29 = vector.load %arg9[%c0_23, %c0_24] : memref<2x2048xbf16, #tpu.memory_space<vmem>>, vector<2x2048xbf16>
      tpu.vector_store %arg9[%c0_23, %c0_24], %28 {strides = array<i32>} : memref<2x2048xbf16, #tpu.memory_space<vmem>>, vector<2x2048xbf16>,
      %c0_25 = arith.constant 0 : index
      %c0_26 = arith.constant 0 : index
      %30 = vector.load %arg7[%c0_25, %c0_26] : memref<1x128xf32, #tpu.memory_space<vmem>>, vector<1x128xf32>
      %31 = vector.shape_cast %30 : vector<1x128xf32> to vector<1x128xf32>
      %32 = vector.broadcast %31 : vector<1x128xf32> to vector<2x128xf32>
      %c0_27 = arith.constant 0 : index
      %c0_28 = arith.constant 0 : index
      %33 = vector.load %arg8[%c0_27, %c0_28] : memref<2x128xf32, #tpu.memory_space<vmem>>, vector<2x128xf32>
      tpu.vector_store %arg8[%c0_27, %c0_28], %32 {strides = array<i32>} : memref<2x128xf32, #tpu.memory_space<vmem>>, vector<2x128xf32>,
    } else {
    }
    %c0 = arith.constant 0 : index
    %c0_1 = arith.constant 0 : index
    %3 = vector.load %arg9[%c0, %c0_1] : memref<2x2048xbf16, #tpu.memory_space<vmem>>, vector<2x2048xbf16>
    %c0_2 = arith.constant 0 : index
    %c0_3 = arith.constant 0 : index
    %c0_4 = arith.constant 0 : index
    %4 = vector.load %arg4[%c0_2, %c0_3, %c0_4] : memref<1x2048x512xbf16, #tpu.memory_space<vmem>>, vector<1x2048x512xbf16>
    %5 = vector.shape_cast %4 : vector<1x2048x512xbf16> to vector<2048x512xbf16>
    %cst = arith.constant dense<0.000000e+00> : vector<2x512xf32>
    %6 = tpu.matmul %3, %5, %cst {dimension_numbers = #tpu.dot_dimension_numbers<[1], [0], [0], [1], [0, 0, 1, 1], [], []>} : vector<2x2048xbf16>, vector<2048x512xbf16>, vector<2x512xf32> -> vector<2x512xf32>
    %c0_5 = arith.constant 0 : index
    %c0_6 = arith.constant 0 : index
    %7 = vector.load %arg5[%c0_5, %c0_6] : memref<1x512xf32, #tpu.memory_space<vmem>>, vector<1x512xf32>
    %8 = vector.broadcast %7 : vector<1x512xf32> to vector<2x512xf32>
    %9 = arith.addf %6, %8 : vector<2x512xf32>
    %cst_7 = arith.constant 0.000000e+00 : f32
    %10 = vector.broadcast %cst_7 : f32 to vector<2x512xf32>
    %11 = arith.maximumf %9, %10 : vector<2x512xf32>
    %12 = arith.truncf %11 : vector<2x512xf32> to vector<2x512xbf16>
    %c0_8 = arith.constant 0 : index
    %c0_9 = arith.constant 0 : index
    %13 = vector.load %arg8[%c0_8, %c0_9] : memref<2x128xf32, #tpu.memory_space<vmem>>, vector<2x128xf32>
    %c0_10 = arith.constant 0 : index
    %c0_11 = arith.constant 0 : index
    %14 = vector.load %arg6[%c0_10, %c0_11] : memref<512x128xbf16, #tpu.memory_space<vmem>>, vector<512x128xbf16>
    %cst_12 = arith.constant dense<0.000000e+00> : vector<2x128xf32>
    %15 = tpu.matmul %12, %14, %cst_12 {dimension_numbers = #tpu.dot_dimension_numbers<[1], [0], [0], [1], [0, 0, 1, 1], [], []>} : vector<2x512xbf16>, vector<512x128xbf16>, vector<2x128xf32> -> vector<2x128xf32>
    %16 = arith.addf %13, %15 : vector<2x128xf32>
    %c0_13 = arith.constant 0 : index
    %c0_14 = arith.constant 0 : index
    %17 = vector.load %arg8[%c0_13, %c0_14] : memref<2x128xf32, #tpu.memory_space<vmem>>, vector<2x128xf32>
    tpu.vector_store %arg8[%c0_13, %c0_14], %16 {strides = array<i32>} : memref<2x128xf32, #tpu.memory_space<vmem>>, vector<2x128xf32>,
    return
  }
  func.func @transform_0(%arg0: i32) -> (i32, i32) {
    %c0_i32 = arith.constant 0 : i32
    %c0_i32_0 = arith.constant 0 : i32
    %c0_i32_1 = arith.constant 0 : i32
    return %c0_i32, %c0_i32_0 : i32, i32
  }
  func.func @transform_1(%arg0: i32) -> (i32, i32) {
    %c0_i32 = arith.constant 0 : i32
    %c0_i32_0 = arith.constant 0 : i32
    %c0_i32_1 = arith.constant 0 : i32
    return %c0_i32, %c0_i32_0 : i32, i32
  }
  func.func @transform_2(%arg0: i32) -> (i32, i32) {
    %c0_i32 = arith.constant 0 : i32
    %c0_i32_0 = arith.constant 0 : i32
    %c0_i32_1 = arith.constant 0 : i32
    return %c0_i32, %c0_i32_0 : i32, i32
  }
  func.func @transform_3(%arg0: i32) -> (i32, i32, i32) {
    %c0_i32 = arith.constant 0 : i32
    %c0_i32_0 = arith.constant 0 : i32
    %c0_i32_1 = arith.constant 0 : i32
    return %arg0, %c0_i32, %c0_i32_0 : i32, i32, i32
  }
  func.func @transform_4(%arg0: i32) -> (i32, i32) {
    %c0_i32 = arith.constant 0 : i32
    %c0_i32_0 = arith.constant 0 : i32
    return %c0_i32, %arg0 : i32, i32
  }
  func.func @transform_5(%arg0: i32) -> (i32, i32) {
    %c0_i32 = arith.constant 0 : i32
    %c0_i32_0 = arith.constant 0 : i32
    return %arg0, %c0_i32 : i32, i32
  }
  func.func @transform_6(%arg0: i32) -> (i32, i32) {
    %c0_i32 = arith.constant 0 : i32
    %c0_i32_0 = arith.constant 0 : i32
    %c0_i32_1 = arith.constant 0 : i32
    return %c0_i32, %c0_i32_0 : i32, i32
  }
  func.func @transform_7(%arg0: i32) -> (i32, i32) {
    %c0_i32 = arith.constant 0 : i32
    %c0_i32_0 = arith.constant 0 : i32
    %c0_i32_1 = arith.constant 0 : i32
    return %c0_i32, %c0_i32_0 : i32, i32
  }
}

</mosaic_0001>

<bundles_post_ra>
// kernel: tpu_custom_call.1
= control target key start
LH: loop header
LB: loop body
LE: loop exit
PB: predicated region body
PF: predicated region fallthrough
CT: control target
= control target key end

     0   :  { %s8136_s0 = inlined_call_operand.hbm [shape: bf16[16,196], index: 0, kind: input, shape index: {}]   ;;  %s8137_s1 = inlined_call_operand.vmem [shape: bf16[196,16], index: 1, kind: input, shape index: {}]   ;;  %s8138_s2 = inlined_call_operand.hbm [shape: bf16[8,128], index: 2, kind: input, shape index: {}]   ;;  %s8139_s3 = inlined_call_operand.hbm [shape: bf16[2,2048,512], index: 3, kind: input, shape index: {}]   ;;  %s8140_s4 = inlined_call_operand.hbm [shape: f32[1,1024], index: 4, kind: input, shape index: {}]   ;;  %s8141_s5 = inlined_call_operand.hbm [shape: bf16[1024,128], index: 5, kind: input, shape index: {}]   ;;  %s8142_s6 = inlined_call_operand.hbm [shape: f32[1,128], index: 6, kind: input, shape index: {}]   ;;  %s8143_s7 = inlined_call_operand.hbm [shape: f32[2,128], index: 7, kind: output, shape index: {}]  }
   0x1   :  { %8154 = sst [smem:[#allocation21_spill]] %s8136_s0 }
   0x2   :  { %8155 = sst [smem:[#allocation22_spill]] %s8139_s3 }
   0x3   :  { %12 = vsyncpa [#allocation4], 0 }
   0x4   :  { %13 = vsyncpa [#allocation7], 0 }
   0x5   :  { %14 = vsyncpa [#allocation5], 0  ;;  %s7167_s24 = smov 0   ;;  %s7169_s25 = smov 0  }
   0x6   :  { %s7171_s26 = smov 0   ;;  %s7173_s27 = smov 0  }
   0x7 LB: > { %8156 = sst [smem:[#allocation18_spill]] %s7105_s26  ;;  %s7186_s28 = sadd.s32 4294967295, %s7109_s27   ;;  %s7109_s27 = sphi %s7173_s27, %s8180_s27   ;;  %s7105_s26 = sphi %s7171_s26, %s8182_s26   ;;  %s7101_s25 = sphi %s7169_s25, %s8184_s25   ;;  %s7097_s24 = sphi %s7167_s24, %s8183_s24  }
   0x8   : > { %s7189_s29 = sadd.s32 1, %s7109_s27   ;;  %s90_s8 = sadd.s32 1, %s7105_s26 }
   0x9   : > { %8157 = sst [smem:[#allocation19_spill]] %s7189_s29  ;;  %s87_s30 = ssub.s32 %s7109_s27, %s7189_s29 }
   0xa   : > { %p88_p0 = scmp.eq.s32.totalorder %s87_s30, 0  ;;  %p97_p1 = scmp.ne.s32.totalorder %s7105_s26, %s7101_s25 }
   0xb   : > { %p98_p2 = scmp.eq.s32.totalorder %s7109_s27, 0  ;;  %p103_p3 = scmp.ne.s32.totalorder %s7101_s25, %s7097_s24 }
   0xc   : > { %s7199_s9 = scalar_select %p88_p0, %s7105_s26, %s90_s8  }
   0xd   : > { %p7201_p4 = por %p98_p2, %p97_p1  ;;  %p8144_p5 = scmp.eq.s32.totalorder %s7186_s28, 0 }
   0xe   : > { %8158 = sst [smem:[#allocation20_spill]] %s7199_s9  ;;  %p5291_p6 = scmp.ge.s32.totalorder %s7109_s27, 1 }
   0xf   : > { %p208_p7 = scmp.lt.s32.totalorder %s7109_s27, 3  ;;  %p7210_p8 = por %p8144_p5, %p103_p3 }
  0x10   : > { %s7111_s13 = smov [#allocation3]   ;;  %p5990_p13 = scmp.lt.s32.totalorder %s7109_s27, 2 }
  0x11   : > { %s8160_s11 = scalar_select %p7210_p8, 1, 0 }
  0x12   : > { %p7215_p10 = pnand %p5291_p6, %p208_p7  ;;  %s220_s14 = sshll.u32 %s7111_s13, 4  ;;  %s221_s14 = int_to_ptr.vmem [resolvable:$true] %s220_s14 }
  0x13   : > { %s259_s16 = sand.u32 1, %s7109_s27   ;;  %s7230_s17 = sand.u32 1, %s7105_s26  }
  0x14   : > { %s8161_s12 = scalar_select %p7215_p10, 1, 0 }
  0x15   : > { %p5967_p11 = pneg %p7215_p10  ;;  %p7234_p0 = pnand %p5990_p13, %p7201_p4 }
  0x16   : > { %s6884_s19 = scalar_lea.vmem %s221_s14, 256  ;;  %p6892_p7 = scmp.lt.s32.totalorder %s221_s14, %s221_s14 }
  0x17   : > { %p7223_p12 = pnand %p5967_p11, %p8144_p5  ;;  %p6885_p2 = scmp.ne.s32.totalorder %s221_s14, %s6884_s19 }
  0x18   : > { %p6893_p11 = scmp.lt.s32.totalorder %s6884_s19, %s6884_s19 }
  0x19   : > { %s8162_s15 = scalar_select %p7223_p12, 1, 0 }
  0x1a   : > { %p8148_p1 = pneg %p7223_p12  ;;  %p6894_p9 = por %p6893_p11, %p6892_p7 }
  0x1c   : > { %p6887_p3 = pnand %p6885_p2, %p8148_p1 }
  0x1e   : > { %p6888_p6 = pneg %p6887_p3 }
  0x20   : > { %p6895_p5 = pnand %p6894_p9, %p6888_p6 }
  0x22   : > { %6898 = shalt.err (!%p6895_p5)
}
  0x23   : > { %s7112_s20 = smov 128   ;;  %s7113_s21 = smov 8  }
  0x24   : > { %s8164_s0 = sld [smem:[#allocation21_spill]]  ;;  %s5296_s24 = sshll.u32 %s7230_s17, 12 }
  0x25   : > { %s5888_s30 = sshll.u32 %s7109_s27, 16  ;;  %s8165_s3 = sld [smem:[#allocation22_spill]] }
  0x26   : > { %s263_s19 = scalar_lea.vmem [#allocation8], %s5296_s24  ;;  %s7257_s26 = scalar_lea.sflag [#allocation4], %s259_s16 }
  0x27   : > { %s270_s9 = sshll.u32 %s263_s19, 4  ;;  %p7263_p5 = pneg %p7234_p0  ;;  %s7255_s9 = int_to_ptr.vmem [resolvable:$true] %s270_s9 }
  0x2a   : > { %5970 = dma.hbm_to_vmem [thread:$0]  (!%p7223_p12), %s8164_s0, 256, %s221_s14, [#allocation4], %s7112_s20, %s7112_s20, %s7113_s21  }
  0x2b   : > { %s7253_s13 = scalar_lea.hbm %s8165_s3, %s5888_s30  ;;  %s6904_s22 = scalar_lea.hbm %s8165_s3, 131072 }
  0x2c   : > { %s6899_s29 = scalar_lea.hbm %s7253_s13, 65536  ;;  %p6905_p2 = scmp.lt.s32.totalorder %s7253_s13, %s8165_s3 }
  0x2d   : > { %p6900_p4 = scmp.ne.s32.totalorder %s7253_s13, %s6899_s29  ;;  %p6906_p3 = scmp.lt.s32.totalorder %s6904_s22, %s6899_s29 }
  0x2f   : > { %p6902_p9 = pnand %p7263_p5, %p6900_p4  ;;  %p6907_p6 = por %p6906_p3, %p6905_p2 }
  0x31   : > { %p6903_p13 = pneg %p6902_p9 }
  0x33   : > { %p6908_p7 = pnand %p6907_p6, %p6903_p13 }
  0x35   : > { %6911 = shalt.err (!%p6908_p7)
}
  0x36   : > { %s6912_s16 = scalar_lea.vmem %s7255_s9, 65536  ;;  %s7114_s30 = smov [#allocation8]  }
  0x37   : > { %p6913_p11 = scmp.ne.s32.totalorder %s7255_s9, %s6912_s16  ;;  %s6917_s8 = sshll.u32 %s7114_s30, 4  ;;  %s6918_s8 = int_to_ptr.vmem [resolvable:$false] %s6917_s8 }
  0x38   : > { %s6919_s10 = scalar_lea.vmem %s6918_s8, 131072  ;;  %p6920_p1 = scmp.lt.s32.totalorder %s7255_s9, %s6918_s8 }
  0x39   : > { %p6915_p4 = pnand %p6913_p11, %p7263_p5  ;;  %p6921_p8 = scmp.lt.s32.totalorder %s6919_s10, %s6912_s16 }
  0x3b   : > { %p6916_p9 = pneg %p6915_p4  ;;  %p6922_p10 = por %p6921_p8, %p6920_p1 }
  0x3d   : > { %p6923_p12 = pnand %p6922_p10, %p6916_p9 }
  0x3f   : > { %6926 = shalt.err (!%p6923_p12)
}
  0x40   : > { %s7115_s29 = smov 256   ;;  %s7116_s19 = smov 16  }
  0x41   : > { %5980 = dma.hbm_to_vmem [thread:$0]  (!%p7234_p0), %s7253_s13, 65536, %s7255_s9, %s7257_s26, %s7115_s29, %s7115_s29, %s7116_s19  }
  0x42   : > { %s5299_s20 = sshll.u32 %s7230_s17, 2  ;;  %s7117_s21 = smov [#allocation6]  }
  0x43   : > { %s237_s22 = sshll.u32 %s7117_s21, 4  ;;  %s5889_s23 = sshll.u32 %s7109_s27, 6  ;;  %s238_s22 = int_to_ptr.vmem [resolvable:$true] %s237_s22 }
  0x44   : > { %s6938_s24 = scalar_lea.vmem %s238_s22, 64  ;;  %p8167_p10 = scmp.ne.s32.totalorder %s8162_s15, 0 }
  0x45   : > { %p6939_p8 = scmp.ne.s32.totalorder %s238_s22, %s6938_s24  ;;  %p6946_p2 = scmp.lt.s32.totalorder %s238_s22, %s238_s22 }
  0x46   : > { %p8168_p12 = pneg %p8167_p10  ;;  %p6947_p3 = scmp.lt.s32.totalorder %s6938_s24, %s6938_s24 }
  0x48   : > { %p6941_p1 = pnand %p6939_p8, %p8168_p12  ;;  %p6948_p6 = por %p6947_p3, %p6946_p2 }
  0x4a   : > { %p6942_p13 = pneg %p6941_p1 }
  0x4c   : > { %p6949_p7 = pnand %p6948_p6, %p6942_p13 }
  0x4e   : > { %6952 = shalt.err (!%p6949_p7)
}
  0x4f   : > { %5973 = dma.hbm_to_vmem [thread:$0]  (!%p8167_p10), %s8138_s2, 64, %s238_s22, [#allocation7]  }
  0x50   : > { %s290_s8 = scalar_lea.hbm %s8140_s4, %s5889_s23  ;;  %s284_s10 = scalar_lea.vmem [#allocation9], %s5299_s20 }
  0x51   : > { %s292_s29 = sshll.u32 %s284_s10, 4  ;;  %s6953_s19 = scalar_lea.hbm %s290_s8, 64  ;;  %s293_s29 = int_to_ptr.vmem [resolvable:$true] %s292_s29 }
  0x52   : > { %p6954_p11 = scmp.ne.s32.totalorder %s290_s8, %s6953_s19  ;;  %s6958_s0 = scalar_lea.hbm %s8140_s4, 128 }
  0x53   : > { %p6959_p8 = scmp.lt.s32.totalorder %s290_s8, %s8140_s4  ;;  %p6960_p12 = scmp.lt.s32.totalorder %s6958_s0, %s6953_s19 }
  0x54   : > { %p6956_p4 = pnand %p6954_p11, %p7263_p5 }
  0x55   : > { %p6961_p1 = por %p6960_p12, %p6959_p8 }
  0x56   : > { %p6957_p9 = pneg %p6956_p4 }
  0x58   : > { %p6962_p13 = pnand %p6961_p1, %p6957_p9 }
  0x5a   : > { %6965 = shalt.err (!%p6962_p13)
}
  0x5b   : > { %s6966_s20 = scalar_lea.vmem %s293_s29, 64  ;;  %s7118_s22 = smov [#allocation9]  }
  0x5c   : > { %p6967_p2 = scmp.ne.s32.totalorder %s293_s29, %s6966_s20  ;;  %s6971_s23 = sshll.u32 %s7118_s22, 4  ;;  %s6972_s23 = int_to_ptr.vmem [resolvable:$false] %s6971_s23 }
  0x5d   : > { %s6973_s9 = scalar_lea.vmem %s6972_s23, 128  ;;  %p6974_p7 = scmp.lt.s32.totalorder %s293_s29, %s6972_s23 }
  0x5e   : > { %p6969_p3 = pnand %p6967_p2, %p7263_p5  ;;  %p6975_p11 = scmp.lt.s32.totalorder %s6973_s9, %s6966_s20 }
  0x60   : > { %p6970_p6 = pneg %p6969_p3  ;;  %p6976_p4 = por %p6975_p11, %p6974_p7 }
  0x62   : > { %p6977_p10 = pnand %p6976_p4, %p6970_p6 }
  0x64   : > { %6980 = shalt.err (!%p6977_p10)
}
  0x65   : > { %5983 = dma.hbm_to_vmem [thread:$0]  (!%p7234_p0), %s290_s8, 64, %s293_s29, %s7257_s26  }
  0x66   : > { %s7119_s0 = smov [#allocation11]   ;;  %s5302_s13 = sshll.u32 %s7230_s17, 8 }
  0x67   : > { %s248_s3 = sshll.u32 %s7119_s0, 4  ;;  %p8169_p8 = scmp.ne.s32.totalorder %s8162_s15, 0  ;;  %s249_s3 = int_to_ptr.vmem [resolvable:$true] %s248_s3 }
  0x68   : > { %s6992_s30 = scalar_lea.vmem %s249_s3, 16  ;;  %s6999_s10 = scalar_lea.vmem %s249_s3, 32 }
  0x69   : > { %p6993_p9 = scmp.ne.s32.totalorder %s249_s3, %s6992_s30  ;;  %p8170_p12 = pneg %p8169_p8 }
  0x6a   : > { %p7000_p2 = scmp.lt.s32.totalorder %s249_s3, %s249_s3  ;;  %p7001_p3 = scmp.lt.s32.totalorder %s6999_s10, %s6992_s30 }
  0x6b   : > { %p6995_p1 = pnand %p6993_p9, %p8170_p12 }
  0x6c   : > { %p7002_p10 = por %p7001_p3, %p7000_p2 }
  0x6d   : > { %p6996_p13 = pneg %p6995_p1 }
  0x6f   : > { %p7003_p6 = pnand %p7002_p10, %p6996_p13 }
  0x71   : > { %7006 = shalt.err (!%p7003_p6)
}
  0x72   : > { %5976 = dma.hbm_to_vmem [thread:$0]  (!%p8169_p8), %s8142_s6, 16, %s249_s3, [#allocation7]  }
  0x73   : > { %s5890_s17 = sshll.u32 %s7109_s27, 12  ;;  %s303_s29 = scalar_lea.vmem [#allocation10], %s5302_s13 }
  0x74   : > { %s310_s21 = sshll.u32 %s303_s29, 4  ;;  %s7325_s20 = scalar_lea.hbm %s8141_s5, %s5890_s17  ;;  %s7327_s21 = int_to_ptr.vmem [resolvable:$true] %s310_s21 }
  0x75   : > { %s7007_s15 = scalar_lea.hbm %s7325_s20, 4096  ;;  %s7012_s27 = scalar_lea.hbm %s8141_s5, 8192 }
  0x76   : > { %p7008_p7 = scmp.ne.s32.totalorder %s7325_s20, %s7007_s15  ;;  %p7013_p9 = scmp.lt.s32.totalorder %s7325_s20, %s8141_s5 }
  0x77   : > { %p7014_p8 = scmp.lt.s32.totalorder %s7012_s27, %s7007_s15 }
  0x78   : > { %p7010_p11 = pnand %p7008_p7, %p7263_p5 }
  0x79   : > { %p7015_p12 = por %p7014_p8, %p7013_p9 }
  0x7a   : > { %p7011_p4 = pneg %p7010_p11 }
  0x7c   : > { %p7016_p1 = pnand %p7015_p12, %p7011_p4 }
  0x7e   : > { %7019 = shalt.err (!%p7016_p1)
}
  0x7f   : > { %s7020_s3 = scalar_lea.vmem %s7327_s21, 4096  ;;  %s7120_s13 = smov [#allocation10]  }
  0x80   : > { %p7021_p13 = scmp.ne.s32.totalorder %s7327_s21, %s7020_s3  ;;  %s7025_s30 = sshll.u32 %s7120_s13, 4  ;;  %s7026_s30 = int_to_ptr.vmem [resolvable:$false] %s7025_s30 }
  0x81   : > { %s7027_s10 = scalar_lea.vmem %s7026_s30, 8192  ;;  %p7028_p10 = scmp.lt.s32.totalorder %s7327_s21, %s7026_s30 }
  0x82   : > { %p7023_p2 = pnand %p7021_p13, %p7263_p5  ;;  %p7029_p6 = scmp.lt.s32.totalorder %s7027_s10, %s7020_s3 }
  0x84   : > { %p7024_p3 = pneg %p7023_p2  ;;  %p7030_p7 = por %p7029_p6, %p7028_p10 }
  0x86   : > { %p7031_p11 = pnand %p7030_p7, %p7024_p3 }
  0x88   : > { %7034 = shalt.err (!%p7031_p11)
}
  0x89   : > { %s7121_s19 = smov 64   ;;  %s7122_s8 = smov 4  }
  0x8a   : > { %5986 = dma.hbm_to_vmem [thread:$0]  (!%p7234_p0), %s7325_s20, 4096, %s7327_s21, %s7257_s26, %s7121_s19, %s7121_s19, %s7122_s8  }
  0x8b   : > { %p8171_p5 = scmp.ne.s32.totalorder %s8161_s12, 0 }
  0x8c   : > { %p8172_p4 = scmp.eq.s32.totalorder (!%p8171_p5), %s7186_s28, 0 }
  0x8d   : > { %322 = sbr.rel (%p8171_p5) target bundleno = 1697 (0x6a1), region = 48 }
  0x92   : > { %7076 = dma.done.wait (%p8172_p4), [#allocation4], 256   ;;  %p8173_p9 = pmov %p8172_p4 }
  0x93   : > { %p8174_p8 = pmov %p8172_p4 }
  0x94   : > { %7078 = vsyncadd (%p8173_p9), [#allocation4], 4294967040 }
  0x95   : > { %7080 = dma.done.wait (%p8174_p8), [#allocation7], 64   ;;  %p8175_p12 = pmov %p8172_p4 }
  0x96   : > { %s332_s18 = sand.u32 1, %s7186_s28   ;;  %s334_s26 = sand.u32 1, %s7101_s25  }
  0x97   : > { %7082 = vsyncadd (%p8175_p12), [#allocation7], 4294967232  ;;  %s5308_s14 = sshll.u32 %s334_s26, 12  ;;  %s333_s12 = scalar_lea.sflag [#allocation4], %s332_s18 }
  0x98   : > { %s7362_s17 = scalar_lea.vmem [#allocation8], %s5308_s14  ;;  %p8176_p0 = scmp.ne.s32.totalorder %s8160_s11, 0 }
  0x9a   : > { %7084 = dma.done.wait (%p8176_p0), %s333_s12, 69696  }
  0x9b   : > { %7086 = vsyncadd (%p8176_p0), %s333_s12, 4294897600  ;;  %s5309_s29 = sshll.u32 %s334_s26, 2  ;;  %s5310_s21 = sshll.u32 %s334_s26, 8 }
  0x9c   : > { %s7368_s24 = scalar_lea.vmem [#allocation9], %s5309_s29  ;;  %s7370_s16 = scalar_lea.vmem [#allocation10], %s5310_s21 }
  0x9d   : > { %p8177_p1 = pmov %p8172_p4 }
  0x9f   : > { %7088 = dma.done.wait (%p8177_p1), [#allocation7], 16   ;;  %p8178_p13 = pmov %p8177_p1 }
  0xa0   : > { %p8179_p2 = scmp.ne.s32.totalorder %s7186_s28, 0 }
  0xa1   : > { %7090 = vsyncadd (%p8178_p13), [#allocation7], 4294967280 }
  0xa2   : > { %400 = sbr.rel (%p8179_p2) target bundleno = 774 (0x306), region = 76 }
  0xa7   : > { %v6054_v0 = vld [vmem:[%s8137_s1 + $0x38] sm:$0xff]   ;;  %v7123_v1 = vmov 0   ;;  %v6055_v2 = vld [vmem:[%s8137_s1 + $0x30] sm:$0xff]   ;;  %v6056_v3 = vld [vmem:[%s8137_s1 + $0x28] sm:$0xff]   ;;  %vm512_vm0 = vcmask 556032   ;;  %vm516_vm1 = vcmask 1041408   ;;  %v697_v35 = vlaneseq }
  0xa8   : > { %520 = vmatprep.subr.bf16.mxu0 %v7123_v1  ;;  %v6057_v4 = vld [vmem:[%s8137_s1 + $0x20] sm:$0xff]   ;;  %v6069_v5 = vld [vmem:[#allocation3 + $0x4] ss:$8 sps:$4 sm:$0xff]   ;;  %v6060_v8 = vld [vmem:[%s8137_s1 + $0x8] sm:$0xff]   ;;  %vm635_vm2 = vcmask 1043456   ;;  %vm628_vm3 = vcmask 64512  }
  0xa9   : > { %521 = vmatpush1.bf16.msra.mxu0 %v6054_v0  ;;  %v6058_v6 = vld [vmem:[%s8137_s1 + $0x18] sm:$0xff]   ;;  %5328 = vmatprep.mubr.msk.bf16.mxu0 %vm512_vm0, %v6069_v5  ;;  %v6059_v7 = vld [vmem:[%s8137_s1 + $0x10] sm:$0xff]   ;;  %v6061_v9 = vld [vmem:[%s8137_s1] sm:$0xff]   ;;  %v7124_v33 = vmov 1966171168   ;;  %v698_v37 = vshrl.u32 %v697_v35, 7 }
  0xaa   : > { %522 = vmatprep.subr.bf16.mxu0 %v7123_v1  ;;  %v6062_v10 = vld [vmem:[%s8137_s1 + $0x60] ss:$0 sps:$4 sm:$0x33]   ;;  %v6063_v12 = vld [vmem:[%s8137_s1 + $0x58] sm:$0xff]   ;;  %v6064_v13 = vld [vmem:[%s8137_s1 + $0x50] sm:$0xff]   ;;  %v695_v34 = vunpack.c.l.s4 %v7124_v33 }
  0xab   : > { %v518_v11 = vsel %vm516_vm1, %v6062_v10, 0  ;;  %v6065_v14 = vld [vmem:[%s8137_s1 + $0x48] sm:$0xff]   ;;  %v6066_v15 = vld [vmem:[%s8137_s1 + $0x40] sm:$0xff]   ;;  %v6067_v16 = vld [vmem:[#allocation3] ss:$8 sps:$4 sm:$0xff]  }
  0xac   : > { %v627_v22 = vld [vmem:[#allocation6] sm:$0xf]  ;;  %v5339_v32 = vld [vmem:[#allocation11] ss:$0 sm:$0xff]  ;;  %v696_v36 = vunpack.c.0.s8 %v695_v34 }
  0xad   : > { %523 = vmatpush1.bf16.msra.mxu0 %v6055_v2  ;;  %5944 = vmatprep.subr.msk.bf16.mxu1 %vm635_vm2, %v627_v22  ;;  %v637_v23 = vsel %vm635_vm2, %v627_v22, 0  ;;  %949 = vst [vmem:[#allocation12] sm:$0x3] %v5339_v32 }
  0xae   : > { %524 = vmatprep.subr.bf16.mxu0 %v7123_v1  ;;  %5939 = vmatpush3.bf16.msra.mxu1 %v637_v23  ;;  %v699_v39 = vsub.s32 %v696_v36, %v698_v37 }
  0xb1   : > { %525 = vmatpush1.bf16.msra.mxu0 %v6056_v3 }
  0xb2   : > { %526 = vmatprep.subr.bf16.mxu0 %v7123_v1 }
  0xb5   : > { %527 = vmatpush1.bf16.msra.mxu0 %v6057_v4 }
  0xb6   : > { %528 = vmatprep.subr.bf16.mxu0 %v7123_v1 }
  0xb9   : > { %529 = vmatpush1.bf16.msra.mxu0 %v6058_v6 }
  0xba   : > { %530 = vmatprep.subr.bf16.mxu0 %v7123_v1 }
  0xbd   : > { %531 = vmatpush1.bf16.msra.mxu0 %v6059_v7 }
  0xbe   : > { %532 = vmatprep.subr.bf16.mxu0 %v7123_v1 }
  0xc1   : > { %533 = vmatpush1.bf16.msra.mxu0 %v6060_v8 }
  0xc2   : > { %534 = vmatprep.subr.bf16.mxu0 %v7123_v1 }
  0xc5   : > { %535 = vmatpush1.bf16.msra.mxu0 %v6061_v9 }
  0xc6   : > { %542 = vmatprep.subr.bf16.mxu0 %v7123_v1 }
  0xc9   : > { %543 = vmatpush2.bf16.msra.mxu0 %v518_v11 }
  0xca   : > { %544 = vmatprep.subr.bf16.mxu0 %v7123_v1 }
  0xcd   : > { %545 = vmatpush2.bf16.msra.mxu0 %v6063_v12 }
  0xce   : > { %546 = vmatprep.subr.bf16.mxu0 %v7123_v1 }
  0xd1   : > { %547 = vmatpush2.bf16.msra.mxu0 %v6064_v13 }
  0xd2   : > { %548 = vmatprep.subr.bf16.mxu0 %v7123_v1 }
  0xd5   : > { %549 = vmatpush2.bf16.msra.mxu0 %v6065_v14 }
  0xd6   : > { %550 = vmatprep.subr.bf16.mxu0 %v7123_v1 }
  0xd9   : > { %551 = vmatpush2.bf16.msra.mxu0 %v6066_v15 }
  0xdc   : > { %553 = vmatmul.mubr.bf16.vlgmr.msra.gmra.mxu0 %v6067_v16 }
 0x19c   : > { %v554_v17 = vpop.f32.mrf.mxu0 }
 0x19e   : > { %v556_v18 = vpop.f32.mrf.mxu0 }
 0x1a0   : > { %v557_v19 = vpop.f32.mrf.mxu0 }
 0x1a1   : > { %v6042_v20 = vpack.i.bf16 %v557_v19, %v554_v17 }
 0x1a2   : > { %v559_v21 = vpop.f32.mrf.mxu0 }
 0x1a3   : > { %6043 = vxpose.xlu0.b32.start.end [1/1] (short) (narrow) %v6042_v20, 16 }
 0x21f   : > { %v6044_v24 = vpop.trf.xlu0 }
 0x220   : > { %v6048_v25 = vunpack.i.h.bf16 %v6044_v24  ;;  %v6045_v27 = vunpack.i.l.bf16 %v6044_v24 }
 0x223   : > { %v6049_v26 = vpop.trf.xlu0 }
 0x224   : > { %v6053_v28 = vunpack.i.h.bf16 %v6049_v26  ;;  %v6050_v29 = vunpack.i.l.bf16 %v6049_v26 }
 0x226   : > { %v626_v30 = vpack.c.bf16 %v6053_v28, %v6048_v25  ;;  %v625_v31 = vpack.c.bf16 %v6050_v29, %v6045_v27 }
 0x228   : > { %5940 = vmatprep.mubr.msk.bf16.mxu1 %vm628_vm3, %v625_v31 }
 0x229   : > { %5941 = vmatmul.mubr.msk.bf16.vlgmr.msra.gmra.mxu1 %vm628_vm3, %v626_v30 }
 0x2e9   : > { %v5942_v38 = vpop.f32.mrf.mxu1 }
 0x2eb   : > { %v673_v40 = vpop.f32.mrf.mxu1 }
 0x2ec   : > { %v692_v41 = vcombine.low %v673_v40, %v5942_v38  ;;  %v693_v42 = vcombine.high %v673_v40, %v5942_v38 }
 0x2ed   : > { %v5943_v43 = vpop.f32.mrf.mxu1 }
 0x2ee   : > { %v700_v44 = vrot.slane %v692_v41, %v699_v39  ;;  %v707_v45 = vrot.slane %v693_v42, %v699_v39 }
 0x2ef   : > { %v676_v46 = vpop.f32.mrf.mxu1 }
 0x2f0   : > { %v708_v47 = vcombine.high %v700_v44, %v700_v44  ;;  %v709_v48 = vcombine.high %v707_v45, %v707_v45  ;;  %v716_v49 = vrot.slane %v700_v44, %v699_v39  ;;  %v723_v50 = vrot.slane %v707_v45, %v699_v39 }
 0x2f1   : > { %v742_v51 = vcombine.low %v676_v46, %v5943_v43  ;;  %v743_v52 = vcombine.high %v676_v46, %v5943_v43 }
 0x2f2   : > { %v730_v53 = vrot.slane %v708_v47, %v699_v39  ;;  %v737_v54 = vrot.slane %v709_v48, %v699_v39  ;;  %v738_v55 = vcombine.high %v716_v49, %v716_v49  ;;  %v739_v56 = vcombine.high %v723_v50, %v723_v50 }
 0x2f3   : > { %v750_v57 = vrot.slane %v742_v51, %v699_v39  ;;  %v757_v58 = vrot.slane %v743_v52, %v699_v39 }
 0x2f4   : > { %v740_v59 = vcombine.high %v730_v53, %v730_v53  ;;  %v741_v60 = vcombine.high %v737_v54, %v737_v54  ;;  %v5331_v61 = vpack.c.bf16 %v730_v53, %v716_v49  ;;  %v5333_v62 = vpack.c.bf16 %v737_v54, %v723_v50 }
 0x2f5   : > { %v758_v63 = vcombine.high %v750_v57, %v750_v57  ;;  %v759_v0 = vcombine.high %v757_v58, %v757_v58  ;;  %v766_v1 = vrot.slane %v750_v57, %v699_v39  ;;  %v773_v2 = vrot.slane %v757_v58, %v699_v39 }
 0x2f6   : > { %v5332_v3 = vpack.c.bf16 %v740_v59, %v738_v55  ;;  %v5334_v4 = vpack.c.bf16 %v741_v60, %v739_v56  ;;  %v850_v5 = vrot.slane %v5331_v61, %v699_v39  ;;  %v864_v6 = vrot.slane %v5333_v62, %v699_v39 }
 0x2f7   : > { %v780_v7 = vrot.slane %v758_v63, %v699_v39  ;;  %v787_v8 = vrot.slane %v759_v0, %v699_v39  ;;  %v788_v11 = vcombine.high %v766_v1, %v766_v1  ;;  %v789_v12 = vcombine.high %v773_v2, %v773_v2 }
 0x2f8   : > { %v857_v9 = vrot.slane %v5332_v3, %v699_v39  ;;  %v871_v10 = vrot.slane %v5334_v4, %v699_v39 }
 0x2f9   : > { %v790_v13 = vcombine.high %v780_v7, %v780_v7  ;;  %v791_v14 = vcombine.high %v787_v8, %v787_v8  ;;  %v5335_v15 = vpack.c.bf16 %v780_v7, %v766_v1  ;;  %v5337_v16 = vpack.c.bf16 %v787_v8, %v773_v2 }
 0x2fa   : > { %v872_v17 = vcombine.low %v850_v5, %v857_v9  ;;  %v873_v18 = vcombine.low %v864_v6, %v871_v10 }
 0x2fb   : > { %v5336_v19 = vpack.c.bf16 %v790_v13, %v788_v11  ;;  %v5338_v20 = vpack.c.bf16 %v791_v14, %v789_v12  ;;  %v899_v23 = vrot.slane %v5335_v15, %v699_v39  ;;  %v913_v25 = vrot.slane %v5337_v16, %v699_v39 }
 0x2fc   : > { %v880_v21 = vrot.slane %v872_v17, %v699_v39  ;;  %v887_v22 = vrot.slane %v873_v18, %v699_v39 }
 0x2fd   : > { %v906_v24 = vrot.slane %v5336_v19, %v699_v39  ;;  %v920_v26 = vrot.slane %v5338_v20, %v699_v39 }
 0x2fe   : > { %v888_v27 = vcombine.low %v880_v21, %v887_v22 }
 0x2ff   : > { %v921_v28 = vcombine.low %v899_v23, %v906_v24  ;;  %v922_v29 = vcombine.low %v913_v25, %v920_v26 }
 0x300   : > { %940 = vst [vmem:[#allocation2] sm:$0xff] %v888_v27 }
 0x301   : > { %v929_v30 = vrot.slane %v921_v28, %v699_v39  ;;  %v936_v31 = vrot.slane %v922_v29, %v699_v39 }
 0x303   : > { %v937_v32 = vcombine.low %v929_v30, %v936_v31 }
 0x305   : > { %941 = vst [vmem:[#allocation2 + $0x8] sm:$0xff] %v937_v32 }
 0x306 PF: > { %v6070_v33 = vld [vmem:[%s7362_s17 + $0xe4] ss:$16 sps:$4 sm:$0xff]   ;;  %v6074_v35 = vld [vmem:[%s7362_s17 + $0xe0] ss:$16 sps:$4 sm:$0xff]   ;;  %v1466_v5 = vlaneseq  ;;  %v7125_v6 = vmov 1966171168  }
 0x307   : > { %v6072_v34 = vld [vmem:[%s7362_s17 + $0x2e4] ss:$16 sps:$4 sm:$0xff]   ;;  %4162 = vmatprep.subr.bf16.mxu0 %v6070_v33  ;;  %v6075_v36 = vld [vmem:[%s7362_s17 + $0x2e0] ss:$16 sps:$4 sm:$0xff]   ;;  %v1490_v7 = vunpack.c.l.s4 %v7125_v6  ;;  %p5994_p3 = scmp.eq.s32.totalorder %s7186_s28, 1 }
 0x308   : > { %4203 = vmatprep.subr.bf16.mxu1 %v6072_v34  ;;  %v6076_v37 = vld [vmem:[%s7362_s17 + $0xc4] ss:$16 sps:$4 sm:$0xff]   ;;  %4163 = vmatpush1.bf16.msra.mxu0 %v6074_v35  ;;  %v6080_v39 = vld [vmem:[%s7362_s17 + $0xc0] ss:$16 sps:$4 sm:$0xff]   ;;  %v7456_v11 = vshrl.u32 %v1466_v5, 7 }
 0x309   : > { %4204 = vmatpush1.bf16.msra.mxu1 %v6075_v36  ;;  %v6078_v38 = vld [vmem:[%s7362_s17 + $0x2c4] ss:$16 sps:$4 sm:$0xff]   ;;  %4164 = vmatprep.subr.bf16.mxu0 %v6076_v37  ;;  %v6081_v40 = vld [vmem:[%s7362_s17 + $0x2c0] ss:$16 sps:$4 sm:$0xff]   ;;  %v1491_v12 = vunpack.c.0.s8 %v1490_v7 }
 0x30a   : > { %4205 = vmatprep.subr.bf16.mxu1 %v6078_v38  ;;  %v6082_v41 = vld [vmem:[%s7362_s17 + $0xa4] ss:$16 sps:$4 sm:$0xff]   ;;  %v6086_v43 = vld [vmem:[%s7362_s17 + $0xa0] ss:$16 sps:$4 sm:$0xff]  }
 0x30b   : > { %v6084_v42 = vld [vmem:[%s7362_s17 + $0x2a4] ss:$16 sps:$4 sm:$0xff]   ;;  %v6087_v44 = vld [vmem:[%s7362_s17 + $0x2a0] ss:$16 sps:$4 sm:$0xff]   ;;  %v7464_v18 = vsub.s32 %v1491_v12, %v7456_v11 }
 0x30c   : > { %4165 = vmatpush1.bf16.msra.mxu0 %v6080_v39  ;;  %v6088_v45 = vld [vmem:[%s7362_s17 + $0x84] ss:$16 sps:$4 sm:$0xff]   ;;  %v6092_v47 = vld [vmem:[%s7362_s17 + $0x80] ss:$16 sps:$4 sm:$0xff]  }
 0x30d   : > { %4206 = vmatpush1.bf16.msra.mxu1 %v6081_v40  ;;  %4166 = vmatprep.subr.bf16.mxu0 %v6082_v41  ;;  %v6090_v46 = vld [vmem:[%s7362_s17 + $0x284] ss:$16 sps:$4 sm:$0xff]   ;;  %v6093_v48 = vld [vmem:[%s7362_s17 + $0x280] ss:$16 sps:$4 sm:$0xff]  }
 0x30e   : > { %4207 = vmatprep.subr.bf16.mxu1 %v6084_v42  ;;  %v6094_v49 = vld [vmem:[%s7362_s17 + $0x64] ss:$16 sps:$4 sm:$0xff]   ;;  %v6098_v51 = vld [vmem:[%s7362_s17 + $0x60] ss:$16 sps:$4 sm:$0xff]  }
 0x30f   : > { %v6096_v50 = vld [vmem:[%s7362_s17 + $0x264] ss:$16 sps:$4 sm:$0xff]   ;;  %v6099_v52 = vld [vmem:[%s7362_s17 + $0x260] ss:$16 sps:$4 sm:$0xff]  }
 0x310   : > { %4167 = vmatpush1.bf16.msra.mxu0 %v6086_v43  ;;  %v6100_v53 = vld [vmem:[%s7362_s17 + $0x44] ss:$16 sps:$4 sm:$0xff]   ;;  %v6104_v55 = vld [vmem:[%s7362_s17 + $0x40] ss:$16 sps:$4 sm:$0xff]  }
 0x311   : > { %4208 = vmatpush1.bf16.msra.mxu1 %v6087_v44  ;;  %4168 = vmatprep.subr.bf16.mxu0 %v6088_v45  ;;  %v6102_v54 = vld [vmem:[%s7362_s17 + $0x244] ss:$16 sps:$4 sm:$0xff]   ;;  %v6105_v56 = vld [vmem:[%s7362_s17 + $0x240] ss:$16 sps:$4 sm:$0xff]  }
 0x312   : > { %4209 = vmatprep.subr.bf16.mxu1 %v6090_v46  ;;  %v6106_v57 = vld [vmem:[%s7362_s17 + $0x24] ss:$16 sps:$4 sm:$0xff]   ;;  %v6110_v59 = vld [vmem:[%s7362_s17 + $0x20] ss:$16 sps:$4 sm:$0xff]  }
 0x313   : > { %v6108_v58 = vld [vmem:[%s7362_s17 + $0x224] ss:$16 sps:$4 sm:$0xff]   ;;  %v6111_v60 = vld [vmem:[%s7362_s17 + $0x220] ss:$16 sps:$4 sm:$0xff]  }
 0x314   : > { %4169 = vmatpush1.bf16.msra.mxu0 %v6092_v47  ;;  %v6112_v61 = vld [vmem:[%s7362_s17 + $0x4] ss:$16 sps:$4 sm:$0xff]   ;;  %v6116_v63 = vld [vmem:[%s7362_s17] ss:$16 sps:$4 sm:$0xff]  }
 0x315   : > { %4210 = vmatpush1.bf16.msra.mxu1 %v6093_v48  ;;  %4170 = vmatprep.subr.bf16.mxu0 %v6094_v49  ;;  %v6114_v62 = vld [vmem:[%s7362_s17 + $0x204] ss:$16 sps:$4 sm:$0xff]   ;;  %v6117_v0 = vld [vmem:[%s7362_s17 + $0x200] ss:$16 sps:$4 sm:$0xff]  }
 0x316   : > { %4211 = vmatprep.subr.bf16.mxu1 %v6096_v50  ;;  %v6118_v1 = vld [vmem:[%s7362_s17 + $0x1e4] ss:$16 sps:$4 sm:$0xff]   ;;  %v6122_v3 = vld [vmem:[%s7362_s17 + $0x1e0] ss:$16 sps:$4 sm:$0xff]  }
 0x317   : > { %v6120_v2 = vld [vmem:[%s7362_s17 + $0x3e4] ss:$16 sps:$4 sm:$0xff]   ;;  %v6123_v4 = vld [vmem:[%s7362_s17 + $0x3e0] ss:$16 sps:$4 sm:$0xff]  }
 0x318   : > { %4171 = vmatpush1.bf16.msra.mxu0 %v6098_v51  ;;  %v6124_v8 = vld [vmem:[%s7362_s17 + $0x1c4] ss:$16 sps:$4 sm:$0xff]   ;;  %v6128_v10 = vld [vmem:[%s7362_s17 + $0x1c0] ss:$16 sps:$4 sm:$0xff]  }
 0x319   : > { %4212 = vmatpush1.bf16.msra.mxu1 %v6099_v52  ;;  %4172 = vmatprep.subr.bf16.mxu0 %v6100_v53  ;;  %v6126_v9 = vld [vmem:[%s7362_s17 + $0x3c4] ss:$16 sps:$4 sm:$0xff]   ;;  %v6129_v13 = vld [vmem:[%s7362_s17 + $0x3c0] ss:$16 sps:$4 sm:$0xff]  }
 0x31a   : > { %4213 = vmatprep.subr.bf16.mxu1 %v6102_v54  ;;  %v6130_v14 = vld [vmem:[%s7362_s17 + $0x1a4] ss:$16 sps:$4 sm:$0xff]   ;;  %v6134_v16 = vld [vmem:[%s7362_s17 + $0x1a0] ss:$16 sps:$4 sm:$0xff]  }
 0x31b   : > { %v6132_v15 = vld [vmem:[%s7362_s17 + $0x3a4] ss:$16 sps:$4 sm:$0xff]   ;;  %v6135_v17 = vld [vmem:[%s7362_s17 + $0x3a0] ss:$16 sps:$4 sm:$0xff]  }
 0x31c   : > { %4173 = vmatpush1.bf16.msra.mxu0 %v6104_v55  ;;  %v6136_v19 = vld [vmem:[%s7362_s17 + $0x184] ss:$16 sps:$4 sm:$0xff]   ;;  %v950_v21 = vld [vmem:[#allocation2] sm:$0xff] }
 0x31d   : > { %4214 = vmatpush1.bf16.msra.mxu1 %v6105_v56  ;;  %4174 = vmatprep.subr.bf16.mxu0 %v6106_v57  ;;  %v6138_v20 = vld [vmem:[%s7362_s17 + $0x384] ss:$16 sps:$4 sm:$0xff]   ;;  %v6140_v22 = vld [vmem:[%s7362_s17 + $0x180] ss:$16 sps:$4 sm:$0xff]   ;;  %v1495_v23 = vrot.slane %v950_v21, %v7464_v18  ;;  %v1488_v34 = vcombine.high %v950_v21, %v950_v21 }
 0x31e   : > { %4215 = vmatprep.subr.bf16.mxu1 %v6108_v58  ;;  %v6141_v24 = vld [vmem:[%s7362_s17 + $0x380] ss:$16 sps:$4 sm:$0xff]   ;;  %v6142_v25 = vld [vmem:[%s7362_s17 + $0x164] ss:$16 sps:$4 sm:$0xff]  }
 0x31f   : > { %v6144_v26 = vld [vmem:[%s7362_s17 + $0x364] ss:$16 sps:$4 sm:$0xff]   ;;  %v1503_v27 = vcombine.high %v1495_v23, %v1495_v23  ;;  %v6146_v28 = vld [vmem:[%s7362_s17 + $0x160] ss:$16 sps:$4 sm:$0xff]   ;;  %v7491_v39 = vrot.slane %v1488_v34, %v7464_v18  ;;  %v7501_v46 = vrot.slane %v1495_v23, %v7464_v18 }
 0x320   : > { %4175 = vmatpush1.bf16.msra.mxu0 %v6110_v59  ;;  %v6147_v30 = vld [vmem:[%s7362_s17 + $0x360] ss:$16 sps:$4 sm:$0xff]   ;;  %v6148_v31 = vld [vmem:[%s7362_s17 + $0x144] ss:$16 sps:$4 sm:$0xff]  }
 0x321   : > { %4216 = vmatpush1.bf16.msra.mxu1 %v6111_v60  ;;  %4176 = vmatprep.subr.bf16.mxu0 %v6112_v61  ;;  %v7475_v29 = vrot.slane %v1503_v27, %v7464_v18  ;;  %v6150_v32 = vld [vmem:[%s7362_s17 + $0x344] ss:$16 sps:$4 sm:$0xff]   ;;  %v6152_v35 = vld [vmem:[%s7362_s17 + $0x140] ss:$16 sps:$4 sm:$0xff]   ;;  %v1504_v44 = vcombine.high %v7491_v39, %v7491_v39  ;;  %v7511_v51 = vcombine.high %v7501_v46, %v7501_v46 }
 0x322   : > { %4217 = vmatprep.subr.bf16.mxu1 %v6114_v62  ;;  %v6153_v36 = vld [vmem:[%s7362_s17 + $0x340] ss:$16 sps:$4 sm:$0xff]   ;;  %v6154_v37 = vld [vmem:[%s7362_s17 + $0x124] ss:$16 sps:$4 sm:$0xff]  }
 0x323   : > { %v7482_v33 = vcombine.high %v7475_v29, %v7475_v29  ;;  %4194 = vmatprep.mubr.bf16.mxu0 %v7475_v29  ;;  %v6156_v38 = vld [vmem:[%s7362_s17 + $0x324] ss:$16 sps:$4 sm:$0xff]   ;;  %v6158_v40 = vld [vmem:[%s7362_s17 + $0x120] ss:$16 sps:$4 sm:$0xff]   ;;  %v7507_v50 = vrot.slane %v1504_v44, %v7464_v18 }
 0x324   : > { %4177 = vmatpush1.bf16.msra.mxu0 %v6116_v63  ;;  %v6159_v41 = vld [vmem:[%s7362_s17 + $0x320] ss:$16 sps:$4 sm:$0xff]   ;;  %v6160_v42 = vld [vmem:[%s7362_s17 + $0x104] ss:$16 sps:$4 sm:$0xff]  }
 0x325   : > { %4218 = vmatpush1.bf16.msra.mxu1 %v6117_v0  ;;  %4178 = vmatprep.subr.bf16.mxu0 %v6118_v1  ;;  %v6162_v43 = vld [vmem:[%s7362_s17 + $0x304] ss:$16 sps:$4 sm:$0xff]   ;;  %v6164_v45 = vld [vmem:[%s7362_s17 + $0x100] ss:$16 sps:$4 sm:$0xff]   ;;  %v7519_v56 = vcombine.high %v7507_v50, %v7507_v50 }
 0x326   : > { %4219 = vmatprep.subr.bf16.mxu1 %v6120_v2  ;;  %4235 = vmatprep.mubr.bf16.mxu1 %v7482_v33  ;;  %v6165_v47 = vld [vmem:[%s7362_s17 + $0x300] ss:$16 sps:$4 sm:$0xff]   ;;  %v6168_v48 = vld [vmem:[%s7362_s17 + $0x4e4] ss:$16 sps:$4 sm:$0xff]  }
 0x327   : > { %v6171_v49 = vld [vmem:[%s7362_s17 + $0x6e4] ss:$16 sps:$4 sm:$0xff]   ;;  %v6166_v52 = vld [vmem:[%s7362_s17 + $0x4e0] ss:$16 sps:$4 sm:$0xff]  }
 0x328   : > { %4179 = vmatpush2.bf16.msra.mxu0 %v6122_v3  ;;  %v6169_v53 = vld [vmem:[%s7362_s17 + $0x6e0] ss:$16 sps:$4 sm:$0xff]   ;;  %v6174_v54 = vld [vmem:[%s7362_s17 + $0x4c4] ss:$16 sps:$4 sm:$0xff]  }
 0x329   : > { %4220 = vmatpush2.bf16.msra.mxu1 %v6123_v4  ;;  %4180 = vmatprep.subr.bf16.mxu0 %v6124_v8  ;;  %v6177_v55 = vld [vmem:[%s7362_s17 + $0x6c4] ss:$16 sps:$4 sm:$0xff]   ;;  %v6172_v57 = vld [vmem:[%s7362_s17 + $0x4c0] ss:$16 sps:$4 sm:$0xff]  }
 0x32a   : > { %4221 = vmatprep.subr.bf16.mxu1 %v6126_v9  ;;  %v6175_v58 = vld [vmem:[%s7362_s17 + $0x6c0] ss:$16 sps:$4 sm:$0xff]   ;;  %v6180_v59 = vld [vmem:[%s7362_s17 + $0x4a4] ss:$16 sps:$4 sm:$0xff]  }
 0x32b   : > { %v6183_v60 = vld [vmem:[%s7362_s17 + $0x6a4] ss:$16 sps:$4 sm:$0xff]   ;;  %v6178_v61 = vld [vmem:[%s7362_s17 + $0x4a0] ss:$16 sps:$4 sm:$0xff]  }
 0x32c   : > { %4181 = vmatpush2.bf16.msra.mxu0 %v6128_v10  ;;  %v6181_v62 = vld [vmem:[%s7362_s17 + $0x6a0] ss:$16 sps:$4 sm:$0xff]   ;;  %v6186_v63 = vld [vmem:[%s7362_s17 + $0x484] ss:$16 sps:$4 sm:$0xff]  }
 0x32d   : > { %4222 = vmatpush2.bf16.msra.mxu1 %v6129_v13  ;;  %4182 = vmatprep.subr.bf16.mxu0 %v6130_v14  ;;  %v6189_v0 = vld [vmem:[%s7362_s17 + $0x684] ss:$16 sps:$4 sm:$0xff]   ;;  %v6184_v1 = vld [vmem:[%s7362_s17 + $0x480] ss:$16 sps:$4 sm:$0xff]  }
 0x32e   : > { %4223 = vmatprep.subr.bf16.mxu1 %v6132_v15  ;;  %v6187_v2 = vld [vmem:[%s7362_s17 + $0x680] ss:$16 sps:$4 sm:$0xff]   ;;  %v6192_v3 = vld [vmem:[%s7362_s17 + $0x464] ss:$16 sps:$4 sm:$0xff]  }
 0x32f   : > { %v6195_v4 = vld [vmem:[%s7362_s17 + $0x664] ss:$16 sps:$4 sm:$0xff]   ;;  %v6190_v5 = vld [vmem:[%s7362_s17 + $0x460] ss:$16 sps:$4 sm:$0xff]  }
 0x330   : > { %4183 = vmatpush2.bf16.msra.mxu0 %v6134_v16  ;;  %v6193_v6 = vld [vmem:[%s7362_s17 + $0x660] ss:$16 sps:$4 sm:$0xff]   ;;  %v6198_v7 = vld [vmem:[%s7362_s17 + $0x444] ss:$16 sps:$4 sm:$0xff]  }
 0x331   : > { %4224 = vmatpush2.bf16.msra.mxu1 %v6135_v17  ;;  %4184 = vmatprep.subr.bf16.mxu0 %v6136_v19  ;;  %v6201_v8 = vld [vmem:[%s7362_s17 + $0x644] ss:$16 sps:$4 sm:$0xff]   ;;  %v6196_v9 = vld [vmem:[%s7362_s17 + $0x440] ss:$16 sps:$4 sm:$0xff]  }
 0x332   : > { %4225 = vmatprep.subr.bf16.mxu1 %v6138_v20  ;;  %v6199_v10 = vld [vmem:[%s7362_s17 + $0x640] ss:$16 sps:$4 sm:$0xff]   ;;  %v6204_v12 = vld [vmem:[%s7362_s17 + $0x424] ss:$16 sps:$4 sm:$0xff]  }
 0x333   : > { %v6207_v13 = vld [vmem:[%s7362_s17 + $0x624] ss:$16 sps:$4 sm:$0xff]   ;;  %v6202_v14 = vld [vmem:[%s7362_s17 + $0x420] ss:$16 sps:$4 sm:$0xff]  }
 0x334   : > { %4185 = vmatpush2.bf16.msra.mxu0 %v6140_v22  ;;  %v6205_v15 = vld [vmem:[%s7362_s17 + $0x620] ss:$16 sps:$4 sm:$0xff]   ;;  %v6210_v16 = vld [vmem:[%s7362_s17 + $0x404] ss:$16 sps:$4 sm:$0xff]  }
 0x335   : > { %4226 = vmatpush2.bf16.msra.mxu1 %v6141_v24  ;;  %4186 = vmatprep.subr.bf16.mxu0 %v6142_v25  ;;  %v6213_v17 = vld [vmem:[%s7362_s17 + $0x604] ss:$16 sps:$4 sm:$0xff]   ;;  %v6208_v19 = vld [vmem:[%s7362_s17 + $0x400] ss:$16 sps:$4 sm:$0xff]  }
 0x336   : > { %4227 = vmatprep.subr.bf16.mxu1 %v6144_v26  ;;  %v6211_v20 = vld [vmem:[%s7362_s17 + $0x600] ss:$16 sps:$4 sm:$0xff]   ;;  %v6216_v21 = vld [vmem:[%s7362_s17 + $0x5e4] ss:$16 sps:$4 sm:$0xff]  }
 0x337   : > { %v6219_v22 = vld [vmem:[%s7362_s17 + $0x7e4] ss:$16 sps:$4 sm:$0xff]   ;;  %v6214_v23 = vld [vmem:[%s7362_s17 + $0x5e0] ss:$16 sps:$4 sm:$0xff]  }
 0x338   : > { %4187 = vmatpush2.bf16.msra.mxu0 %v6146_v28  ;;  %v6217_v24 = vld [vmem:[%s7362_s17 + $0x7e0] ss:$16 sps:$4 sm:$0xff]   ;;  %v6222_v25 = vld [vmem:[%s7362_s17 + $0x5c4] ss:$16 sps:$4 sm:$0xff]  }
 0x339   : > { %4228 = vmatpush2.bf16.msra.mxu1 %v6147_v30  ;;  %4188 = vmatprep.subr.bf16.mxu0 %v6148_v31  ;;  %v6225_v26 = vld [vmem:[%s7362_s17 + $0x7c4] ss:$16 sps:$4 sm:$0xff]   ;;  %v6220_v27 = vld [vmem:[%s7362_s17 + $0x5c0] ss:$16 sps:$4 sm:$0xff]  }
 0x33a   : > { %4229 = vmatprep.subr.bf16.mxu1 %v6150_v32  ;;  %v6223_v28 = vld [vmem:[%s7362_s17 + $0x7c0] ss:$16 sps:$4 sm:$0xff]   ;;  %v6228_v30 = vld [vmem:[%s7362_s17 + $0x5a4] ss:$16 sps:$4 sm:$0xff]  }
 0x33b   : > { %v6231_v31 = vld [vmem:[%s7362_s17 + $0x7a4] ss:$16 sps:$4 sm:$0xff]   ;;  %v6226_v32 = vld [vmem:[%s7362_s17 + $0x5a0] ss:$16 sps:$4 sm:$0xff]  }
 0x33c   : > { %4189 = vmatpush2.bf16.msra.mxu0 %v6152_v35  ;;  %v6229_v34 = vld [vmem:[%s7362_s17 + $0x7a0] ss:$16 sps:$4 sm:$0xff]   ;;  %v6234_v35 = vld [vmem:[%s7362_s17 + $0x584] ss:$16 sps:$4 sm:$0xff]  }
 0x33d   : > { %4230 = vmatpush2.bf16.msra.mxu1 %v6153_v36  ;;  %4190 = vmatprep.subr.bf16.mxu0 %v6154_v37  ;;  %v6237_v36 = vld [vmem:[%s7362_s17 + $0x784] ss:$16 sps:$4 sm:$0xff]   ;;  %v6232_v37 = vld [vmem:[%s7362_s17 + $0x580] ss:$16 sps:$4 sm:$0xff]  }
 0x33e   : > { %4231 = vmatprep.subr.bf16.mxu1 %v6156_v38  ;;  %v6235_v38 = vld [vmem:[%s7362_s17 + $0x780] ss:$16 sps:$4 sm:$0xff]   ;;  %v6246_v44 = vld [vmem:[%s7362_s17 + $0x544] ss:$16 sps:$4 sm:$0xff]  }
 0x340   : > { %4191 = vmatpush2.bf16.msra.mxu0 %v6158_v40  ;;  %v6240_v40 = vld [vmem:[%s7362_s17 + $0x564] ss:$16 sps:$4 sm:$0xff]  }
 0x341   : > { %4232 = vmatpush2.bf16.msra.mxu1 %v6159_v41  ;;  %4192 = vmatprep.subr.bf16.mxu0 %v6160_v42  ;;  %v6243_v41 = vld [vmem:[%s7362_s17 + $0x764] ss:$16 sps:$4 sm:$0xff]   ;;  %v6238_v42 = vld [vmem:[%s7362_s17 + $0x560] ss:$16 sps:$4 sm:$0xff]  }
 0x342   : > { %4233 = vmatprep.subr.bf16.mxu1 %v6162_v43  ;;  %v6241_v43 = vld [vmem:[%s7362_s17 + $0x760] ss:$16 sps:$4 sm:$0xff]  }
 0x344   : > { %4193 = vmatpush2.bf16.msra.mxu0 %v6164_v45  ;;  %v6249_v45 = vld [vmem:[%s7362_s17 + $0x744] ss:$16 sps:$4 sm:$0xff]  }
 0x345   : > { %4234 = vmatpush2.bf16.msra.mxu1 %v6165_v47  ;;  %4244 = vmatprep.subr.bf16.mxu0 %v6168_v48  ;;  %v6244_v47 = vld [vmem:[%s7362_s17 + $0x540] ss:$16 sps:$4 sm:$0xff]  }
 0x346   : > { %4285 = vmatprep.subr.bf16.mxu1 %v6171_v49  ;;  %v6247_v48 = vld [vmem:[%s7362_s17 + $0x740] ss:$16 sps:$4 sm:$0xff]   ;;  %v6252_v49 = vld [vmem:[%s7362_s17 + $0x524] ss:$16 sps:$4 sm:$0xff]  }
 0x347   : > { %4195 = vmatmul.mubr.bf16.vlgmr.msra.gmra.mxu0 %v7501_v46 }
 0x348   : > { %4236 = vmatmul.mubr.bf16.vlgmr.msra.gmra.mxu1 %v7511_v51  ;;  %4245 = vmatpush1.bf16.msra.mxu0 %v6166_v52  ;;  %v6255_v52 = vld [vmem:[%s7362_s17 + $0x724] ss:$16 sps:$4 sm:$0xff]  }
 0x349   : > { %4286 = vmatpush1.bf16.msra.mxu1 %v6169_v53  ;;  %4246 = vmatprep.subr.bf16.mxu0 %v6174_v54  ;;  %v6250_v53 = vld [vmem:[%s7362_s17 + $0x520] ss:$16 sps:$4 sm:$0xff]  }
 0x34a   : > { %4287 = vmatprep.subr.bf16.mxu1 %v6177_v55  ;;  %4276 = vmatprep.mubr.bf16.mxu0 %v7507_v50  ;;  %v6253_v54 = vld [vmem:[%s7362_s17 + $0x720] ss:$16 sps:$4 sm:$0xff]   ;;  %v6258_v55 = vld [vmem:[%s7362_s17 + $0x504] ss:$16 sps:$4 sm:$0xff]  }
 0x34b   : > { %4317 = vmatprep.mubr.bf16.mxu1 %v7519_v56 }
 0x34c   : > { %4247 = vmatpush1.bf16.msra.mxu0 %v6172_v57  ;;  %v6261_v57 = vld [vmem:[%s7362_s17 + $0x704] ss:$16 sps:$4 sm:$0xff]  }
 0x34d   : > { %4288 = vmatpush1.bf16.msra.mxu1 %v6175_v58  ;;  %4248 = vmatprep.subr.bf16.mxu0 %v6180_v59  ;;  %v6256_v58 = vld [vmem:[%s7362_s17 + $0x500] ss:$16 sps:$4 sm:$0xff]   ;;  %v7584_v59 = vrot.slane %v7491_v39, %v7464_v18 }
 0x34e   : > { %4289 = vmatprep.subr.bf16.mxu1 %v6183_v60  ;;  %v6259_v60 = vld [vmem:[%s7362_s17 + $0x700] ss:$16 sps:$4 sm:$0xff]  }
 0x34f   : > { %v6266_v39 = vld [vmem:[%s7362_s17 + $0xae0] ss:$16 sps:$4 sm:$0xff]  }
 0x350   : > { %4249 = vmatpush1.bf16.msra.mxu0 %v6178_v61  ;;  %v6265_v61 = vld [vmem:[%s7362_s17 + $0x8e4] ss:$16 sps:$4 sm:$0xff]  }
 0x351   : > { %4290 = vmatpush1.bf16.msra.mxu1 %v6181_v62  ;;  %4250 = vmatprep.subr.bf16.mxu0 %v6186_v63  ;;  %v6268_v62 = vld [vmem:[%s7362_s17 + $0xae4] ss:$16 sps:$4 sm:$0xff]   ;;  %v7591_v63 = vcombine.high %v7584_v59, %v7584_v59 }
 0x352   : > { %4291 = vmatprep.subr.bf16.mxu1 %v6189_v0  ;;  %v6263_v0 = vld [vmem:[%s7362_s17 + $0x8e0] ss:$16 sps:$4 sm:$0xff]  }
 0x354   : > { %4251 = vmatpush1.bf16.msra.mxu0 %v6184_v1  ;;  %v7595_v1 = vld [vmem:[#allocation2 + $0x8] sm:$0xff] }
 0x355   : > { %4292 = vmatpush1.bf16.msra.mxu1 %v6187_v2  ;;  %4252 = vmatprep.subr.bf16.mxu0 %v6192_v3  ;;  %v6271_v2 = vld [vmem:[%s7362_s17 + $0x8c4] ss:$16 sps:$4 sm:$0xff]  }
 0x356   : > { %4293 = vmatprep.subr.bf16.mxu1 %v6195_v4  ;;  %v6274_v3 = vld [vmem:[%s7362_s17 + $0xac4] ss:$16 sps:$4 sm:$0xff]   ;;  %v7601_v4 = vrot.slane %v7595_v1, %v7464_v18 }
 0x358   : > { %4253 = vmatpush1.bf16.msra.mxu0 %v6190_v5  ;;  %v1552_v5 = vcombine.high %v7601_v4, %v7601_v4 }
 0x359   : > { %4294 = vmatpush1.bf16.msra.mxu1 %v6193_v6  ;;  %4254 = vmatprep.subr.bf16.mxu0 %v6198_v7  ;;  %v6269_v6 = vld [vmem:[%s7362_s17 + $0x8c0] ss:$16 sps:$4 sm:$0xff]  }
 0x35a   : > { %4295 = vmatprep.subr.bf16.mxu1 %v6201_v8  ;;  %v6272_v7 = vld [vmem:[%s7362_s17 + $0xac0] ss:$16 sps:$4 sm:$0xff]   ;;  %v6277_v8 = vld [vmem:[%s7362_s17 + $0x8a4] ss:$16 sps:$4 sm:$0xff]  }
 0x35c   : > { %4255 = vmatpush1.bf16.msra.mxu0 %v6196_v9  ;;  %v6280_v9 = vld [vmem:[%s7362_s17 + $0xaa4] ss:$16 sps:$4 sm:$0xff]  }
 0x35d   : > { %4296 = vmatpush1.bf16.msra.mxu1 %v6199_v10  ;;  %4256 = vmatprep.subr.bf16.mxu0 %v6204_v12  ;;  %v7612_v10 = vrot.slane %v1552_v5, %v7464_v18  ;;  %v6341_v5 = vld [vmem:[%s7362_s17 + $0x940] ss:$16 sps:$4 sm:$0xff]  }
 0x35e   : > { %4297 = vmatprep.subr.bf16.mxu1 %v6207_v13  ;;  %v6275_v13 = vld [vmem:[%s7362_s17 + $0x8a0] ss:$16 sps:$4 sm:$0xff]  }
 0x35f   : > { %v7617_v12 = vcombine.high %v7612_v10, %v7612_v10 }
 0x360   : > { %4257 = vmatpush1.bf16.msra.mxu0 %v6202_v14  ;;  %v6278_v14 = vld [vmem:[%s7362_s17 + $0xaa0] ss:$16 sps:$4 sm:$0xff]  }
 0x361   : > { %4298 = vmatpush1.bf16.msra.mxu1 %v6205_v15  ;;  %4258 = vmatprep.subr.bf16.mxu0 %v6210_v16  ;;  %v6283_v15 = vld [vmem:[%s7362_s17 + $0x884] ss:$16 sps:$4 sm:$0xff]  }
 0x362   : > { %4299 = vmatprep.subr.bf16.mxu1 %v6213_v17  ;;  %v6286_v16 = vld [vmem:[%s7362_s17 + $0xa84] ss:$16 sps:$4 sm:$0xff]   ;;  %v6281_v17 = vld [vmem:[%s7362_s17 + $0x880] ss:$16 sps:$4 sm:$0xff]  }
 0x364   : > { %4259 = vmatpush1.bf16.msra.mxu0 %v6208_v19  ;;  %v6284_v19 = vld [vmem:[%s7362_s17 + $0xa80] ss:$16 sps:$4 sm:$0xff]  }
 0x365   : > { %4300 = vmatpush1.bf16.msra.mxu1 %v6211_v20  ;;  %4260 = vmatprep.subr.bf16.mxu0 %v6216_v21  ;;  %v6289_v20 = vld [vmem:[%s7362_s17 + $0x864] ss:$16 sps:$4 sm:$0xff]  }
 0x366   : > { %4301 = vmatprep.subr.bf16.mxu1 %v6219_v22  ;;  %v6292_v21 = vld [vmem:[%s7362_s17 + $0xa64] ss:$16 sps:$4 sm:$0xff]   ;;  %v6287_v22 = vld [vmem:[%s7362_s17 + $0x860] ss:$16 sps:$4 sm:$0xff]  }
 0x368   : > { %4261 = vmatpush2.bf16.msra.mxu0 %v6214_v23  ;;  %v6290_v23 = vld [vmem:[%s7362_s17 + $0xa60] ss:$16 sps:$4 sm:$0xff]  }
 0x369   : > { %4302 = vmatpush2.bf16.msra.mxu1 %v6217_v24  ;;  %4262 = vmatprep.subr.bf16.mxu0 %v6222_v25  ;;  %v6295_v24 = vld [vmem:[%s7362_s17 + $0x844] ss:$16 sps:$4 sm:$0xff]  }
 0x36a   : > { %4303 = vmatprep.subr.bf16.mxu1 %v6225_v26  ;;  %v6298_v25 = vld [vmem:[%s7362_s17 + $0xa44] ss:$16 sps:$4 sm:$0xff]   ;;  %v6293_v26 = vld [vmem:[%s7362_s17 + $0x840] ss:$16 sps:$4 sm:$0xff]  }
 0x36c   : > { %4263 = vmatpush2.bf16.msra.mxu0 %v6220_v27  ;;  %v6296_v27 = vld [vmem:[%s7362_s17 + $0xa40] ss:$16 sps:$4 sm:$0xff]  }
 0x36d   : > { %4304 = vmatpush2.bf16.msra.mxu1 %v6223_v28  ;;  %4264 = vmatprep.subr.bf16.mxu0 %v6228_v30  ;;  %v6301_v28 = vld [vmem:[%s7362_s17 + $0x824] ss:$16 sps:$4 sm:$0xff]  }
 0x36e   : > { %4305 = vmatprep.subr.bf16.mxu1 %v6231_v31  ;;  %v6304_v30 = vld [vmem:[%s7362_s17 + $0xa24] ss:$16 sps:$4 sm:$0xff]   ;;  %v6299_v31 = vld [vmem:[%s7362_s17 + $0x820] ss:$16 sps:$4 sm:$0xff]  }
 0x370   : > { %4265 = vmatpush2.bf16.msra.mxu0 %v6226_v32  ;;  %v6302_v32 = vld [vmem:[%s7362_s17 + $0xa20] ss:$16 sps:$4 sm:$0xff]  }
 0x371   : > { %4306 = vmatpush2.bf16.msra.mxu1 %v6229_v34  ;;  %4266 = vmatprep.subr.bf16.mxu0 %v6234_v35  ;;  %v6307_v34 = vld [vmem:[%s7362_s17 + $0x804] ss:$16 sps:$4 sm:$0xff]  }
 0x372   : > { %4307 = vmatprep.subr.bf16.mxu1 %v6237_v36  ;;  %v6310_v35 = vld [vmem:[%s7362_s17 + $0xa04] ss:$16 sps:$4 sm:$0xff]   ;;  %v6305_v36 = vld [vmem:[%s7362_s17 + $0x800] ss:$16 sps:$4 sm:$0xff]  }
 0x374   : > { %4267 = vmatpush2.bf16.msra.mxu0 %v6232_v37  ;;  %v6308_v37 = vld [vmem:[%s7362_s17 + $0xa00] ss:$16 sps:$4 sm:$0xff]  }
 0x375   : > { %4308 = vmatpush2.bf16.msra.mxu1 %v6235_v38  ;;  %4268 = vmatprep.subr.bf16.mxu0 %v6240_v40  ;;  %v6313_v38 = vld [vmem:[%s7362_s17 + $0x9e4] ss:$16 sps:$4 sm:$0xff]  }
 0x376   : > { %4309 = vmatprep.subr.bf16.mxu1 %v6243_v41  ;;  %v6316_v40 = vld [vmem:[%s7362_s17 + $0xbe4] ss:$16 sps:$4 sm:$0xff]   ;;  %v6311_v41 = vld [vmem:[%s7362_s17 + $0x9e0] ss:$16 sps:$4 sm:$0xff]  }
 0x378   : > { %4269 = vmatpush2.bf16.msra.mxu0 %v6238_v42  ;;  %v6314_v42 = vld [vmem:[%s7362_s17 + $0xbe0] ss:$16 sps:$4 sm:$0xff]  }
 0x379   : > { %4310 = vmatpush2.bf16.msra.mxu1 %v6241_v43  ;;  %4270 = vmatprep.subr.bf16.mxu0 %v6246_v44  ;;  %v6319_v43 = vld [vmem:[%s7362_s17 + $0x9c4] ss:$16 sps:$4 sm:$0xff]  }
 0x37a   : > { %4311 = vmatprep.subr.bf16.mxu1 %v6249_v45  ;;  %v6322_v44 = vld [vmem:[%s7362_s17 + $0xbc4] ss:$16 sps:$4 sm:$0xff]   ;;  %v6317_v45 = vld [vmem:[%s7362_s17 + $0x9c0] ss:$16 sps:$4 sm:$0xff]  }
 0x37c   : > { %4271 = vmatpush2.bf16.msra.mxu0 %v6244_v47  ;;  %v6320_v47 = vld [vmem:[%s7362_s17 + $0xbc0] ss:$16 sps:$4 sm:$0xff]  }
 0x37d   : > { %4312 = vmatpush2.bf16.msra.mxu1 %v6247_v48  ;;  %4272 = vmatprep.subr.bf16.mxu0 %v6252_v49  ;;  %v6325_v48 = vld [vmem:[%s7362_s17 + $0x9a4] ss:$16 sps:$4 sm:$0xff]  }
 0x37e   : > { %4313 = vmatprep.subr.bf16.mxu1 %v6255_v52  ;;  %v6328_v49 = vld [vmem:[%s7362_s17 + $0xba4] ss:$16 sps:$4 sm:$0xff]   ;;  %v6323_v52 = vld [vmem:[%s7362_s17 + $0x9a0] ss:$16 sps:$4 sm:$0xff]  }
 0x380   : > { %4273 = vmatpush2.bf16.msra.mxu0 %v6250_v53  ;;  %v6326_v53 = vld [vmem:[%s7362_s17 + $0xba0] ss:$16 sps:$4 sm:$0xff]  }
 0x381   : > { %4314 = vmatpush2.bf16.msra.mxu1 %v6253_v54  ;;  %4274 = vmatprep.subr.bf16.mxu0 %v6258_v55  ;;  %v6331_v54 = vld [vmem:[%s7362_s17 + $0x984] ss:$16 sps:$4 sm:$0xff]  }
 0x382   : > { %4315 = vmatprep.subr.bf16.mxu1 %v6261_v57  ;;  %v6334_v55 = vld [vmem:[%s7362_s17 + $0xb84] ss:$16 sps:$4 sm:$0xff]   ;;  %v6329_v57 = vld [vmem:[%s7362_s17 + $0x980] ss:$16 sps:$4 sm:$0xff]  }
 0x384   : > { %4275 = vmatpush2.bf16.msra.mxu0 %v6256_v58  ;;  %v6332_v58 = vld [vmem:[%s7362_s17 + $0xb80] ss:$16 sps:$4 sm:$0xff]  }
 0x385   : > { %4316 = vmatpush2.bf16.msra.mxu1 %v6259_v60  ;;  %4326 = vmatprep.subr.bf16.mxu0 %v6265_v61  ;;  %v6337_v60 = vld [vmem:[%s7362_s17 + $0x964] ss:$16 sps:$4 sm:$0xff]  }
 0x386   : > { %4367 = vmatprep.subr.bf16.mxu1 %v6268_v62  ;;  %v6340_v61 = vld [vmem:[%s7362_s17 + $0xb64] ss:$16 sps:$4 sm:$0xff]   ;;  %v6335_v62 = vld [vmem:[%s7362_s17 + $0x960] ss:$16 sps:$4 sm:$0xff]  }
 0x387   : > { %4277 = vmatmul.mubr.bf16.vlgmr.msra.gmra.mxu0 %v7584_v59 }
 0x388   : > { %4318 = vmatmul.mubr.bf16.vlgmr.msra.gmra.mxu1 %v7591_v63  ;;  %4327 = vmatpush1.bf16.msra.mxu0 %v6263_v0  ;;  %v6338_v0 = vld [vmem:[%s7362_s17 + $0xb60] ss:$16 sps:$4 sm:$0xff]  }
 0x389   : > { %4368 = vmatpush1.bf16.msra.mxu1 %v6266_v39  ;;  %4328 = vmatprep.subr.bf16.mxu0 %v6271_v2  ;;  %v6343_v39 = vld [vmem:[%s7362_s17 + $0x944] ss:$16 sps:$4 sm:$0xff]  }
 0x38a   : > { %4369 = vmatprep.subr.bf16.mxu1 %v6274_v3  ;;  %4358 = vmatprep.mubr.bf16.mxu0 %v7612_v10  ;;  %v6346_v2 = vld [vmem:[%s7362_s17 + $0xb44] ss:$16 sps:$4 sm:$0xff]   ;;  %v1537_v3 = vcombine.high %v7595_v1, %v7595_v1  ;;  %v6350_v1 = vld [vmem:[%s7362_s17 + $0xb20] ss:$16 sps:$4 sm:$0xff]  }
 0x38b   : > { %4399 = vmatprep.mubr.bf16.mxu1 %v7617_v12 }
 0x38c   : > { %4329 = vmatpush1.bf16.msra.mxu0 %v6269_v6  ;;  %v6344_v6 = vld [vmem:[%s7362_s17 + $0xb40] ss:$16 sps:$4 sm:$0xff]  }
 0x38d   : > { %4370 = vmatpush1.bf16.msra.mxu1 %v6272_v7  ;;  %4330 = vmatprep.subr.bf16.mxu0 %v6277_v8  ;;  %v6349_v7 = vld [vmem:[%s7362_s17 + $0x924] ss:$16 sps:$4 sm:$0xff]  }
 0x38e   : > { %4371 = vmatprep.subr.bf16.mxu1 %v6280_v9  ;;  %v6352_v8 = vld [vmem:[%s7362_s17 + $0xb24] ss:$16 sps:$4 sm:$0xff]   ;;  %v7671_v9 = vrot.slane %v1537_v3, %v7464_v18  ;;  %v6410_v3 = vld [vmem:[%s7362_s17 + $0xfe0] ss:$16 sps:$4 sm:$0xff]  }
 0x390   : > { %4331 = vmatpush1.bf16.msra.mxu0 %v6275_v13  ;;  %v6347_v13 = vld [vmem:[%s7362_s17 + $0x920] ss:$16 sps:$4 sm:$0xff]  }
 0x391   : > { %4372 = vmatpush1.bf16.msra.mxu1 %v6278_v14  ;;  %4332 = vmatprep.subr.bf16.mxu0 %v6283_v15  ;;  %v6355_v14 = vld [vmem:[%s7362_s17 + $0x904] ss:$16 sps:$4 sm:$0xff]  }
 0x392   : > { %4373 = vmatprep.subr.bf16.mxu1 %v6286_v16  ;;  %v6358_v15 = vld [vmem:[%s7362_s17 + $0xb04] ss:$16 sps:$4 sm:$0xff]   ;;  %v1553_v16 = vcombine.high %v7671_v9, %v7671_v9 }
 0x394   : > { %4333 = vmatpush1.bf16.msra.mxu0 %v6281_v17  ;;  %v6353_v17 = vld [vmem:[%s7362_s17 + $0x900] ss:$16 sps:$4 sm:$0xff]  }
 0x395   : > { %4374 = vmatpush1.bf16.msra.mxu1 %v6284_v19  ;;  %4334 = vmatprep.subr.bf16.mxu0 %v6289_v20  ;;  %v7682_v19 = vrot.slane %v7601_v4, %v7464_v18  ;;  %v6356_v20 = vld [vmem:[%s7362_s17 + $0xb00] ss:$16 sps:$4 sm:$0xff]  }
 0x396   : > { %4375 = vmatprep.subr.bf16.mxu1 %v6292_v21  ;;  %v6361_v21 = vld [vmem:[%s7362_s17 + $0xce4] ss:$16 sps:$4 sm:$0xff]   ;;  %v6359_v4 = vld [vmem:[%s7362_s17 + $0xce0] ss:$16 sps:$4 sm:$0xff]  }
 0x398   : > { %4335 = vmatpush1.bf16.msra.mxu0 %v6287_v22  ;;  %v6364_v22 = vld [vmem:[%s7362_s17 + $0xee4] ss:$16 sps:$4 sm:$0xff]  }
 0x399   : > { %4376 = vmatpush1.bf16.msra.mxu1 %v6290_v23  ;;  %4336 = vmatprep.subr.bf16.mxu0 %v6295_v24  ;;  %v7688_v23 = vrot.slane %v1553_v16, %v7464_v18  ;;  %v7692_v24 = vcombine.high %v7682_v19, %v7682_v19  ;;  %v6427_v16 = vld [vmem:[%s7362_s17 + $0xd84] ss:$16 sps:$4 sm:$0xff]  }
 0x39a   : > { %4377 = vmatprep.subr.bf16.mxu1 %v6298_v25  ;;  %v6362_v25 = vld [vmem:[%s7362_s17 + $0xee0] ss:$16 sps:$4 sm:$0xff]  }
 0x39c   : > { %4337 = vmatpush1.bf16.msra.mxu0 %v6293_v26  ;;  %v6367_v26 = vld [vmem:[%s7362_s17 + $0xcc4] ss:$16 sps:$4 sm:$0xff]  }
 0x39d   : > { %4378 = vmatpush1.bf16.msra.mxu1 %v6296_v27  ;;  %4338 = vmatprep.subr.bf16.mxu0 %v6301_v28  ;;  %v6370_v27 = vld [vmem:[%s7362_s17 + $0xec4] ss:$16 sps:$4 sm:$0xff]   ;;  %v7700_v28 = vcombine.high %v7688_v23, %v7688_v23 }
 0x39e   : > { %4379 = vmatprep.subr.bf16.mxu1 %v6304_v30  ;;  %v6365_v30 = vld [vmem:[%s7362_s17 + $0xcc0] ss:$16 sps:$4 sm:$0xff]  }
 0x3a0   : > { %4339 = vmatpush1.bf16.msra.mxu0 %v6299_v31  ;;  %v6368_v31 = vld [vmem:[%s7362_s17 + $0xec0] ss:$16 sps:$4 sm:$0xff]  }
 0x3a1   : > { %4380 = vmatpush1.bf16.msra.mxu1 %v6302_v32  ;;  %4340 = vmatprep.subr.bf16.mxu0 %v6307_v34  ;;  %v6373_v32 = vld [vmem:[%s7362_s17 + $0xca4] ss:$16 sps:$4 sm:$0xff]  }
 0x3a2   : > { %4381 = vmatprep.subr.bf16.mxu1 %v6310_v35  ;;  %v6376_v34 = vld [vmem:[%s7362_s17 + $0xea4] ss:$16 sps:$4 sm:$0xff]   ;;  %v6371_v35 = vld [vmem:[%s7362_s17 + $0xca0] ss:$16 sps:$4 sm:$0xff]  }
 0x3a4   : > { %4341 = vmatpush1.bf16.msra.mxu0 %v6305_v36  ;;  %v6374_v36 = vld [vmem:[%s7362_s17 + $0xea0] ss:$16 sps:$4 sm:$0xff]  }
 0x3a5   : > { %4382 = vmatpush1.bf16.msra.mxu1 %v6308_v37  ;;  %4342 = vmatprep.subr.bf16.mxu0 %v6313_v38  ;;  %v6379_v37 = vld [vmem:[%s7362_s17 + $0xc84] ss:$16 sps:$4 sm:$0xff]  }
 0x3a6   : > { %4383 = vmatprep.subr.bf16.mxu1 %v6316_v40  ;;  %v6382_v38 = vld [vmem:[%s7362_s17 + $0xe84] ss:$16 sps:$4 sm:$0xff]   ;;  %v6377_v40 = vld [vmem:[%s7362_s17 + $0xc80] ss:$16 sps:$4 sm:$0xff]  }
 0x3a8   : > { %4343 = vmatpush2.bf16.msra.mxu0 %v6311_v41  ;;  %v6380_v41 = vld [vmem:[%s7362_s17 + $0xe80] ss:$16 sps:$4 sm:$0xff]  }
 0x3a9   : > { %4384 = vmatpush2.bf16.msra.mxu1 %v6314_v42  ;;  %4344 = vmatprep.subr.bf16.mxu0 %v6319_v43  ;;  %v6385_v42 = vld [vmem:[%s7362_s17 + $0xc64] ss:$16 sps:$4 sm:$0xff]  }
 0x3aa   : > { %4385 = vmatprep.subr.bf16.mxu1 %v6322_v44  ;;  %v6388_v43 = vld [vmem:[%s7362_s17 + $0xe64] ss:$16 sps:$4 sm:$0xff]   ;;  %v6383_v44 = vld [vmem:[%s7362_s17 + $0xc60] ss:$16 sps:$4 sm:$0xff]  }
 0x3ac   : > { %4345 = vmatpush2.bf16.msra.mxu0 %v6317_v45  ;;  %v6386_v45 = vld [vmem:[%s7362_s17 + $0xe60] ss:$16 sps:$4 sm:$0xff]  }
 0x3ad   : > { %4386 = vmatpush2.bf16.msra.mxu1 %v6320_v47  ;;  %4346 = vmatprep.subr.bf16.mxu0 %v6325_v48  ;;  %v6391_v47 = vld [vmem:[%s7362_s17 + $0xc44] ss:$16 sps:$4 sm:$0xff]  }
 0x3ae   : > { %4387 = vmatprep.subr.bf16.mxu1 %v6328_v49  ;;  %v6394_v48 = vld [vmem:[%s7362_s17 + $0xe44] ss:$16 sps:$4 sm:$0xff]   ;;  %v6389_v49 = vld [vmem:[%s7362_s17 + $0xc40] ss:$16 sps:$4 sm:$0xff]  }
 0x3b0   : > { %4347 = vmatpush2.bf16.msra.mxu0 %v6323_v52  ;;  %v6392_v52 = vld [vmem:[%s7362_s17 + $0xe40] ss:$16 sps:$4 sm:$0xff]  }
 0x3b1   : > { %4388 = vmatpush2.bf16.msra.mxu1 %v6326_v53  ;;  %4348 = vmatprep.subr.bf16.mxu0 %v6331_v54  ;;  %v6397_v53 = vld [vmem:[%s7362_s17 + $0xc24] ss:$16 sps:$4 sm:$0xff]  }
 0x3b2   : > { %4389 = vmatprep.subr.bf16.mxu1 %v6334_v55  ;;  %v6400_v54 = vld [vmem:[%s7362_s17 + $0xe24] ss:$16 sps:$4 sm:$0xff]   ;;  %v6395_v55 = vld [vmem:[%s7362_s17 + $0xc20] ss:$16 sps:$4 sm:$0xff]  }
 0x3b4   : > { %4349 = vmatpush2.bf16.msra.mxu0 %v6329_v57  ;;  %v6398_v57 = vld [vmem:[%s7362_s17 + $0xe20] ss:$16 sps:$4 sm:$0xff]  }
 0x3b5   : > { %4390 = vmatpush2.bf16.msra.mxu1 %v6332_v58  ;;  %4350 = vmatprep.subr.bf16.mxu0 %v6337_v60  ;;  %v6403_v58 = vld [vmem:[%s7362_s17 + $0xc04] ss:$16 sps:$4 sm:$0xff]  }
 0x3b6   : > { %4391 = vmatprep.subr.bf16.mxu1 %v6340_v61  ;;  %v6406_v60 = vld [vmem:[%s7362_s17 + $0xe04] ss:$16 sps:$4 sm:$0xff]   ;;  %v6401_v61 = vld [vmem:[%s7362_s17 + $0xc00] ss:$16 sps:$4 sm:$0xff]  }
 0x3b8   : > { %4351 = vmatpush2.bf16.msra.mxu0 %v6335_v62  ;;  %v6404_v62 = vld [vmem:[%s7362_s17 + $0xe00] ss:$16 sps:$4 sm:$0xff]  }
 0x3b9   : > { %4392 = vmatpush2.bf16.msra.mxu1 %v6338_v0  ;;  %4352 = vmatprep.subr.bf16.mxu0 %v6343_v39  ;;  %v6409_v0 = vld [vmem:[%s7362_s17 + $0xde4] ss:$16 sps:$4 sm:$0xff]  }
 0x3ba   : > { %4393 = vmatprep.subr.bf16.mxu1 %v6346_v2  ;;  %v6412_v39 = vld [vmem:[%s7362_s17 + $0xfe4] ss:$16 sps:$4 sm:$0xff]   ;;  %v6407_v2 = vld [vmem:[%s7362_s17 + $0xde0] ss:$16 sps:$4 sm:$0xff]  }
 0x3bc   : > { %4353 = vmatpush2.bf16.msra.mxu0 %v6341_v5  ;;  %v6415_v5 = vld [vmem:[%s7362_s17 + $0xdc4] ss:$16 sps:$4 sm:$0xff]  }
 0x3bd   : > { %4394 = vmatpush2.bf16.msra.mxu1 %v6344_v6  ;;  %4354 = vmatprep.subr.bf16.mxu0 %v6349_v7  ;;  %v6418_v6 = vld [vmem:[%s7362_s17 + $0xfc4] ss:$16 sps:$4 sm:$0xff]   ;;  %v6413_v7 = vld [vmem:[%s7362_s17 + $0xdc0] ss:$16 sps:$4 sm:$0xff]  }
 0x3be   : > { %4395 = vmatprep.subr.bf16.mxu1 %v6352_v8  ;;  %v6416_v8 = vld [vmem:[%s7362_s17 + $0xfc0] ss:$16 sps:$4 sm:$0xff]  }
 0x3c0   : > { %4355 = vmatpush2.bf16.msra.mxu0 %v6347_v13  ;;  %v6421_v13 = vld [vmem:[%s7362_s17 + $0xda4] ss:$16 sps:$4 sm:$0xff]  }
 0x3c1   : > { %4396 = vmatpush2.bf16.msra.mxu1 %v6350_v1  ;;  %4356 = vmatprep.subr.bf16.mxu0 %v6355_v14  ;;  %v6424_v1 = vld [vmem:[%s7362_s17 + $0xfa4] ss:$16 sps:$4 sm:$0xff]   ;;  %v6419_v14 = vld [vmem:[%s7362_s17 + $0xda0] ss:$16 sps:$4 sm:$0xff]  }
 0x3c2   : > { %4397 = vmatprep.subr.bf16.mxu1 %v6358_v15  ;;  %v6422_v15 = vld [vmem:[%s7362_s17 + $0xfa0] ss:$16 sps:$4 sm:$0xff]  }
 0x3c4   : > { %4357 = vmatpush2.bf16.msra.mxu0 %v6353_v17  ;;  %v6430_v17 = vld [vmem:[%s7362_s17 + $0xf84] ss:$16 sps:$4 sm:$0xff]  }
 0x3c5   : > { %4398 = vmatpush2.bf16.msra.mxu1 %v6356_v20  ;;  %4408 = vmatprep.subr.bf16.mxu0 %v6361_v21  ;;  %v6425_v20 = vld [vmem:[%s7362_s17 + $0xd80] ss:$16 sps:$4 sm:$0xff]  }
 0x3c6   : > { %4449 = vmatprep.subr.bf16.mxu1 %v6364_v22  ;;  %v6428_v21 = vld [vmem:[%s7362_s17 + $0xf80] ss:$16 sps:$4 sm:$0xff]   ;;  %v6433_v22 = vld [vmem:[%s7362_s17 + $0xd64] ss:$16 sps:$4 sm:$0xff]  }
 0x3c7   : > { %4359 = vmatmul.mubr.bf16.vlgmr.msra.gmra.mxu0 %v7682_v19 }
 0x3c8   : > { %4400 = vmatmul.mubr.bf16.vlgmr.msra.gmra.mxu1 %v7692_v24  ;;  %4409 = vmatpush1.bf16.msra.mxu0 %v6359_v4  ;;  %v6436_v4 = vld [vmem:[%s7362_s17 + $0xf64] ss:$16 sps:$4 sm:$0xff]  }
 0x3c9   : > { %4450 = vmatpush1.bf16.msra.mxu1 %v6362_v25  ;;  %4410 = vmatprep.subr.bf16.mxu0 %v6367_v26  ;;  %v6431_v25 = vld [vmem:[%s7362_s17 + $0xd60] ss:$16 sps:$4 sm:$0xff]  }
 0x3ca   : > { %4451 = vmatprep.subr.bf16.mxu1 %v6370_v27  ;;  %4440 = vmatprep.mubr.bf16.mxu0 %v7688_v23  ;;  %v6434_v26 = vld [vmem:[%s7362_s17 + $0xf60] ss:$16 sps:$4 sm:$0xff]   ;;  %v6439_v27 = vld [vmem:[%s7362_s17 + $0xd44] ss:$16 sps:$4 sm:$0xff]  }
 0x3cb   : > { %4481 = vmatprep.mubr.bf16.mxu1 %v7700_v28 }
 0x3cc   : > { %4411 = vmatpush1.bf16.msra.mxu0 %v6365_v30  ;;  %v6442_v30 = vld [vmem:[%s7362_s17 + $0xf44] ss:$16 sps:$4 sm:$0xff]  }
 0x3cd   : > { %4452 = vmatpush1.bf16.msra.mxu1 %v6368_v31  ;;  %4412 = vmatprep.subr.bf16.mxu0 %v6373_v32  ;;  %v6437_v31 = vld [vmem:[%s7362_s17 + $0xd40] ss:$16 sps:$4 sm:$0xff]  }
 0x3ce   : > { %4453 = vmatprep.subr.bf16.mxu1 %v6376_v34  ;;  %v6440_v32 = vld [vmem:[%s7362_s17 + $0xf40] ss:$16 sps:$4 sm:$0xff]   ;;  %v6445_v34 = vld [vmem:[%s7362_s17 + $0xd24] ss:$16 sps:$4 sm:$0xff]  }
 0x3d0   : > { %4413 = vmatpush1.bf16.msra.mxu0 %v6371_v35  ;;  %v6448_v35 = vld [vmem:[%s7362_s17 + $0xf24] ss:$16 sps:$4 sm:$0xff]  }
 0x3d1   : > { %4454 = vmatpush1.bf16.msra.mxu1 %v6374_v36  ;;  %4414 = vmatprep.subr.bf16.mxu0 %v6379_v37  ;;  %v6443_v36 = vld [vmem:[%s7362_s17 + $0xd20] ss:$16 sps:$4 sm:$0xff]  }
 0x3d2   : > { %4455 = vmatprep.subr.bf16.mxu1 %v6382_v38  ;;  %v6446_v37 = vld [vmem:[%s7362_s17 + $0xf20] ss:$16 sps:$4 sm:$0xff]   ;;  %v6451_v38 = vld [vmem:[%s7362_s17 + $0xd04] ss:$16 sps:$4 sm:$0xff]  }
 0x3d4   : > { %4415 = vmatpush1.bf16.msra.mxu0 %v6377_v40  ;;  %v6454_v40 = vld [vmem:[%s7362_s17 + $0xf04] ss:$16 sps:$4 sm:$0xff]  }
 0x3d5   : > { %4456 = vmatpush1.bf16.msra.mxu1 %v6380_v41  ;;  %4416 = vmatprep.subr.bf16.mxu0 %v6385_v42  ;;  %v6449_v41 = vld [vmem:[%s7362_s17 + $0xd00] ss:$16 sps:$4 sm:$0xff]  }
 0x3d6   : > { %4457 = vmatprep.subr.bf16.mxu1 %v6388_v43  ;;  %v6452_v42 = vld [vmem:[%s7362_s17 + $0xf00] ss:$16 sps:$4 sm:$0xff]   ;;  %v7766_v43 = vrot.slane %v7671_v9, %v7464_v18  ;;  %v6456_v18 = vld [vmem:[%s7362_s17 + $0xe8] ss:$16 sps:$4 sm:$0xff]  }
 0x3d8   : > { %4417 = vmatpush1.bf16.msra.mxu0 %v6383_v44  ;;  %v1464_v44 = vld [vmem:[%s7368_s24] sm:$0xf] }
 0x3d9   : > { %4458 = vmatpush1.bf16.msra.mxu1 %v6386_v45  ;;  %4418 = vmatprep.subr.bf16.mxu0 %v6391_v47  ;;  %v1468_v45 = vsub.s32 0, %v7456_v11  ;;  %v6458_v47 = vld [vmem:[%s7362_s17 + $0xec] ss:$16 sps:$4 sm:$0xff]  }
 0x3da   : > { %4459 = vmatprep.subr.bf16.mxu1 %v6394_v48  ;;  %v6461_v48 = vld [vmem:[%s7362_s17 + $0x2ec] ss:$16 sps:$4 sm:$0xff]  }
 0x3db   : > { %v1469_v9 = vrot.slane %v1464_v44, %v1468_v45  ;;  %v6509_v45 = vld [vmem:[%s7362_s17 + $0x3ec] ss:$16 sps:$4 sm:$0xff]  }
 0x3dc   : > { %4419 = vmatpush1.bf16.msra.mxu0 %v6389_v49  ;;  %v1472_v49 = vsub.s32 1, %v7456_v11 }
 0x3dd   : > { %4460 = vmatpush1.bf16.msra.mxu1 %v6392_v52  ;;  %4420 = vmatprep.subr.bf16.mxu0 %v6397_v53  ;;  %v7775_v52 = vcombine.high %v7766_v43, %v7766_v43  ;;  %v6459_v53 = vld [vmem:[%s7362_s17 + $0x2e8] ss:$16 sps:$4 sm:$0xff]  }
 0x3de   : > { %4461 = vmatprep.subr.bf16.mxu1 %v6400_v54  ;;  %v6464_v54 = vld [vmem:[%s7362_s17 + $0xcc] ss:$16 sps:$4 sm:$0xff]  }
 0x3e0   : > { %4421 = vmatpush1.bf16.msra.mxu0 %v6395_v55  ;;  %v6467_v55 = vld [vmem:[%s7362_s17 + $0x2cc] ss:$16 sps:$4 sm:$0xff]  }
 0x3e1   : > { %4462 = vmatpush1.bf16.msra.mxu1 %v6398_v57  ;;  %4422 = vmatprep.subr.bf16.mxu0 %v6403_v58  ;;  %v1473_v57 = vrot.slane %v1464_v44, %v1472_v49  ;;  %v6506_v44 = vld [vmem:[%s7362_s17 + $0x1ec] ss:$16 sps:$4 sm:$0xff]  }
 0x3e2   : > { %4463 = vmatprep.subr.bf16.mxu1 %v6406_v60  ;;  %v6512_v49 = vld [vmem:[%s7362_s17 + $0x1cc] ss:$16 sps:$4 sm:$0xff]  }
 0x3e4   : > { %4423 = vmatpush1.bf16.msra.mxu0 %v6401_v61  ;;  %v6462_v61 = vld [vmem:[%s7362_s17 + $0xc8] ss:$16 sps:$4 sm:$0xff]  }
 0x3e5   : > { %4464 = vmatpush1.bf16.msra.mxu1 %v6404_v62  ;;  %4424 = vmatprep.subr.bf16.mxu0 %v6409_v0  ;;  %v6465_v62 = vld [vmem:[%s7362_s17 + $0x2c8] ss:$16 sps:$4 sm:$0xff]  }
 0x3e6   : > { %4465 = vmatprep.subr.bf16.mxu1 %v6412_v39 }
 0x3e8   : > { %4425 = vmatpush2.bf16.msra.mxu0 %v6407_v2 }
 0x3e9   : > { %4466 = vmatpush2.bf16.msra.mxu1 %v6410_v3  ;;  %4426 = vmatprep.subr.bf16.mxu0 %v6415_v5  ;;  %v6470_v3 = vld [vmem:[%s7362_s17 + $0xac] ss:$16 sps:$4 sm:$0xff]  }
 0x3ea   : > { %4467 = vmatprep.subr.bf16.mxu1 %v6418_v6  ;;  %v6473_v5 = vld [vmem:[%s7362_s17 + $0x2ac] ss:$16 sps:$4 sm:$0xff]  }
 0x3ec   : > { %4427 = vmatpush2.bf16.msra.mxu0 %v6413_v7 }
 0x3ed   : > { %4468 = vmatpush2.bf16.msra.mxu1 %v6416_v8  ;;  %4428 = vmatprep.subr.bf16.mxu0 %v6421_v13  ;;  %v6468_v8 = vld [vmem:[%s7362_s17 + $0xa8] ss:$16 sps:$4 sm:$0xff]  }
 0x3ee   : > { %4469 = vmatprep.subr.bf16.mxu1 %v6424_v1  ;;  %v6471_v13 = vld [vmem:[%s7362_s17 + $0x2a8] ss:$16 sps:$4 sm:$0xff]  }
 0x3f0   : > { %4429 = vmatpush2.bf16.msra.mxu0 %v6419_v14 }
 0x3f1   : > { %4470 = vmatpush2.bf16.msra.mxu1 %v6422_v15  ;;  %4430 = vmatprep.subr.bf16.mxu0 %v6427_v16 }
 0x3f2   : > { %4471 = vmatprep.subr.bf16.mxu1 %v6430_v17 }
 0x3f4   : > { %4431 = vmatpush2.bf16.msra.mxu0 %v6425_v20  ;;  %v6476_v20 = vld [vmem:[%s7362_s17 + $0x8c] ss:$16 sps:$4 sm:$0xff]  }
 0x3f5   : > { %4472 = vmatpush2.bf16.msra.mxu1 %v6428_v21  ;;  %4432 = vmatprep.subr.bf16.mxu0 %v6433_v22  ;;  %v6477_v21 = vld [vmem:[%s7362_s17 + $0x288] ss:$16 sps:$4 sm:$0xff]   ;;  %v6482_v22 = vld [vmem:[%s7362_s17 + $0x6c] ss:$16 sps:$4 sm:$0xff]  }
 0x3f6   : > { %4473 = vmatprep.subr.bf16.mxu1 %v6436_v4  ;;  %v6485_v4 = vld [vmem:[%s7362_s17 + $0x26c] ss:$16 sps:$4 sm:$0xff]  }
 0x3f8   : > { %4433 = vmatpush2.bf16.msra.mxu0 %v6431_v25  ;;  %v6480_v25 = vld [vmem:[%s7362_s17 + $0x68] ss:$16 sps:$4 sm:$0xff]  }
 0x3f9   : > { %4474 = vmatpush2.bf16.msra.mxu1 %v6434_v26  ;;  %4434 = vmatprep.subr.bf16.mxu0 %v6439_v27  ;;  %v6483_v26 = vld [vmem:[%s7362_s17 + $0x268] ss:$16 sps:$4 sm:$0xff]   ;;  %v6488_v27 = vld [vmem:[%s7362_s17 + $0x4c] ss:$16 sps:$4 sm:$0xff]  }
 0x3fa   : > { %4475 = vmatprep.subr.bf16.mxu1 %v6442_v30  ;;  %v6491_v30 = vld [vmem:[%s7362_s17 + $0x24c] ss:$16 sps:$4 sm:$0xff]  }
 0x3fc   : > { %4435 = vmatpush2.bf16.msra.mxu0 %v6437_v31  ;;  %v6486_v31 = vld [vmem:[%s7362_s17 + $0x48] ss:$16 sps:$4 sm:$0xff]  }
 0x3fd   : > { %4476 = vmatpush2.bf16.msra.mxu1 %v6440_v32  ;;  %4436 = vmatprep.subr.bf16.mxu0 %v6445_v34  ;;  %v6489_v32 = vld [vmem:[%s7362_s17 + $0x248] ss:$16 sps:$4 sm:$0xff]   ;;  %v6494_v34 = vld [vmem:[%s7362_s17 + $0x2c] ss:$16 sps:$4 sm:$0xff]  }
 0x3fe   : > { %4477 = vmatprep.subr.bf16.mxu1 %v6448_v35  ;;  %v6497_v35 = vld [vmem:[%s7362_s17 + $0x22c] ss:$16 sps:$4 sm:$0xff]  }
 0x400   : > { %4437 = vmatpush2.bf16.msra.mxu0 %v6443_v36  ;;  %v6492_v36 = vld [vmem:[%s7362_s17 + $0x28] ss:$16 sps:$4 sm:$0xff]  }
 0x401   : > { %4478 = vmatpush2.bf16.msra.mxu1 %v6446_v37  ;;  %4438 = vmatprep.subr.bf16.mxu0 %v6451_v38  ;;  %v6495_v37 = vld [vmem:[%s7362_s17 + $0x228] ss:$16 sps:$4 sm:$0xff]   ;;  %v6500_v38 = vld [vmem:[%s7362_s17 + $0xc] ss:$16 sps:$4 sm:$0xff]  }
 0x402   : > { %4479 = vmatprep.subr.bf16.mxu1 %v6454_v40  ;;  %v6503_v40 = vld [vmem:[%s7362_s17 + $0x20c] ss:$16 sps:$4 sm:$0xff]  }
 0x404   : > { %4439 = vmatpush2.bf16.msra.mxu0 %v6449_v41  ;;  %v6498_v41 = vld [vmem:[%s7362_s17 + $0x8] ss:$16 sps:$4 sm:$0xff]  }
 0x405   : > { %4480 = vmatpush2.bf16.msra.mxu1 %v6452_v42  ;;  %4490 = vmatprep.subr.bf16.mxu0 %v6458_v47  ;;  %v6501_v42 = vld [vmem:[%s7362_s17 + $0x208] ss:$16 sps:$4 sm:$0xff]  }
 0x406   : > { %4531 = vmatprep.subr.bf16.mxu1 %v6461_v48  ;;  %v6504_v47 = vld [vmem:[%s7362_s17 + $0x1e8] ss:$16 sps:$4 sm:$0xff]  }
 0x407   : > { %v4196_v58 = vpop.f32.mrf.mxu0  ;;  %4441 = vmatmul.mubr.bf16.vlgmr.msra.gmra.mxu0 %v7766_v43  ;;  %v6507_v48 = vld [vmem:[%s7362_s17 + $0x3e8] ss:$16 sps:$4 sm:$0xff]  }
 0x408   : > { %v4237_v60 = vpop.f32.mrf.mxu1  ;;  %4482 = vmatmul.mubr.bf16.vlgmr.msra.gmra.mxu1 %v7775_v52  ;;  %v4197_v0 = vadd.f32 %v4196_v58, %v1469_v9  ;;  %4491 = vmatpush1.bf16.msra.mxu0 %v6456_v18  ;;  %v6515_v18 = vld [vmem:[%s7362_s17 + $0x3cc] ss:$16 sps:$4 sm:$0xff]   ;;  %v6510_v9 = vld [vmem:[%s7362_s17 + $0x1c8] ss:$16 sps:$4 sm:$0xff]  }
 0x409   : > { %4532 = vmatpush1.bf16.msra.mxu1 %v6459_v53  ;;  %v4198_v39 = vpop.f32.mrf.mxu0  ;;  %4492 = vmatprep.subr.bf16.mxu0 %v6464_v54  ;;  %v6513_v53 = vld [vmem:[%s7362_s17 + $0x3c8] ss:$16 sps:$4 sm:$0xff]   ;;  %v6518_v54 = vld [vmem:[%s7362_s17 + $0x1ac] ss:$16 sps:$4 sm:$0xff]  }
 0x40a   : > { %v4239_v2 = vpop.f32.mrf.mxu1  ;;  %4533 = vmatprep.subr.bf16.mxu1 %v6467_v55  ;;  %v7787_v6 = vadd.f32 %v4237_v60, %v4197_v0  ;;  %v4199_v7 = vadd.f32 %v4198_v39, %v1473_v57  ;;  %4522 = vmatprep.mubr.bf16.mxu0 %v7475_v29  ;;  %v6479_v29 = vld [vmem:[%s7362_s17 + $0x28c] ss:$16 sps:$4 sm:$0xff]   ;;  %v6516_v57 = vld [vmem:[%s7362_s17 + $0x1a8] ss:$16 sps:$4 sm:$0xff]  }
 0x40b   : > { %4563 = vmatprep.mubr.bf16.mxu1 %v7482_v33  ;;  %v4200_v1 = vpop.f32.mrf.mxu0  ;;  %v6474_v33 = vld [vmem:[%s7362_s17 + $0x88] ss:$16 sps:$4 sm:$0xff]   ;;  %v6521_v55 = vld [vmem:[%s7362_s17 + $0x3ac] ss:$16 sps:$4 sm:$0xff]  }
 0x40c   : > { %v4241_v14 = vpop.f32.mrf.mxu1  ;;  %v7793_v15 = vadd.f32 %v4239_v2, %v4199_v7  ;;  %4493 = vmatpush1.bf16.msra.mxu0 %v6462_v61  ;;  %v6519_v58 = vld [vmem:[%s7362_s17 + $0x3a8] ss:$16 sps:$4 sm:$0xff]   ;;  %v6524_v60 = vld [vmem:[%s7362_s17 + $0x18c] ss:$16 sps:$4 sm:$0xff]  }
 0x40d   : > { %4534 = vmatpush1.bf16.msra.mxu1 %v6465_v62  ;;  %v4201_v16 = vpop.f32.mrf.mxu0  ;;  %4494 = vmatprep.subr.bf16.mxu0 %v6470_v3  ;;  %v6527_v61 = vld [vmem:[%s7362_s17 + $0x38c] ss:$16 sps:$4 sm:$0xff]   ;;  %v6522_v62 = vld [vmem:[%s7362_s17 + $0x188] ss:$16 sps:$4 sm:$0xff]  }
 0x40e   : > { %v4242_v17 = vpop.f32.mrf.mxu1  ;;  %4535 = vmatprep.subr.bf16.mxu1 %v6473_v5  ;;  %v6525_v0 = vld [vmem:[%s7362_s17 + $0x388] ss:$16 sps:$4 sm:$0xff]   ;;  %v6530_v39 = vld [vmem:[%s7362_s17 + $0x16c] ss:$16 sps:$4 sm:$0xff]  }
 0x40f   : > { %v6533_v2 = vld [vmem:[%s7362_s17 + $0x36c] ss:$16 sps:$4 sm:$0xff]   ;;  %v6528_v3 = vld [vmem:[%s7362_s17 + $0x168] ss:$16 sps:$4 sm:$0xff]  }
 0x410   : > { %4495 = vmatpush1.bf16.msra.mxu0 %v6468_v8  ;;  %v6531_v5 = vld [vmem:[%s7362_s17 + $0x368] ss:$16 sps:$4 sm:$0xff]   ;;  %v6536_v7 = vld [vmem:[%s7362_s17 + $0x14c] ss:$16 sps:$4 sm:$0xff]  }
 0x411   : > { %4536 = vmatpush1.bf16.msra.mxu1 %v6471_v13  ;;  %4496 = vmatprep.subr.bf16.mxu0 %v6476_v20  ;;  %v6539_v8 = vld [vmem:[%s7362_s17 + $0x34c] ss:$16 sps:$4 sm:$0xff]   ;;  %v6534_v13 = vld [vmem:[%s7362_s17 + $0x148] ss:$16 sps:$4 sm:$0xff]  }
 0x412   : > { %4537 = vmatprep.subr.bf16.mxu1 %v6479_v29  ;;  %v6537_v1 = vld [vmem:[%s7362_s17 + $0x348] ss:$16 sps:$4 sm:$0xff]   ;;  %v6542_v14 = vld [vmem:[%s7362_s17 + $0x12c] ss:$16 sps:$4 sm:$0xff]  }
 0x413   : > { %v6545_v16 = vld [vmem:[%s7362_s17 + $0x32c] ss:$16 sps:$4 sm:$0xff]   ;;  %v6540_v17 = vld [vmem:[%s7362_s17 + $0x128] ss:$16 sps:$4 sm:$0xff]  }
 0x414   : > { %4497 = vmatpush1.bf16.msra.mxu0 %v6474_v33  ;;  %v6543_v20 = vld [vmem:[%s7362_s17 + $0x328] ss:$16 sps:$4 sm:$0xff]   ;;  %v6548_v29 = vld [vmem:[%s7362_s17 + $0x10c] ss:$16 sps:$4 sm:$0xff]  }
 0x415   : > { %4538 = vmatpush1.bf16.msra.mxu1 %v6477_v21  ;;  %4498 = vmatprep.subr.bf16.mxu0 %v6482_v22  ;;  %v6551_v33 = vld [vmem:[%s7362_s17 + $0x30c] ss:$16 sps:$4 sm:$0xff]   ;;  %v6546_v21 = vld [vmem:[%s7362_s17 + $0x108] ss:$16 sps:$4 sm:$0xff]  }
 0x416   : > { %4539 = vmatprep.subr.bf16.mxu1 %v6485_v4  ;;  %v6549_v22 = vld [vmem:[%s7362_s17 + $0x308] ss:$16 sps:$4 sm:$0xff]   ;;  %v6554_v4 = vld [vmem:[%s7362_s17 + $0x4ec] ss:$16 sps:$4 sm:$0xff]  }
 0x418   : > { %4499 = vmatpush1.bf16.msra.mxu0 %v6480_v25  ;;  %v6557_v25 = vld [vmem:[%s7362_s17 + $0x6ec] ss:$16 sps:$4 sm:$0xff]  }
 0x419   : > { %4540 = vmatpush1.bf16.msra.mxu1 %v6483_v26  ;;  %4500 = vmatprep.subr.bf16.mxu0 %v6488_v27  ;;  %v6552_v26 = vld [vmem:[%s7362_s17 + $0x4e8] ss:$16 sps:$4 sm:$0xff]  }
 0x41a   : > { %4541 = vmatprep.subr.bf16.mxu1 %v6491_v30  ;;  %v6555_v27 = vld [vmem:[%s7362_s17 + $0x6e8] ss:$16 sps:$4 sm:$0xff]   ;;  %v6560_v30 = vld [vmem:[%s7362_s17 + $0x4cc] ss:$16 sps:$4 sm:$0xff]  }
 0x41c   : > { %4501 = vmatpush1.bf16.msra.mxu0 %v6486_v31  ;;  %v6563_v31 = vld [vmem:[%s7362_s17 + $0x6cc] ss:$16 sps:$4 sm:$0xff]  }
 0x41d   : > { %4542 = vmatpush1.bf16.msra.mxu1 %v6489_v32  ;;  %4502 = vmatprep.subr.bf16.mxu0 %v6494_v34  ;;  %v6558_v32 = vld [vmem:[%s7362_s17 + $0x4c8] ss:$16 sps:$4 sm:$0xff]  }
 0x41e   : > { %4543 = vmatprep.subr.bf16.mxu1 %v6497_v35  ;;  %v6561_v34 = vld [vmem:[%s7362_s17 + $0x6c8] ss:$16 sps:$4 sm:$0xff]  }
 0x420   : > { %4503 = vmatpush1.bf16.msra.mxu0 %v6492_v36 }
 0x421   : > { %4544 = vmatpush1.bf16.msra.mxu1 %v6495_v37  ;;  %4504 = vmatprep.subr.bf16.mxu0 %v6500_v38 }
 0x422   : > { %4545 = vmatprep.subr.bf16.mxu1 %v6503_v40 }
 0x424   : > { %4505 = vmatpush1.bf16.msra.mxu0 %v6498_v41  ;;  %v6566_v41 = vld [vmem:[%s7362_s17 + $0x4ac] ss:$16 sps:$4 sm:$0xff]  }
 0x425   : > { %4546 = vmatpush1.bf16.msra.mxu1 %v6501_v42  ;;  %4506 = vmatprep.subr.bf16.mxu0 %v6506_v44  ;;  %v6569_v42 = vld [vmem:[%s7362_s17 + $0x6ac] ss:$16 sps:$4 sm:$0xff]  }
 0x426   : > { %4547 = vmatprep.subr.bf16.mxu1 %v6509_v45 }
 0x428   : > { %4507 = vmatpush2.bf16.msra.mxu0 %v6504_v47  ;;  %v6564_v47 = vld [vmem:[%s7362_s17 + $0x4a8] ss:$16 sps:$4 sm:$0xff]  }
 0x429   : > { %4548 = vmatpush2.bf16.msra.mxu1 %v6507_v48  ;;  %4508 = vmatprep.subr.bf16.mxu0 %v6512_v49 }
 0x42a   : > { %4549 = vmatprep.subr.bf16.mxu1 %v6515_v18 }
 0x42c   : > { %4509 = vmatpush2.bf16.msra.mxu0 %v6510_v9  ;;  %v6573_v9 = vld [vmem:[%s7362_s17 + $0x688] ss:$16 sps:$4 sm:$0xff]  }
 0x42d   : > { %4550 = vmatpush2.bf16.msra.mxu1 %v6513_v53  ;;  %4510 = vmatprep.subr.bf16.mxu0 %v6518_v54  ;;  %v6578_v53 = vld [vmem:[%s7362_s17 + $0x46c] ss:$16 sps:$4 sm:$0xff]  }
 0x42e   : > { %4551 = vmatprep.subr.bf16.mxu1 %v6521_v55  ;;  %v6581_v54 = vld [vmem:[%s7362_s17 + $0x66c] ss:$16 sps:$4 sm:$0xff]   ;;  %v6576_v55 = vld [vmem:[%s7362_s17 + $0x468] ss:$16 sps:$4 sm:$0xff]  }
 0x430   : > { %4511 = vmatpush2.bf16.msra.mxu0 %v6516_v57  ;;  %v6579_v57 = vld [vmem:[%s7362_s17 + $0x668] ss:$16 sps:$4 sm:$0xff]  }
 0x431   : > { %4552 = vmatpush2.bf16.msra.mxu1 %v6519_v58  ;;  %4512 = vmatprep.subr.bf16.mxu0 %v6524_v60  ;;  %v6584_v58 = vld [vmem:[%s7362_s17 + $0x44c] ss:$16 sps:$4 sm:$0xff]  }
 0x432   : > { %4553 = vmatprep.subr.bf16.mxu1 %v6527_v61  ;;  %v6587_v60 = vld [vmem:[%s7362_s17 + $0x64c] ss:$16 sps:$4 sm:$0xff]   ;;  %v6582_v61 = vld [vmem:[%s7362_s17 + $0x448] ss:$16 sps:$4 sm:$0xff]  }
 0x434   : > { %4513 = vmatpush2.bf16.msra.mxu0 %v6522_v62  ;;  %v6585_v62 = vld [vmem:[%s7362_s17 + $0x648] ss:$16 sps:$4 sm:$0xff]  }
 0x435   : > { %4554 = vmatpush2.bf16.msra.mxu1 %v6525_v0  ;;  %4514 = vmatprep.subr.bf16.mxu0 %v6530_v39  ;;  %v6590_v0 = vld [vmem:[%s7362_s17 + $0x42c] ss:$16 sps:$4 sm:$0xff]  }
 0x436   : > { %4555 = vmatprep.subr.bf16.mxu1 %v6533_v2  ;;  %v6593_v39 = vld [vmem:[%s7362_s17 + $0x62c] ss:$16 sps:$4 sm:$0xff]   ;;  %v6588_v2 = vld [vmem:[%s7362_s17 + $0x428] ss:$16 sps:$4 sm:$0xff]  }
 0x438   : > { %4515 = vmatpush2.bf16.msra.mxu0 %v6528_v3  ;;  %v6591_v3 = vld [vmem:[%s7362_s17 + $0x628] ss:$16 sps:$4 sm:$0xff]  }
 0x439   : > { %4556 = vmatpush2.bf16.msra.mxu1 %v6531_v5  ;;  %4516 = vmatprep.subr.bf16.mxu0 %v6536_v7  ;;  %v6596_v5 = vld [vmem:[%s7362_s17 + $0x40c] ss:$16 sps:$4 sm:$0xff]  }
 0x43a   : > { %4557 = vmatprep.subr.bf16.mxu1 %v6539_v8  ;;  %v6599_v7 = vld [vmem:[%s7362_s17 + $0x60c] ss:$16 sps:$4 sm:$0xff]   ;;  %v6594_v8 = vld [vmem:[%s7362_s17 + $0x408] ss:$16 sps:$4 sm:$0xff]  }
 0x43c   : > { %4517 = vmatpush2.bf16.msra.mxu0 %v6534_v13  ;;  %v6597_v13 = vld [vmem:[%s7362_s17 + $0x608] ss:$16 sps:$4 sm:$0xff]  }
 0x43d   : > { %4558 = vmatpush2.bf16.msra.mxu1 %v6537_v1  ;;  %4518 = vmatprep.subr.bf16.mxu0 %v6542_v14  ;;  %v6602_v1 = vld [vmem:[%s7362_s17 + $0x5ec] ss:$16 sps:$4 sm:$0xff]  }
 0x43e   : > { %4559 = vmatprep.subr.bf16.mxu1 %v6545_v16  ;;  %v6605_v14 = vld [vmem:[%s7362_s17 + $0x7ec] ss:$16 sps:$4 sm:$0xff]   ;;  %v6600_v16 = vld [vmem:[%s7362_s17 + $0x5e8] ss:$16 sps:$4 sm:$0xff]  }
 0x440   : > { %4519 = vmatpush2.bf16.msra.mxu0 %v6540_v17  ;;  %v6603_v17 = vld [vmem:[%s7362_s17 + $0x7e8] ss:$16 sps:$4 sm:$0xff]  }
 0x441   : > { %4560 = vmatpush2.bf16.msra.mxu1 %v6543_v20  ;;  %4520 = vmatprep.subr.bf16.mxu0 %v6548_v29  ;;  %v6608_v20 = vld [vmem:[%s7362_s17 + $0x5cc] ss:$16 sps:$4 sm:$0xff]  }
 0x442   : > { %4561 = vmatprep.subr.bf16.mxu1 %v6551_v33  ;;  %v6611_v29 = vld [vmem:[%s7362_s17 + $0x7cc] ss:$16 sps:$4 sm:$0xff]   ;;  %v6606_v33 = vld [vmem:[%s7362_s17 + $0x5c8] ss:$16 sps:$4 sm:$0xff]  }
 0x444   : > { %4521 = vmatpush2.bf16.msra.mxu0 %v6546_v21  ;;  %v6609_v21 = vld [vmem:[%s7362_s17 + $0x7c8] ss:$16 sps:$4 sm:$0xff]  }
 0x445   : > { %4562 = vmatpush2.bf16.msra.mxu1 %v6549_v22  ;;  %4572 = vmatprep.subr.bf16.mxu0 %v6554_v4  ;;  %v6614_v22 = vld [vmem:[%s7362_s17 + $0x5ac] ss:$16 sps:$4 sm:$0xff]  }
 0x446   : > { %4613 = vmatprep.subr.bf16.mxu1 %v6557_v25  ;;  %v6617_v4 = vld [vmem:[%s7362_s17 + $0x7ac] ss:$16 sps:$4 sm:$0xff]   ;;  %v6612_v25 = vld [vmem:[%s7362_s17 + $0x5a8] ss:$16 sps:$4 sm:$0xff]  }
 0x447   : > { %v4278_v35 = vpop.f32.mrf.mxu0  ;;  %4523 = vmatmul.mubr.bf16.vlgmr.msra.gmra.mxu0 %v7501_v46  ;;  %v6567_v46 = vld [vmem:[%s7362_s17 + $0x6a8] ss:$16 sps:$4 sm:$0xff]  }
 0x448   : > { %v4319_v36 = vpop.f32.mrf.mxu1  ;;  %4564 = vmatmul.mubr.bf16.vlgmr.msra.gmra.mxu1 %v7511_v51  ;;  %v4279_v37 = vadd.f32 %v4278_v35, %v7787_v6  ;;  %4573 = vmatpush1.bf16.msra.mxu0 %v6552_v26  ;;  %v6615_v26 = vld [vmem:[%s7362_s17 + $0x7a8] ss:$16 sps:$4 sm:$0xff]   ;;  %v6629_v35 = vld [vmem:[%s7362_s17 + $0x76c] ss:$16 sps:$4 sm:$0xff]  }
 0x449   : > { %4614 = vmatpush1.bf16.msra.mxu1 %v6555_v27  ;;  %v4280_v38 = vpop.f32.mrf.mxu0  ;;  %4574 = vmatprep.subr.bf16.mxu0 %v6560_v30  ;;  %v6620_v27 = vld [vmem:[%s7362_s17 + $0x58c] ss:$16 sps:$4 sm:$0xff]  }
 0x44a   : > { %v4321_v40 = vpop.f32.mrf.mxu1  ;;  %4615 = vmatprep.subr.bf16.mxu1 %v6563_v31  ;;  %v7860_v44 = vadd.f32 %v4319_v36, %v4279_v37  ;;  %v4281_v45 = vadd.f32 %v4280_v38, %v7793_v15  ;;  %4604 = vmatprep.mubr.bf16.mxu0 %v7507_v50  ;;  %v6572_v15 = vld [vmem:[%s7362_s17 + $0x48c] ss:$16 sps:$4 sm:$0xff]   ;;  %v6618_v31 = vld [vmem:[%s7362_s17 + $0x588] ss:$16 sps:$4 sm:$0xff]  }
 0x44b   : > { %4645 = vmatprep.mubr.bf16.mxu1 %v7519_v56  ;;  %v4282_v51 = vpop.f32.mrf.mxu0  ;;  %v6575_v50 = vld [vmem:[%s7362_s17 + $0x68c] ss:$16 sps:$4 sm:$0xff]   ;;  %v6570_v56 = vld [vmem:[%s7362_s17 + $0x488] ss:$16 sps:$4 sm:$0xff]  }
 0x44c   : > { %v4323_v6 = vpop.f32.mrf.mxu1  ;;  %v7867_v48 = vadd.f32 %v4321_v40, %v4281_v45  ;;  %4575 = vmatpush1.bf16.msra.mxu0 %v6558_v32  ;;  %v6623_v30 = vld [vmem:[%s7362_s17 + $0x78c] ss:$16 sps:$4 sm:$0xff]   ;;  %v6621_v32 = vld [vmem:[%s7362_s17 + $0x788] ss:$16 sps:$4 sm:$0xff]  }
 0x44d   : > { %4616 = vmatpush1.bf16.msra.mxu1 %v6561_v34  ;;  %v4283_v49 = vpop.f32.mrf.mxu0  ;;  %4576 = vmatprep.subr.bf16.mxu0 %v6566_v41  ;;  %v6626_v34 = vld [vmem:[%s7362_s17 + $0x56c] ss:$16 sps:$4 sm:$0xff]   ;;  %v6624_v36 = vld [vmem:[%s7362_s17 + $0x568] ss:$16 sps:$4 sm:$0xff]  }
 0x44e   : > { %v4324_v18 = vpop.f32.mrf.mxu1  ;;  %4617 = vmatprep.subr.bf16.mxu1 %v6569_v42  ;;  %v6627_v37 = vld [vmem:[%s7362_s17 + $0x768] ss:$16 sps:$4 sm:$0xff]   ;;  %v6632_v38 = vld [vmem:[%s7362_s17 + $0x54c] ss:$16 sps:$4 sm:$0xff]  }
 0x44f   : > { %v6635_v40 = vld [vmem:[%s7362_s17 + $0x74c] ss:$16 sps:$4 sm:$0xff]   ;;  %v6630_v41 = vld [vmem:[%s7362_s17 + $0x548] ss:$16 sps:$4 sm:$0xff]  }
 0x450   : > { %4577 = vmatpush1.bf16.msra.mxu0 %v6564_v47  ;;  %v6633_v42 = vld [vmem:[%s7362_s17 + $0x748] ss:$16 sps:$4 sm:$0xff]   ;;  %v6638_v45 = vld [vmem:[%s7362_s17 + $0x52c] ss:$16 sps:$4 sm:$0xff]  }
 0x451   : > { %4618 = vmatpush1.bf16.msra.mxu1 %v6567_v46  ;;  %4578 = vmatprep.subr.bf16.mxu0 %v6572_v15  ;;  %v6641_v47 = vld [vmem:[%s7362_s17 + $0x72c] ss:$16 sps:$4 sm:$0xff]   ;;  %v6636_v46 = vld [vmem:[%s7362_s17 + $0x528] ss:$16 sps:$4 sm:$0xff]  }
 0x452   : > { %4619 = vmatprep.subr.bf16.mxu1 %v6575_v50  ;;  %v6639_v51 = vld [vmem:[%s7362_s17 + $0x728] ss:$16 sps:$4 sm:$0xff]   ;;  %v6644_v6 = vld [vmem:[%s7362_s17 + $0x50c] ss:$16 sps:$4 sm:$0xff]  }
 0x453   : > { %v6647_v49 = vld [vmem:[%s7362_s17 + $0x70c] ss:$16 sps:$4 sm:$0xff]   ;;  %v6642_v18 = vld [vmem:[%s7362_s17 + $0x508] ss:$16 sps:$4 sm:$0xff]  }
 0x454   : > { %4579 = vmatpush1.bf16.msra.mxu0 %v6570_v56  ;;  %v6645_v15 = vld [vmem:[%s7362_s17 + $0x708] ss:$16 sps:$4 sm:$0xff]   ;;  %v6650_v50 = vld [vmem:[%s7362_s17 + $0x8ec] ss:$16 sps:$4 sm:$0xff]  }
 0x455   : > { %4620 = vmatpush1.bf16.msra.mxu1 %v6573_v9  ;;  %4580 = vmatprep.subr.bf16.mxu0 %v6578_v53  ;;  %v6653_v56 = vld [vmem:[%s7362_s17 + $0xaec] ss:$16 sps:$4 sm:$0xff]   ;;  %v6648_v9 = vld [vmem:[%s7362_s17 + $0x8e8] ss:$16 sps:$4 sm:$0xff]  }
 0x456   : > { %4621 = vmatprep.subr.bf16.mxu1 %v6581_v54  ;;  %v6651_v53 = vld [vmem:[%s7362_s17 + $0xae8] ss:$16 sps:$4 sm:$0xff]   ;;  %v6656_v54 = vld [vmem:[%s7362_s17 + $0x8cc] ss:$16 sps:$4 sm:$0xff]  }
 0x458   : > { %4581 = vmatpush1.bf16.msra.mxu0 %v6576_v55  ;;  %v6659_v55 = vld [vmem:[%s7362_s17 + $0xacc] ss:$16 sps:$4 sm:$0xff]  }
 0x459   : > { %4622 = vmatpush1.bf16.msra.mxu1 %v6579_v57  ;;  %4582 = vmatprep.subr.bf16.mxu0 %v6584_v58 }
 0x45a   : > { %4623 = vmatprep.subr.bf16.mxu1 %v6587_v60 }
 0x45c   : > { %4583 = vmatpush1.bf16.msra.mxu0 %v6582_v61  ;;  %v6654_v61 = vld [vmem:[%s7362_s17 + $0x8c8] ss:$16 sps:$4 sm:$0xff]  }
 0x45d   : > { %4624 = vmatpush1.bf16.msra.mxu1 %v6585_v62  ;;  %4584 = vmatprep.subr.bf16.mxu0 %v6590_v0  ;;  %v6657_v62 = vld [vmem:[%s7362_s17 + $0xac8] ss:$16 sps:$4 sm:$0xff]  }
 0x45e   : > { %4625 = vmatprep.subr.bf16.mxu1 %v6593_v39 }
 0x460   : > { %4585 = vmatpush1.bf16.msra.mxu0 %v6588_v2  ;;  %v6662_v2 = vld [vmem:[%s7362_s17 + $0x8ac] ss:$16 sps:$4 sm:$0xff]  }
 0x461   : > { %4626 = vmatpush1.bf16.msra.mxu1 %v6591_v3  ;;  %4586 = vmatprep.subr.bf16.mxu0 %v6596_v5  ;;  %v6665_v3 = vld [vmem:[%s7362_s17 + $0xaac] ss:$16 sps:$4 sm:$0xff]  }
 0x462   : > { %4627 = vmatprep.subr.bf16.mxu1 %v6599_v7 }
 0x464   : > { %4587 = vmatpush1.bf16.msra.mxu0 %v6594_v8  ;;  %v6660_v8 = vld [vmem:[%s7362_s17 + $0x8a8] ss:$16 sps:$4 sm:$0xff]  }
 0x465   : > { %4628 = vmatpush1.bf16.msra.mxu1 %v6597_v13  ;;  %4588 = vmatprep.subr.bf16.mxu0 %v6602_v1  ;;  %v6663_v13 = vld [vmem:[%s7362_s17 + $0xaa8] ss:$16 sps:$4 sm:$0xff]  }
 0x466   : > { %4629 = vmatprep.subr.bf16.mxu1 %v6605_v14 }
 0x468   : > { %4589 = vmatpush2.bf16.msra.mxu0 %v6600_v16  ;;  %v6669_v16 = vld [vmem:[%s7362_s17 + $0xa88] ss:$16 sps:$4 sm:$0xff]  }
 0x469   : > { %4630 = vmatpush2.bf16.msra.mxu1 %v6603_v17  ;;  %4590 = vmatprep.subr.bf16.mxu0 %v6608_v20  ;;  %v6674_v17 = vld [vmem:[%s7362_s17 + $0x86c] ss:$16 sps:$4 sm:$0xff]  }
 0x46a   : > { %4631 = vmatprep.subr.bf16.mxu1 %v6611_v29  ;;  %v6677_v20 = vld [vmem:[%s7362_s17 + $0xa6c] ss:$16 sps:$4 sm:$0xff]   ;;  %v6672_v29 = vld [vmem:[%s7362_s17 + $0x868] ss:$16 sps:$4 sm:$0xff]  }
 0x46c   : > { %4591 = vmatpush2.bf16.msra.mxu0 %v6606_v33  ;;  %v6675_v33 = vld [vmem:[%s7362_s17 + $0xa68] ss:$16 sps:$4 sm:$0xff]  }
 0x46d   : > { %4632 = vmatpush2.bf16.msra.mxu1 %v6609_v21  ;;  %4592 = vmatprep.subr.bf16.mxu0 %v6614_v22  ;;  %v6680_v21 = vld [vmem:[%s7362_s17 + $0x84c] ss:$16 sps:$4 sm:$0xff]  }
 0x46e   : > { %4633 = vmatprep.subr.bf16.mxu1 %v6617_v4  ;;  %v6683_v22 = vld [vmem:[%s7362_s17 + $0xa4c] ss:$16 sps:$4 sm:$0xff]   ;;  %v6678_v4 = vld [vmem:[%s7362_s17 + $0x848] ss:$16 sps:$4 sm:$0xff]  }
 0x470   : > { %4593 = vmatpush2.bf16.msra.mxu0 %v6612_v25  ;;  %v6681_v25 = vld [vmem:[%s7362_s17 + $0xa48] ss:$16 sps:$4 sm:$0xff]  }
 0x471   : > { %4634 = vmatpush2.bf16.msra.mxu1 %v6615_v26  ;;  %4594 = vmatprep.subr.bf16.mxu0 %v6620_v27  ;;  %v6686_v26 = vld [vmem:[%s7362_s17 + $0x82c] ss:$16 sps:$4 sm:$0xff]  }
 0x472   : > { %4635 = vmatprep.subr.bf16.mxu1 %v6623_v30  ;;  %v6689_v27 = vld [vmem:[%s7362_s17 + $0xa2c] ss:$16 sps:$4 sm:$0xff]   ;;  %v6684_v30 = vld [vmem:[%s7362_s17 + $0x828] ss:$16 sps:$4 sm:$0xff]  }
 0x474   : > { %4595 = vmatpush2.bf16.msra.mxu0 %v6618_v31  ;;  %v6687_v31 = vld [vmem:[%s7362_s17 + $0xa28] ss:$16 sps:$4 sm:$0xff]  }
 0x475   : > { %4636 = vmatpush2.bf16.msra.mxu1 %v6621_v32  ;;  %4596 = vmatprep.subr.bf16.mxu0 %v6626_v34  ;;  %v6692_v32 = vld [vmem:[%s7362_s17 + $0x80c] ss:$16 sps:$4 sm:$0xff]  }
 0x476   : > { %4637 = vmatprep.subr.bf16.mxu1 %v6629_v35  ;;  %v6695_v34 = vld [vmem:[%s7362_s17 + $0xa0c] ss:$16 sps:$4 sm:$0xff]   ;;  %v6690_v35 = vld [vmem:[%s7362_s17 + $0x808] ss:$16 sps:$4 sm:$0xff]  }
 0x478   : > { %4597 = vmatpush2.bf16.msra.mxu0 %v6624_v36  ;;  %v6693_v36 = vld [vmem:[%s7362_s17 + $0xa08] ss:$16 sps:$4 sm:$0xff]  }
 0x479   : > { %4638 = vmatpush2.bf16.msra.mxu1 %v6627_v37  ;;  %4598 = vmatprep.subr.bf16.mxu0 %v6632_v38  ;;  %v6698_v37 = vld [vmem:[%s7362_s17 + $0x9ec] ss:$16 sps:$4 sm:$0xff]  }
 0x47a   : > { %4639 = vmatprep.subr.bf16.mxu1 %v6635_v40  ;;  %v6701_v38 = vld [vmem:[%s7362_s17 + $0xbec] ss:$16 sps:$4 sm:$0xff]   ;;  %v6696_v40 = vld [vmem:[%s7362_s17 + $0x9e8] ss:$16 sps:$4 sm:$0xff]  }
 0x47c   : > { %4599 = vmatpush2.bf16.msra.mxu0 %v6630_v41  ;;  %v6699_v41 = vld [vmem:[%s7362_s17 + $0xbe8] ss:$16 sps:$4 sm:$0xff]  }
 0x47d   : > { %4640 = vmatpush2.bf16.msra.mxu1 %v6633_v42  ;;  %4600 = vmatprep.subr.bf16.mxu0 %v6638_v45  ;;  %v6704_v42 = vld [vmem:[%s7362_s17 + $0x9cc] ss:$16 sps:$4 sm:$0xff]  }
 0x47e   : > { %4641 = vmatprep.subr.bf16.mxu1 %v6641_v47  ;;  %v6707_v45 = vld [vmem:[%s7362_s17 + $0xbcc] ss:$16 sps:$4 sm:$0xff]   ;;  %v6702_v47 = vld [vmem:[%s7362_s17 + $0x9c8] ss:$16 sps:$4 sm:$0xff]  }
 0x480   : > { %4601 = vmatpush2.bf16.msra.mxu0 %v6636_v46  ;;  %v6705_v46 = vld [vmem:[%s7362_s17 + $0xbc8] ss:$16 sps:$4 sm:$0xff]  }
 0x481   : > { %4642 = vmatpush2.bf16.msra.mxu1 %v6639_v51  ;;  %4602 = vmatprep.subr.bf16.mxu0 %v6644_v6  ;;  %v6710_v51 = vld [vmem:[%s7362_s17 + $0x9ac] ss:$16 sps:$4 sm:$0xff]  }
 0x482   : > { %4643 = vmatprep.subr.bf16.mxu1 %v6647_v49  ;;  %v6713_v6 = vld [vmem:[%s7362_s17 + $0xbac] ss:$16 sps:$4 sm:$0xff]   ;;  %v6708_v49 = vld [vmem:[%s7362_s17 + $0x9a8] ss:$16 sps:$4 sm:$0xff]  }
 0x484   : > { %4603 = vmatpush2.bf16.msra.mxu0 %v6642_v18  ;;  %v6711_v18 = vld [vmem:[%s7362_s17 + $0xba8] ss:$16 sps:$4 sm:$0xff]  }
 0x485   : > { %4644 = vmatpush2.bf16.msra.mxu1 %v6645_v15  ;;  %4654 = vmatprep.subr.bf16.mxu0 %v6650_v50  ;;  %v6716_v15 = vld [vmem:[%s7362_s17 + $0x98c] ss:$16 sps:$4 sm:$0xff]  }
 0x486   : > { %4695 = vmatprep.subr.bf16.mxu1 %v6653_v56  ;;  %v6719_v50 = vld [vmem:[%s7362_s17 + $0xb8c] ss:$16 sps:$4 sm:$0xff]   ;;  %v6714_v56 = vld [vmem:[%s7362_s17 + $0x988] ss:$16 sps:$4 sm:$0xff]  }
 0x487   : > { %v4360_v57 = vpop.f32.mrf.mxu0  ;;  %4605 = vmatmul.mubr.bf16.vlgmr.msra.gmra.mxu0 %v7584_v59 }
 0x488   : > { %v4401_v58 = vpop.f32.mrf.mxu1  ;;  %4646 = vmatmul.mubr.bf16.vlgmr.msra.gmra.mxu1 %v7591_v63  ;;  %v4361_v60 = vadd.f32 %v4360_v57, %v7860_v44  ;;  %4655 = vmatpush1.bf16.msra.mxu0 %v6648_v9  ;;  %v6717_v9 = vld [vmem:[%s7362_s17 + $0xb88] ss:$16 sps:$4 sm:$0xff]  }
 0x489   : > { %4696 = vmatpush1.bf16.msra.mxu1 %v6651_v53  ;;  %v4362_v0 = vpop.f32.mrf.mxu0  ;;  %4656 = vmatprep.subr.bf16.mxu0 %v6656_v54  ;;  %v6722_v53 = vld [vmem:[%s7362_s17 + $0x96c] ss:$16 sps:$4 sm:$0xff]   ;;  %v6723_v57 = vld [vmem:[%s7362_s17 + $0xb68] ss:$16 sps:$4 sm:$0xff]  }
 0x48a   : > { %v4403_v39 = vpop.f32.mrf.mxu1  ;;  %4697 = vmatprep.subr.bf16.mxu1 %v6659_v55  ;;  %v7934_v5 = vadd.f32 %v4401_v58, %v4361_v60  ;;  %v4363_v59 = vadd.f32 %v4362_v0, %v7867_v48  ;;  %4686 = vmatprep.mubr.bf16.mxu0 %v7612_v10  ;;  %v6668_v10 = vld [vmem:[%s7362_s17 + $0x88c] ss:$16 sps:$4 sm:$0xff]   ;;  %v6666_v48 = vld [vmem:[%s7362_s17 + $0x888] ss:$16 sps:$4 sm:$0xff]  }
 0x48b   : > { %4727 = vmatprep.mubr.bf16.mxu1 %v7617_v12  ;;  %v4364_v63 = vpop.f32.mrf.mxu0  ;;  %v6671_v12 = vld [vmem:[%s7362_s17 + $0xa8c] ss:$16 sps:$4 sm:$0xff]   ;;  %v6720_v55 = vld [vmem:[%s7362_s17 + $0x968] ss:$16 sps:$4 sm:$0xff]  }
 0x48c   : > { %v4405_v44 = vpop.f32.mrf.mxu1  ;;  %v7939_v7 = vadd.f32 %v4403_v39, %v4363_v59  ;;  %4657 = vmatpush1.bf16.msra.mxu0 %v6654_v61  ;;  %v6725_v54 = vld [vmem:[%s7362_s17 + $0xb6c] ss:$16 sps:$4 sm:$0xff]   ;;  %v6726_v61 = vld [vmem:[%s7362_s17 + $0x948] ss:$16 sps:$4 sm:$0xff]  }
 0x48d   : > { %4698 = vmatpush1.bf16.msra.mxu1 %v6657_v62  ;;  %v4365_v1 = vpop.f32.mrf.mxu0  ;;  %4658 = vmatprep.subr.bf16.mxu0 %v6662_v2  ;;  %v6728_v58 = vld [vmem:[%s7362_s17 + $0x94c] ss:$16 sps:$4 sm:$0xff]   ;;  %v6729_v62 = vld [vmem:[%s7362_s17 + $0xb48] ss:$16 sps:$4 sm:$0xff]  }
 0x48e   : > { %v4406_v14 = vpop.f32.mrf.mxu1  ;;  %4699 = vmatprep.subr.bf16.mxu1 %v6665_v3  ;;  %v6731_v60 = vld [vmem:[%s7362_s17 + $0xb4c] ss:$16 sps:$4 sm:$0xff]   ;;  %v6732_v2 = vld [vmem:[%s7362_s17 + $0x928] ss:$16 sps:$4 sm:$0xff]  }
 0x48f   : > { %v6734_v0 = vld [vmem:[%s7362_s17 + $0x92c] ss:$16 sps:$4 sm:$0xff]   ;;  %v6735_v3 = vld [vmem:[%s7362_s17 + $0xb28] ss:$16 sps:$4 sm:$0xff]  }
 0x490   : > { %4659 = vmatpush1.bf16.msra.mxu0 %v6660_v8  ;;  %v6737_v39 = vld [vmem:[%s7362_s17 + $0xb2c] ss:$16 sps:$4 sm:$0xff]   ;;  %v6738_v44 = vld [vmem:[%s7362_s17 + $0x908] ss:$16 sps:$4 sm:$0xff]  }
 0x491   : > { %4700 = vmatpush1.bf16.msra.mxu1 %v6663_v13  ;;  %4660 = vmatprep.subr.bf16.mxu0 %v6668_v10  ;;  %v6740_v59 = vld [vmem:[%s7362_s17 + $0x90c] ss:$16 sps:$4 sm:$0xff]   ;;  %v6741_v8 = vld [vmem:[%s7362_s17 + $0xb08] ss:$16 sps:$4 sm:$0xff]  }
 0x492   : > { %4701 = vmatprep.subr.bf16.mxu1 %v6671_v12  ;;  %v6743_v63 = vld [vmem:[%s7362_s17 + $0xb0c] ss:$16 sps:$4 sm:$0xff]   ;;  %v6744_v14 = vld [vmem:[%s7362_s17 + $0xce8] ss:$16 sps:$4 sm:$0xff]  }
 0x493   : > { %v6746_v13 = vld [vmem:[%s7362_s17 + $0xcec] ss:$16 sps:$4 sm:$0xff]   ;;  %v6747_v10 = vld [vmem:[%s7362_s17 + $0xee8] ss:$16 sps:$4 sm:$0xff]  }
 0x494   : > { %4661 = vmatpush1.bf16.msra.mxu0 %v6666_v48  ;;  %v6749_v1 = vld [vmem:[%s7362_s17 + $0xeec] ss:$16 sps:$4 sm:$0xff]  }
 0x495   : > { %4702 = vmatpush1.bf16.msra.mxu1 %v6669_v16  ;;  %4662 = vmatprep.subr.bf16.mxu0 %v6674_v17  ;;  %v6752_v12 = vld [vmem:[%s7362_s17 + $0xccc] ss:$16 sps:$4 sm:$0xff]  }
 0x496   : > { %4703 = vmatprep.subr.bf16.mxu1 %v6677_v20  ;;  %v6755_v48 = vld [vmem:[%s7362_s17 + $0xecc] ss:$16 sps:$4 sm:$0xff]  }
 0x498   : > { %4663 = vmatpush1.bf16.msra.mxu0 %v6672_v29  ;;  %v6750_v29 = vld [vmem:[%s7362_s17 + $0xcc8] ss:$16 sps:$4 sm:$0xff]  }
 0x499   : > { %4704 = vmatpush1.bf16.msra.mxu1 %v6675_v33  ;;  %4664 = vmatprep.subr.bf16.mxu0 %v6680_v21  ;;  %v6753_v33 = vld [vmem:[%s7362_s17 + $0xec8] ss:$16 sps:$4 sm:$0xff]  }
 0x49a   : > { %4705 = vmatprep.subr.bf16.mxu1 %v6683_v22 }
 0x49c   : > { %4665 = vmatpush1.bf16.msra.mxu0 %v6678_v4  ;;  %v6758_v4 = vld [vmem:[%s7362_s17 + $0xcac] ss:$16 sps:$4 sm:$0xff]  }
 0x49d   : > { %4706 = vmatpush1.bf16.msra.mxu1 %v6681_v25  ;;  %4666 = vmatprep.subr.bf16.mxu0 %v6686_v26  ;;  %v6756_v26 = vld [vmem:[%s7362_s17 + $0xca8] ss:$16 sps:$4 sm:$0xff]  }
 0x49e   : > { %4707 = vmatprep.subr.bf16.mxu1 %v6689_v27  ;;  %v6759_v27 = vld [vmem:[%s7362_s17 + $0xea8] ss:$16 sps:$4 sm:$0xff]  }
 0x4a0   : > { %4667 = vmatpush1.bf16.msra.mxu0 %v6684_v30 }
 0x4a1   : > { %4708 = vmatpush1.bf16.msra.mxu1 %v6687_v31  ;;  %4668 = vmatprep.subr.bf16.mxu0 %v6692_v32  ;;  %v6764_v32 = vld [vmem:[%s7362_s17 + $0xc8c] ss:$16 sps:$4 sm:$0xff]  }
 0x4a2   : > { %4709 = vmatprep.subr.bf16.mxu1 %v6695_v34  ;;  %v6765_v34 = vld [vmem:[%s7362_s17 + $0xe88] ss:$16 sps:$4 sm:$0xff]  }
 0x4a4   : > { %4669 = vmatpush1.bf16.msra.mxu0 %v6690_v35  ;;  %v6770_v35 = vld [vmem:[%s7362_s17 + $0xc6c] ss:$16 sps:$4 sm:$0xff]  }
 0x4a5   : > { %4710 = vmatpush1.bf16.msra.mxu1 %v6693_v36  ;;  %4670 = vmatprep.subr.bf16.mxu0 %v6698_v37  ;;  %v6773_v36 = vld [vmem:[%s7362_s17 + $0xe6c] ss:$16 sps:$4 sm:$0xff]   ;;  %v6768_v37 = vld [vmem:[%s7362_s17 + $0xc68] ss:$16 sps:$4 sm:$0xff]  }
 0x4a6   : > { %4711 = vmatprep.subr.bf16.mxu1 %v6701_v38  ;;  %v6771_v38 = vld [vmem:[%s7362_s17 + $0xe68] ss:$16 sps:$4 sm:$0xff]  }
 0x4a8   : > { %4671 = vmatpush2.bf16.msra.mxu0 %v6696_v40  ;;  %v6776_v40 = vld [vmem:[%s7362_s17 + $0xc4c] ss:$16 sps:$4 sm:$0xff]  }
 0x4a9   : > { %4712 = vmatpush2.bf16.msra.mxu1 %v6699_v41  ;;  %4672 = vmatprep.subr.bf16.mxu0 %v6704_v42  ;;  %v6779_v41 = vld [vmem:[%s7362_s17 + $0xe4c] ss:$16 sps:$4 sm:$0xff]   ;;  %v6774_v42 = vld [vmem:[%s7362_s17 + $0xc48] ss:$16 sps:$4 sm:$0xff]  }
 0x4aa   : > { %4713 = vmatprep.subr.bf16.mxu1 %v6707_v45  ;;  %v6777_v45 = vld [vmem:[%s7362_s17 + $0xe48] ss:$16 sps:$4 sm:$0xff]  }
 0x4ac   : > { %4673 = vmatpush2.bf16.msra.mxu0 %v6702_v47  ;;  %v6782_v47 = vld [vmem:[%s7362_s17 + $0xc2c] ss:$16 sps:$4 sm:$0xff]  }
 0x4ad   : > { %4714 = vmatpush2.bf16.msra.mxu1 %v6705_v46  ;;  %4674 = vmatprep.subr.bf16.mxu0 %v6710_v51  ;;  %v6785_v46 = vld [vmem:[%s7362_s17 + $0xe2c] ss:$16 sps:$4 sm:$0xff]   ;;  %v6780_v51 = vld [vmem:[%s7362_s17 + $0xc28] ss:$16 sps:$4 sm:$0xff]  }
 0x4ae   : > { %4715 = vmatprep.subr.bf16.mxu1 %v6713_v6  ;;  %v6783_v6 = vld [vmem:[%s7362_s17 + $0xe28] ss:$16 sps:$4 sm:$0xff]  }
 0x4b0   : > { %4675 = vmatpush2.bf16.msra.mxu0 %v6708_v49  ;;  %v6788_v49 = vld [vmem:[%s7362_s17 + $0xc0c] ss:$16 sps:$4 sm:$0xff]  }
 0x4b1   : > { %4716 = vmatpush2.bf16.msra.mxu1 %v6711_v18  ;;  %4676 = vmatprep.subr.bf16.mxu0 %v6716_v15  ;;  %v6791_v18 = vld [vmem:[%s7362_s17 + $0xe0c] ss:$16 sps:$4 sm:$0xff]   ;;  %v6786_v15 = vld [vmem:[%s7362_s17 + $0xc08] ss:$16 sps:$4 sm:$0xff]  }
 0x4b2   : > { %4717 = vmatprep.subr.bf16.mxu1 %v6719_v50  ;;  %v6789_v50 = vld [vmem:[%s7362_s17 + $0xe08] ss:$16 sps:$4 sm:$0xff]  }
 0x4b4   : > { %4677 = vmatpush2.bf16.msra.mxu0 %v6714_v56  ;;  %v6794_v56 = vld [vmem:[%s7362_s17 + $0xdec] ss:$16 sps:$4 sm:$0xff]  }
 0x4b5   : > { %4718 = vmatpush2.bf16.msra.mxu1 %v6717_v9  ;;  %4678 = vmatprep.subr.bf16.mxu0 %v6722_v53  ;;  %v6797_v9 = vld [vmem:[%s7362_s17 + $0xfec] ss:$16 sps:$4 sm:$0xff]   ;;  %v6792_v53 = vld [vmem:[%s7362_s17 + $0xde8] ss:$16 sps:$4 sm:$0xff]  }
 0x4b6   : > { %4719 = vmatprep.subr.bf16.mxu1 %v6725_v54  ;;  %v6795_v54 = vld [vmem:[%s7362_s17 + $0xfe8] ss:$16 sps:$4 sm:$0xff]  }
 0x4b8   : > { %4679 = vmatpush2.bf16.msra.mxu0 %v6720_v55  ;;  %v6800_v55 = vld [vmem:[%s7362_s17 + $0xdcc] ss:$16 sps:$4 sm:$0xff]  }
 0x4b9   : > { %4720 = vmatpush2.bf16.msra.mxu1 %v6723_v57  ;;  %4680 = vmatprep.subr.bf16.mxu0 %v6728_v58  ;;  %v6803_v57 = vld [vmem:[%s7362_s17 + $0xfcc] ss:$16 sps:$4 sm:$0xff]   ;;  %v6798_v58 = vld [vmem:[%s7362_s17 + $0xdc8] ss:$16 sps:$4 sm:$0xff]  }
 0x4ba   : > { %4721 = vmatprep.subr.bf16.mxu1 %v6731_v60  ;;  %v6801_v60 = vld [vmem:[%s7362_s17 + $0xfc8] ss:$16 sps:$4 sm:$0xff]  }
 0x4bc   : > { %4681 = vmatpush2.bf16.msra.mxu0 %v6726_v61  ;;  %v6806_v61 = vld [vmem:[%s7362_s17 + $0xdac] ss:$16 sps:$4 sm:$0xff]  }
 0x4bd   : > { %4722 = vmatpush2.bf16.msra.mxu1 %v6729_v62  ;;  %4682 = vmatprep.subr.bf16.mxu0 %v6734_v0  ;;  %v6809_v62 = vld [vmem:[%s7362_s17 + $0xfac] ss:$16 sps:$4 sm:$0xff]   ;;  %v6804_v0 = vld [vmem:[%s7362_s17 + $0xda8] ss:$16 sps:$4 sm:$0xff]  }
 0x4be   : > { %4723 = vmatprep.subr.bf16.mxu1 %v6737_v39  ;;  %v6807_v39 = vld [vmem:[%s7362_s17 + $0xfa8] ss:$16 sps:$4 sm:$0xff]  }
 0x4c0   : > { %4683 = vmatpush2.bf16.msra.mxu0 %v6732_v2  ;;  %v6812_v2 = vld [vmem:[%s7362_s17 + $0xd8c] ss:$16 sps:$4 sm:$0xff]  }
 0x4c1   : > { %4724 = vmatpush2.bf16.msra.mxu1 %v6735_v3  ;;  %4684 = vmatprep.subr.bf16.mxu0 %v6740_v59  ;;  %v6815_v3 = vld [vmem:[%s7362_s17 + $0xf8c] ss:$16 sps:$4 sm:$0xff]   ;;  %v6810_v59 = vld [vmem:[%s7362_s17 + $0xd88] ss:$16 sps:$4 sm:$0xff]  }
 0x4c2   : > { %4725 = vmatprep.subr.bf16.mxu1 %v6743_v63  ;;  %v6813_v63 = vld [vmem:[%s7362_s17 + $0xf88] ss:$16 sps:$4 sm:$0xff]  }
 0x4c4   : > { %4685 = vmatpush2.bf16.msra.mxu0 %v6738_v44  ;;  %v6818_v44 = vld [vmem:[%s7362_s17 + $0xd6c] ss:$16 sps:$4 sm:$0xff]  }
 0x4c5   : > { %4726 = vmatpush2.bf16.msra.mxu1 %v6741_v8  ;;  %4736 = vmatprep.subr.bf16.mxu0 %v6746_v13  ;;  %v6821_v8 = vld [vmem:[%s7362_s17 + $0xf6c] ss:$16 sps:$4 sm:$0xff]   ;;  %v6816_v13 = vld [vmem:[%s7362_s17 + $0xd68] ss:$16 sps:$4 sm:$0xff]  }
 0x4c6   : > { %4777 = vmatprep.subr.bf16.mxu1 %v6749_v1  ;;  %v6819_v1 = vld [vmem:[%s7362_s17 + $0xf68] ss:$16 sps:$4 sm:$0xff]  }
 0x4c7   : > { %v4442_v16 = vpop.f32.mrf.mxu0  ;;  %4687 = vmatmul.mubr.bf16.vlgmr.msra.gmra.mxu0 %v7682_v19  ;;  %v6761_v19 = vld [vmem:[%s7362_s17 + $0xeac] ss:$16 sps:$4 sm:$0xff]  }
 0x4c8   : > { %v4483_v17 = vpop.f32.mrf.mxu1  ;;  %4728 = vmatmul.mubr.bf16.vlgmr.msra.gmra.mxu1 %v7692_v24  ;;  %v4443_v20 = vadd.f32 %v4442_v16, %v7934_v5  ;;  %4737 = vmatpush1.bf16.msra.mxu0 %v6744_v14  ;;  %v6824_v14 = vld [vmem:[%s7362_s17 + $0xd4c] ss:$16 sps:$4 sm:$0xff]  }
 0x4c9   : > { %4778 = vmatpush1.bf16.msra.mxu1 %v6747_v10  ;;  %v8006_v21 = vpop.f32.mrf.mxu0  ;;  %4738 = vmatprep.subr.bf16.mxu0 %v6752_v12  ;;  %v6827_v10 = vld [vmem:[%s7362_s17 + $0xf4c] ss:$16 sps:$4 sm:$0xff]   ;;  %v6822_v12 = vld [vmem:[%s7362_s17 + $0xd48] ss:$16 sps:$4 sm:$0xff]  }
 0x4ca   : > { %v8008_v22 = vpop.f32.mrf.mxu1  ;;  %4779 = vmatprep.subr.bf16.mxu1 %v6755_v48  ;;  %v8012_v25 = vadd.f32 %v4483_v17, %v4443_v20  ;;  %4768 = vmatprep.mubr.bf16.mxu0 %v7688_v23  ;;  %v6767_v23 = vld [vmem:[%s7362_s17 + $0xe8c] ss:$16 sps:$4 sm:$0xff]   ;;  %v6825_v48 = vld [vmem:[%s7362_s17 + $0xf48] ss:$16 sps:$4 sm:$0xff]   ;;  %v4445_v20 = vadd.f32 %v8006_v21, %v7939_v7  ;;  %v1476_v7 = vsub.s32 2, %v7456_v11  ;;  %v6840_v21 = vld [vmem:[%s7370_s16 + $0x78] sm:$0xff]  }
 0x4cb   : > { %4809 = vmatprep.mubr.bf16.mxu1 %v7700_v28  ;;  %v4446_v24 = vpop.f32.mrf.mxu0  ;;  %v6762_v28 = vld [vmem:[%s7362_s17 + $0xc88] ss:$16 sps:$4 sm:$0xff]   ;;  %v6830_v16 = vld [vmem:[%s7362_s17 + $0xd2c] ss:$16 sps:$4 sm:$0xff]  }
 0x4cc   : > { %v4487_v5 = vpop.f32.mrf.mxu1  ;;  %4739 = vmatpush1.bf16.msra.mxu0 %v6750_v29  ;;  %v6833_v17 = vld [vmem:[%s7362_s17 + $0xf2c] ss:$16 sps:$4 sm:$0xff]   ;;  %v6828_v29 = vld [vmem:[%s7362_s17 + $0xd28] ss:$16 sps:$4 sm:$0xff]   ;;  %v4486_v24 = vadd.f32 %v8008_v22, %v4445_v20 }
 0x4cd   : > { %4780 = vmatpush1.bf16.msra.mxu1 %v6753_v33  ;;  %v4447_v30 = vpop.f32.mrf.mxu0  ;;  %4740 = vmatprep.subr.bf16.mxu0 %v6758_v4  ;;  %v6831_v33 = vld [vmem:[%s7362_s17 + $0xf28] ss:$16 sps:$4 sm:$0xff]   ;;  %v6836_v4 = vld [vmem:[%s7362_s17 + $0xd0c] ss:$16 sps:$4 sm:$0xff]  }
 0x4ce   : > { %v4488_v31 = vpop.f32.mrf.mxu1  ;;  %4781 = vmatprep.subr.bf16.mxu1 %v6761_v19  ;;  %v6839_v19 = vld [vmem:[%s7362_s17 + $0xf0c] ss:$16 sps:$4 sm:$0xff]   ;;  %v6834_v5 = vld [vmem:[%s7362_s17 + $0xd08] ss:$16 sps:$4 sm:$0xff]   ;;  %v1480_v30 = vsub.s32 3, %v7456_v11 }
 0x4cf   : > { %v6872_v31 = vld [vmem:[%s7368_s24] sm:$0xf]  ;;  %v6842_v22 = vld [vmem:[%s7370_s16 + $0x70] sm:$0xff]  }
 0x4d0   : > { %4741 = vmatpush1.bf16.msra.mxu0 %v6756_v26  ;;  %v6837_v26 = vld [vmem:[%s7362_s17 + $0xf08] ss:$16 sps:$4 sm:$0xff]   ;;  %s7126_s17 = smov [#allocation12]  }
 0x4d1   : > { %4782 = vmatpush1.bf16.msra.mxu1 %v6759_v27  ;;  %4742 = vmatprep.subr.bf16.mxu0 %v6764_v32  ;;  %v4819_v27 = vmax.f32 %v4486_v24, 0.0  ;;  %v1477_v32 = vrot.slane %v6872_v31, %v1476_v7  ;;  %v6871_v7 = vld [vmem:[%s7370_s16 + $0x80] sm:$0xff]   ;;  %s5172_s24 = sshll.u32 %s7126_s17, 4  ;;  %s5173_s24 = int_to_ptr.vmem [resolvable:$true] %s5172_s24 }
 0x4d2   : > { %4783 = vmatprep.subr.bf16.mxu1 %v6767_v23  ;;  %v6841_v23 = vld [vmem:[%s7370_s16 + $0x38] sm:$0xff]   ;;  %p7042_p11 = scmp.lt.s32.totalorder %s5173_s24, %s5173_s24 }
 0x4d4   : > { %4743 = vmatpush1.bf16.msra.mxu0 %v6762_v28  ;;  %v4823_v28 = vpack.c.bf16 %v4819_v27, %v4819_v27 }
 0x4d5   : > { %4784 = vmatpush1.bf16.msra.mxu1 %v6765_v34  ;;  %4744 = vmatprep.subr.bf16.mxu0 %v6770_v35  ;;  %v1481_v34 = vrot.slane %v6872_v31, %v1480_v30 }
 0x4d6   : > { %4785 = vmatprep.subr.bf16.mxu1 %v6773_v36 }
 0x4d8   : > { %4745 = vmatpush1.bf16.msra.mxu0 %v6768_v37  ;;  %v6843_v37 = vld [vmem:[%s7370_s16 + $0x30] sm:$0xff]  }
 0x4d9   : > { %4786 = vmatpush1.bf16.msra.mxu1 %v6771_v38  ;;  %4746 = vmatprep.subr.bf16.mxu0 %v6776_v40 }
 0x4da   : > { %4787 = vmatprep.subr.bf16.mxu1 %v6779_v41  ;;  %v6844_v41 = vld [vmem:[%s7370_s16 + $0x68] sm:$0xff]  }
 0x4dc   : > { %4747 = vmatpush1.bf16.msra.mxu0 %v6774_v42 }
 0x4dd   : > { %4788 = vmatpush1.bf16.msra.mxu1 %v6777_v45  ;;  %4748 = vmatprep.subr.bf16.mxu0 %v6782_v47 }
 0x4de   : > { %4789 = vmatprep.subr.bf16.mxu1 %v6785_v46 }
 0x4e0   : > { %4749 = vmatpush1.bf16.msra.mxu0 %v6780_v51  ;;  %v6846_v51 = vld [vmem:[%s7370_s16 + $0x60] sm:$0xff]  }
 0x4e1   : > { %4790 = vmatpush1.bf16.msra.mxu1 %v6783_v6  ;;  %4750 = vmatprep.subr.bf16.mxu0 %v6788_v49 }
 0x4e2   : > { %4791 = vmatprep.subr.bf16.mxu1 %v6791_v18  ;;  %v6856_v18 = vld [vmem:[%s7370_s16 + $0xf8] sm:$0xff]  }
 0x4e4   : > { %4751 = vmatpush1.bf16.msra.mxu0 %v6786_v15  ;;  %v6857_v15 = vld [vmem:[%s7370_s16 + $0xb8] sm:$0xff]  }
 0x4e5   : > { %4792 = vmatpush1.bf16.msra.mxu1 %v6789_v50  ;;  %4752 = vmatprep.subr.bf16.mxu0 %v6794_v56  ;;  %v6858_v50 = vld [vmem:[%s7370_s16 + $0xf0] sm:$0xff]   ;;  %v6847_v56 = vld [vmem:[%s7370_s16 + $0x20] sm:$0xff]  }
 0x4e6   : > { %4793 = vmatprep.subr.bf16.mxu1 %v6797_v9  ;;  %v6859_v9 = vld [vmem:[%s7370_s16 + $0xb0] sm:$0xff]  }
 0x4e8   : > { %4753 = vmatpush2.bf16.msra.mxu0 %v6792_v53  ;;  %v6848_v53 = vld [vmem:[%s7370_s16 + $0x58] sm:$0xff]  }
 0x4e9   : > { %4794 = vmatpush2.bf16.msra.mxu1 %v6795_v54  ;;  %4754 = vmatprep.subr.bf16.mxu0 %v6800_v55  ;;  %v6860_v54 = vld [vmem:[%s7370_s16 + $0xe8] sm:$0xff]   ;;  %v6849_v55 = vld [vmem:[%s7370_s16 + $0x18] sm:$0xff]  }
 0x4ea   : > { %4795 = vmatprep.subr.bf16.mxu1 %v6803_v57  ;;  %v6861_v57 = vld [vmem:[%s7370_s16 + $0xa8] sm:$0xff]  }
 0x4ec   : > { %4755 = vmatpush2.bf16.msra.mxu0 %v6798_v58  ;;  %v6850_v58 = vld [vmem:[%s7370_s16 + $0x50] sm:$0xff]  }
 0x4ed   : > { %4796 = vmatpush2.bf16.msra.mxu1 %v6801_v60  ;;  %4756 = vmatprep.subr.bf16.mxu0 %v6806_v61  ;;  %v6862_v60 = vld [vmem:[%s7370_s16 + $0xe0] sm:$0xff]   ;;  %v6851_v61 = vld [vmem:[%s7370_s16 + $0x10] sm:$0xff]  }
 0x4ee   : > { %4797 = vmatprep.subr.bf16.mxu1 %v6809_v62  ;;  %v6863_v62 = vld [vmem:[%s7370_s16 + $0xa0] sm:$0xff]  }
 0x4f0   : > { %4757 = vmatpush2.bf16.msra.mxu0 %v6804_v0  ;;  %v6852_v0 = vld [vmem:[%s7370_s16 + $0x48] sm:$0xff]  }
 0x4f1   : > { %4798 = vmatpush2.bf16.msra.mxu1 %v6807_v39  ;;  %4758 = vmatprep.subr.bf16.mxu0 %v6812_v2  ;;  %v6864_v39 = vld [vmem:[%s7370_s16 + $0xd8] sm:$0xff]   ;;  %v6853_v2 = vld [vmem:[%s7370_s16 + $0x8] sm:$0xff]  }
 0x4f2   : > { %4799 = vmatprep.subr.bf16.mxu1 %v6815_v3  ;;  %v6865_v3 = vld [vmem:[%s7370_s16 + $0x98] sm:$0xff]  }
 0x4f4   : > { %4759 = vmatpush2.bf16.msra.mxu0 %v6810_v59  ;;  %v6854_v59 = vld [vmem:[%s7370_s16 + $0x40] sm:$0xff]  }
 0x4f5   : > { %4800 = vmatpush2.bf16.msra.mxu1 %v6813_v63  ;;  %4760 = vmatprep.subr.bf16.mxu0 %v6818_v44  ;;  %v6855_v63 = vld [vmem:[%s7370_s16] sm:$0xff]   ;;  %v4818_v44 = vmax.f32 %v8012_v25, 0.0  ;;  %v6869_v25 = vld [vmem:[%s7370_s16 + $0x88] sm:$0xff]  }
 0x4f6   : > { %4801 = vmatprep.subr.bf16.mxu1 %v6821_v8 }
 0x4f7   : > { %v4822_v8 = vpack.c.bf16 %v4818_v44, %v4818_v44 }
 0x4f8   : > { %4761 = vmatpush2.bf16.msra.mxu0 %v6816_v13  ;;  %v6866_v13 = vld [vmem:[%s7370_s16 + $0xd0] sm:$0xff]  }
 0x4f9   : > { %4802 = vmatpush2.bf16.msra.mxu1 %v6819_v1  ;;  %4762 = vmatprep.subr.bf16.mxu0 %v6824_v14  ;;  %v6867_v1 = vld [vmem:[%s7370_s16 + $0x90] sm:$0xff]  }
 0x4fa   : > { %4803 = vmatprep.subr.bf16.mxu1 %v6827_v10 }
 0x4fc   : > { %4763 = vmatpush2.bf16.msra.mxu0 %v6822_v12 }
 0x4fd   : > { %4804 = vmatpush2.bf16.msra.mxu1 %v6825_v48  ;;  %4764 = vmatprep.subr.bf16.mxu0 %v6830_v16 }
 0x4fe   : > { %4805 = vmatprep.subr.bf16.mxu1 %v6833_v17  ;;  %v6868_v17 = vld [vmem:[%s7370_s16 + $0xc8] sm:$0xff]  }
 0x500   : > { %4765 = vmatpush2.bf16.msra.mxu0 %v6828_v29 }
 0x501   : > { %4806 = vmatpush2.bf16.msra.mxu1 %v6831_v33  ;;  %4766 = vmatprep.subr.bf16.mxu0 %v6836_v4 }
 0x502   : > { %4807 = vmatprep.subr.bf16.mxu1 %v6839_v19 }
 0x504   : > { %4767 = vmatpush2.bf16.msra.mxu0 %v6834_v5 }
 0x505   : > { %4808 = vmatpush2.bf16.msra.mxu1 %v6837_v26  ;;  %5894 = vmatprep.subr.bf16.mxu0 %v6840_v21  ;;  %v6870_v26 = vld [vmem:[%s7370_s16 + $0xc0] sm:$0xff]  }
 0x506   : > { %5916 = vmatprep.subr.bf16.mxu1 %v6856_v18 }
 0x507   : > { %v4524_v35 = vpop.f32.mrf.mxu0  ;;  %4769 = vmatmul.mubr.bf16.vlgmr.msra.gmra.mxu0 %v7766_v43 }
 0x508   : > { %v4565_v36 = vpop.f32.mrf.mxu1  ;;  %4810 = vmatmul.mubr.bf16.vlgmr.msra.gmra.mxu1 %v7775_v52  ;;  %v4525_v11 = vadd.f32 %v4524_v35, %v1477_v32  ;;  %5895 = vmatpush3.bf16.msra.mxu0 %v6841_v23  ;;  %v6845_v52 = vld [vmem:[%s7370_s16 + $0x28] sm:$0xff]   ;;  %s7035_s16 = scalar_lea.vmem %s5173_s24, 32 }
 0x509   : > { %5115 = vmatprep.mubr.bf16.mxu0 %v4823_v28  ;;  %v4526_v38 = vpop.f32.mrf.mxu0  ;;  %5896 = vmatprep.subr.bf16.mxu0 %v6842_v22  ;;  %p7036_p10 = scmp.ne.s32.totalorder %s5173_s24, %s7035_s16  ;;  %p7043_p5 = scmp.lt.s32.totalorder %s7035_s16, %s7035_s16 }
 0x50a   : > { %v4567_v40 = vpop.f32.mrf.mxu1  ;;  %v4566_v42 = vadd.f32 %v4565_v36, %v4525_v11  ;;  %v4527_v45 = vadd.f32 %v4526_v38, %v1481_v34  ;;  %5917 = vmatpush3.bf16.msra.mxu1 %v6857_v15 }
 0x50b   : > { %v4528_v47 = vpop.f32.mrf.mxu0  ;;  %5918 = vmatprep.subr.bf16.mxu1 %v6858_v50  ;;  %p7037_p6 = pnand %p7036_p10, %p5994_p3  ;;  %p7044_p4 = por %p7043_p5, %p7042_p11 }
 0x50c   : > { %v4569_v43 = vpop.f32.mrf.mxu1  ;;  %v4568_v46 = vadd.f32 %v4567_v40, %v4527_v45  ;;  %5897 = vmatpush3.bf16.msra.mxu0 %v6843_v37 }
 0x50d   : > { %v4529_v6 = vpop.f32.mrf.mxu0  ;;  %5898 = vmatprep.subr.bf16.mxu0 %v6844_v41  ;;  %p7038_p7 = pneg %p7037_p6 }
 0x50e   : > { %v4570_v49 = vpop.f32.mrf.mxu1  ;;  %5919 = vmatpush3.bf16.msra.mxu1 %v6859_v9 }
 0x50f   : > { %5920 = vmatprep.subr.bf16.mxu1 %v6860_v54  ;;  %p7045_p9 = pnand %p7044_p4, %p7038_p7 }
 0x510   : > { %5899 = vmatpush3.bf16.msra.mxu0 %v6845_v52 }
 0x511   : > { %5900 = vmatprep.subr.bf16.mxu0 %v6846_v51 }
 0x512   : > { %5921 = vmatpush3.bf16.msra.mxu1 %v6861_v57 }
 0x513   : > { %5922 = vmatprep.subr.bf16.mxu1 %v6862_v60 }
 0x514   : > { %5901 = vmatpush3.bf16.msra.mxu0 %v6847_v56 }
 0x515   : > { %5902 = vmatprep.subr.bf16.mxu0 %v6848_v53 }
 0x516   : > { %5923 = vmatpush3.bf16.msra.mxu1 %v6863_v62  ;;  %v4826_v62 = vld [vmem:[#allocation12] sm:$0x3] }
 0x517   : > { %5924 = vmatprep.subr.bf16.mxu1 %v6864_v39 }
 0x518   : > { %5903 = vmatpush3.bf16.msra.mxu0 %v6849_v55 }
 0x519   : > { %5904 = vmatprep.subr.bf16.mxu0 %v6850_v58 }
 0x51a   : > { %5925 = vmatpush3.bf16.msra.mxu1 %v6865_v3 }
 0x51b   : > { %5926 = vmatprep.subr.bf16.mxu1 %v6866_v13 }
 0x51c   : > { %5905 = vmatpush3.bf16.msra.mxu0 %v6851_v61 }
 0x51d   : > { %5906 = vmatprep.subr.bf16.mxu0 %v6852_v0 }
 0x51e   : > { %5927 = vmatpush3.bf16.msra.mxu1 %v6867_v1 }
 0x51f   : > { %5928 = vmatprep.subr.bf16.mxu1 %v6868_v17 }
 0x520   : > { %5907 = vmatpush3.bf16.msra.mxu0 %v6853_v2 }
 0x521   : > { %5908 = vmatprep.subr.bf16.mxu0 %v6854_v59 }
 0x522   : > { %5929 = vmatpush3.bf16.msra.mxu1 %v6869_v25 }
 0x523   : > { %5930 = vmatprep.subr.bf16.mxu1 %v6870_v26 }
 0x524   : > { %5909 = vmatpush3.bf16.msra.mxu0 %v6855_v63 }
 0x526   : > { %5931 = vmatpush3.bf16.msra.mxu1 %v6871_v7 }
 0x527   : > { %5116 = vmatmul.mubr.bf16.vlgmr.msra.gmra.mxu0 %v4822_v8 }
 0x547   : > { %v4606_v14 = vpop.f32.mrf.mxu0 }
 0x548   : > { %v4647_v10 = vpop.f32.mrf.mxu1  ;;  %v4607_v12 = vadd.f32 %v4606_v14, %v4566_v42 }
 0x549   : > { %v4608_v48 = vpop.f32.mrf.mxu0 }
 0x54a   : > { %v4649_v16 = vpop.f32.mrf.mxu1  ;;  %v4648_v20 = vadd.f32 %v4647_v10, %v4607_v12  ;;  %v4609_v29 = vadd.f32 %v4608_v48, %v4568_v46 }
 0x54b   : > { %v4610_v33 = vpop.f32.mrf.mxu0 }
 0x54c   : > { %v4651_v4 = vpop.f32.mrf.mxu1  ;;  %v4650_v19 = vadd.f32 %v4649_v16, %v4609_v29 }
 0x54d   : > { %v4611_v24 = vpop.f32.mrf.mxu0 }
 0x54e   : > { %v4652_v5 = vpop.f32.mrf.mxu1 }
 0x587   : > { %v4688_v21 = vpop.f32.mrf.mxu0 }
 0x588   : > { %v4729_v27 = vpop.f32.mrf.mxu1  ;;  %v4689_v30 = vadd.f32 %v4688_v21, %v4648_v20 }
 0x589   : > { %v4690_v31 = vpop.f32.mrf.mxu0 }
 0x58a   : > { %v4731_v32 = vpop.f32.mrf.mxu1  ;;  %v4730_v23 = vadd.f32 %v4729_v27, %v4689_v30  ;;  %v4691_v36 = vadd.f32 %v4690_v31, %v4650_v19 }
 0x58b   : > { %v4692_v22 = vpop.f32.mrf.mxu0 }
 0x58c   : > { %v4733_v28 = vpop.f32.mrf.mxu1  ;;  %v4732_v38 = vadd.f32 %v4731_v32, %v4691_v36 }
 0x58d   : > { %v4693_v34 = vpop.f32.mrf.mxu0 }
 0x58e   : > { %v4734_v35 = vpop.f32.mrf.mxu1 }
 0x5c7   : > { %v4770_v11 = vpop.f32.mrf.mxu0 }
 0x5c8   : > { %v4811_v37 = vpop.f32.mrf.mxu1  ;;  %v4771_v40 = vadd.f32 %v4770_v11, %v4730_v23 }
 0x5c9   : > { %v4772_v41 = vpop.f32.mrf.mxu0 }
 0x5ca   : > { %v4813_v42 = vpop.f32.mrf.mxu1  ;;  %v4812_v45 = vadd.f32 %v4811_v37, %v4771_v40  ;;  %v4773_v47 = vadd.f32 %v4772_v41, %v4732_v38 }
 0x5cb   : > { %v4774_v43 = vpop.f32.mrf.mxu0 }
 0x5cc   : > { %v4815_v46 = vpop.f32.mrf.mxu1  ;;  %v4814_v52 = vadd.f32 %v4813_v42, %v4773_v47  ;;  %v4820_v51 = vmax.f32 %v4812_v45, 0.0 }
 0x5cd   : > { %v4775_v6 = vpop.f32.mrf.mxu0 }
 0x5ce   : > { %v4816_v49 = vpop.f32.mrf.mxu1  ;;  %v4821_v18 = vmax.f32 %v4814_v52, 0.0  ;;  %v4824_v50 = vpack.c.bf16 %v4820_v51, %v4820_v51 }
 0x5d0   : > { %v4825_v15 = vpack.c.bf16 %v4821_v18, %v4821_v18 }
 0x5d2   : > { %5155 = vmatprep.mubr.bf16.mxu1 %v4825_v15 }
 0x5d3   : > { %5156 = vmatmul.mubr.bf16.vlgmr.msra.gmra.mxu1 %v4824_v50 }
 0x5e7   : > { %v5910_v56 = vpop.f32.mrf.mxu0 }
 0x5e9   : > { %v5911_v9 = vpop.f32.mrf.mxu0 }
 0x5ea   : > { %v5912_v53 = vadd.f32 %v5911_v9, %v5910_v56 }
 0x5eb   : > { %v5913_v54 = vpop.f32.mrf.mxu0 }
 0x5ed   : > { %v5914_v55 = vpop.f32.mrf.mxu0 }
 0x693   : > { %v5932_v57 = vpop.f32.mrf.mxu1 }
 0x695   : > { %v5933_v58 = vpop.f32.mrf.mxu1 }
 0x696   : > { %v5934_v60 = vadd.f32 %v5933_v58, %v5932_v57 }
 0x697   : > { %v5935_v61 = vpop.f32.mrf.mxu1 }
 0x698   : > { %v5158_v0 = vadd.f32 %v5934_v60, %v5912_v53 }
 0x699   : > { %v5936_v39 = vpop.f32.mrf.mxu1 }
 0x69a   : > { %v5163_v2 = vadd.f32 %v5158_v0, %v4826_v62 }
 0x69c   : > { %5164 = vst [vmem:[#allocation12] sm:$0x3] %v5163_v2 }
 0x69d   : > { %7048 = shalt.err (!%p7045_p9)
}
 0x69e   : > { %5964 = dma.vmem_to_hbm [thread:$0]  (%p5994_p3), %s5173_s24, 32, %s8143_s7, [#allocation5]  }
 0x69f   : > { %7092 = dma.done.wait (%p5994_p3), [#allocation5], 32  }
 0x6a0   : > { %7094 = vsyncadd (%p5994_p3), [#allocation5], 4294967264 }
 0x6a1 PF: > { %s8180_s27 = sld [smem:[#allocation19_spill]]  ;;  %s8183_s24 = smov %s7101_s25 }
 0x6a2   : > { %s8181_s3 = sld [smem:[#allocation18_spill]] }
 0x6a3   : > { %s8182_s26 = sld [smem:[#allocation20_spill]] }
 0x6a7   : > { %p17_p8 = scmp.ge.s32.totalorder %s8180_s27, 4  }
 0x6a8   : > { %s8184_s25 = smov %s8181_s3 }
 0x6a9   :  { %19 = sbr.rel (!%p17_p8) target bundleno = 7 (0x7), region = 122 }
 0x6ae   :  { %5185 = vsyncpa [#allocation4], 1 }
 0x6af   :  { %5187 = vsyncpa [#allocation4 + $0x1], 1 }
 0x6b0   :  { %5188 = vsyncpa [#allocation7], 1 }
 0x6b1   :  { %5189 = vsyncpa [#allocation5], 1 }
 0x6b2   :  { %5191 = vsyncpa [#allocation5 + $0x1], 1 }

</bundles_post_ra>
